<compile_context>
chip_gen: v6e
topology: v6e:2x2x1
jax: 0.10.0
libtpu: 0.0.40
codegen_flags: <defaults>
</compile_context>

<pallas_src>
import functools
import math

import jax
import jax.numpy as jnp
from jax.experimental import pallas as pl
from jax.experimental.pallas import tpu as pltpu

BN_EPS = 1e-5


# ---------------------------------------------------------------------------
# Fused kernel: conv1(1x1)+BN+ReLU -> conv2(3x3)+BN+ReLU -> conv3(1x1)+BN
#               -> TripletAttention -> +residual -> ReLU        (one batch/step)
# ---------------------------------------------------------------------------
def _fused_kernel(x_ref, w1_ref, w2_ref, w3_ref, ghw_ref, gcw_ref, ghc_ref,
                  o_ref, h1p_ref, phw_ref, pcw_ref, phc_ref,
                  *, H, W, Cin, planes, Cexp):
    x = x_ref[0].astype(jnp.float32)                         # (H, W, Cin) residual, f32

    # ---- conv1 (1x1) + folded BN1 + ReLU ---------------------------------
    x_mat = x.reshape(H * W, Cin).astype(jnp.bfloat16)
    h1 = jnp.maximum(
        jnp.dot(x_mat, w1_ref[...],
                preferred_element_type=jnp.float32), 0.0)    # (H*W, planes) f32

    # ---- conv2 (3x3, stride 1, pad 1) + folded BN2 + ReLU ----------------
    # Halo built in a persistent VMEM scratch; border re-zeroed every step so
    # the kernel stays correct under megacore partitioning of the batch axis.
    h1p_ref[0:1, :, :] = jnp.zeros((1, W + 2, planes), jnp.float32)
    h1p_ref[H + 1:H + 2, :, :] = jnp.zeros((1, W + 2, planes), jnp.float32)
    h1p_ref[:, 0:1, :] = jnp.zeros((H + 2, 1, planes), jnp.float32)
    h1p_ref[:, W + 1:W + 2, :] = jnp.zeros((H + 2, 1, planes), jnp.float32)
    h1p_ref[1:1 + H, 1:1 + W, :] = h1.reshape(H, W, planes)

    # im2col: one matmul with K = 9*planes instead of 9 tiny-K matmuls.
    taps = [h1p_ref[ky:ky + H, kx:kx + W, :]
            for ky in range(3) for kx in range(3)]
    im2col = jnp.concatenate(taps, axis=2).reshape(H * W, 9 * planes)
    h2 = jnp.maximum(
        jnp.dot(im2col.astype(jnp.bfloat16), w2_ref[...],
                preferred_element_type=jnp.float32), 0.0)    # (H*W, planes) f32

    # ---- conv3 (1x1) + folded BN3 (no ReLU) ------------------------------
    y = jnp.dot(h2.astype(jnp.bfloat16), w3_ref[...],
                preferred_element_type=jnp.float32).reshape(H, W, Cexp)  # f32

    # ---- TripletAttention: three Z-pool gates (7x7, 2->1 conv, pad 3) ----
    # Each gate = ONE MXU matmul: the 7 row-shifted padded-plane views are
    # stacked along the contracting axis (K = 14Q) against the banded-Toeplitz
    # weight (14Q, Q).  Column (lane-axis) padding is folded into the Toeplitz.
    def gate(plane_ref, pmax, pmean, w_ref, P, Q):
        plane_ref[0:3, :] = jnp.zeros((3, 2 * Q), jnp.float32)
        plane_ref[P + 3:P + 6, :] = jnp.zeros((3, 2 * Q), jnp.float32)
        plane_ref[3:3 + P, 0:Q] = pmax
        plane_ref[3:3 + P, Q:2 * Q] = pmean
        stk = jnp.concatenate([plane_ref[a:a + P, :] for a in range(7)],
                              axis=1)                        # (P, 14Q)
        g = jnp.dot(stk.astype(jnp.bfloat16), w_ref[...],
                    preferred_element_type=jnp.float32)      # (P, Q) f32
        # gate BN folded into w_ref; 1/3 combine factor applied on the small plane
        return jax.nn.sigmoid(g) * (1.0 / 3.0)

    s_hw = gate(phw_ref, jnp.max(y, axis=2), jnp.mean(y, axis=2), ghw_ref, H, W)
    s_cw = gate(pcw_ref, jnp.max(y, axis=0), jnp.mean(y, axis=0), gcw_ref, W, Cexp)
    s_hc = gate(phc_ref, jnp.max(y, axis=1), jnp.mean(y, axis=1), ghc_ref, H, Cexp)

    # factored combine + residual + final ReLU (all f32 VPU)
    gsum = s_hw[:, :, None] + s_cw[None, :, :] + s_hc[:, None, :]
    o_ref[0] = jnp.maximum(y * gsum + x, 0.0).astype(o_ref.dtype)


# ---------------------------------------------------------------------------
# Wrapper-side weight preparation
# ---------------------------------------------------------------------------
def _toeplitz_cols(k77, Q):
    # T[a, j, q] = k77[a, j - q + 3] for |j - q| <= 3, else 0   (7x7 conv, pad 3)
    j = jnp.arange(Q)[:, None]
    q = jnp.arange(Q)[None, :]
    d = j - q + 3
    valid = ((d >= 0) & (d <= 6)).astype(jnp.float32)
    return k77[:, jnp.clip(d, 0, 6)] * valid[None]           # (7, Q, Q)


def _gate_weights(kmax, kmean, Q, scale):
    # (14Q, Q): row block a*2Q..(a+1)*2Q holds tap a; within a block the first Q
    # rows contract the max-pool half, the next Q the mean half.  bf16 for MXU.
    w = jnp.concatenate([_toeplitz_cols(kmax, Q),
                         _toeplitz_cols(kmean, Q)], axis=1)  # (7, 2Q, Q)
    return (w * scale).reshape(14 * Q, Q).astype(jnp.bfloat16)


def triplet_bottleneck_forward(x_nchw, p):
    # layout: NCHW at the boundary (PyTorch); NHWC inside the kernel.
    x = jnp.transpose(x_nchw, (0, 2, 3, 1)).astype(jnp.float32)       # NHWC
    N, H, W, Cin = x.shape
    planes = p["w1"].shape[0]
    Cexp = p["w3"].shape[0]
    assert Cin == Cexp, "downsample=None requires inplanes == planes * expansion"

    bn_scale = 1.0 / math.sqrt(1.0 + BN_EPS)    # folded eval-mode BN, fresh stats

    # bf16 MXU operands (f32 accumulation in-kernel).
    w1 = (p["w1"][:, :, 0, 0].T * bn_scale).astype(jnp.bfloat16)       # (Cin, planes)
    w2 = (jnp.transpose(p["w2"], (2, 3, 1, 0)).reshape(9 * planes, planes)
          * bn_scale).astype(jnp.bfloat16)                             # (9*planes, planes)
    w3 = (p["w3"][:, :, 0, 0].T * bn_scale).astype(jnp.bfloat16)       # (planes, Cexp)

    g_hw = _gate_weights(p["wg_hw"][0, 0], p["wg_hw"][0, 1], W, bn_scale)
    # cw gate is evaluated on the transposed (W, C) plane -> transposed kernels
    g_cw = _gate_weights(p["wg_cw"][0, 0].T, p["wg_cw"][0, 1].T, Cexp, bn_scale)
    g_hc = _gate_weights(p["wg_hc"][0, 0], p["wg_hc"][0, 1], Cexp, bn_scale)

    out = pl.pallas_call(
        functools.partial(_fused_kernel, H=H, W=W, Cin=Cin,
                          planes=planes, Cexp=Cexp),
        out_shape=jax.ShapeDtypeStruct((N, H, W, Cexp), x.dtype),
        grid_spec=pltpu.PrefetchScalarGridSpec(
            num_scalar_prefetch=0,
            grid=(N,),
            in_specs=[
                pl.BlockSpec((1, H, W, Cin), lambda n: (n, 0, 0, 0)),
                pl.BlockSpec((Cin, planes), lambda n: (0, 0)),
                pl.BlockSpec((9 * planes, planes), lambda n: (0, 0)),
                pl.BlockSpec((planes, Cexp), lambda n: (0, 0)),
                pl.BlockSpec((14 * W, W), lambda n: (0, 0)),
                pl.BlockSpec((14 * Cexp, Cexp), lambda n: (0, 0)),
                pl.BlockSpec((14 * Cexp, Cexp), lambda n: (0, 0)),
            ],
            out_specs=pl.BlockSpec((1, H, W, Cexp), lambda n: (n, 0, 0, 0)),
            scratch_shapes=[
                pltpu.VMEM((H + 2, W + 2, planes), jnp.float32),   # 3x3 halo
                pltpu.VMEM((H + 6, 2 * W), jnp.float32),           # hw gate plane
                pltpu.VMEM((W + 6, 2 * Cexp), jnp.float32),        # cw gate plane
                pltpu.VMEM((H + 6, 2 * Cexp), jnp.float32),        # hc gate plane
            ],
        ),
        compiler_params=pltpu.CompilerParams(
            dimension_semantics=("parallel",),        # batch axis -> megacore-splittable
            vmem_limit_bytes=48 * 1024 * 1024,        # > 32 MiB default, < v7x 64 MiB phys
        ),
    )(x, w1, w2, w3, g_hw, g_cw, g_hc)
    return jnp.transpose(out, (0, 3, 1, 2))                 # back to NCHW


# ---------------------------------------------------------------------------
# Parameter init (deterministic, shapes per the PyTorch __init__)
# ---------------------------------------------------------------------------
def init_params(key, inplanes, planes):
    expansion = 4
    ks = jax.random.split(key, 6)

    def w(k, shape, fan_in):
        bound = 1.0 / math.sqrt(fan_in)
        return jax.random.uniform(k, shape, jnp.float32, -bound, bound)

    return {
        "w1": w(ks[0], (planes, inplanes, 1, 1), inplanes),              # conv1
        "w2": w(ks[1], (planes, planes, 3, 3), planes * 9),              # conv2
        "w3": w(ks[2], (planes * expansion, planes, 1, 1), planes),      # conv3
        "wg_hw": w(ks[3], (1, 2, 7, 7), 2 * 49),                         # trip.hw
        "wg_cw": w(ks[4], (1, 2, 7, 7), 2 * 49),                         # trip.cw
        "wg_hc": w(ks[5], (1, 2, 7, 7), 2 * 49),                         # trip.hc
        # BN layers use fresh PyTorch defaults (gamma=1, beta=0, mean=0, var=1).
    }


if __name__ == "__main__":
    key = jax.random.PRNGKey(0)
    k_p, k_x = jax.random.split(key)

    N, planes, H, W = 2, 4, 16, 16
    inplanes = planes * 4          # residual add valid with downsample=None

    params = init_params(k_p, inplanes, planes)
    x = jax.random.normal(k_x, (N, inplanes, H, W), jnp.float32)

    out = jax.jit(triplet_bottleneck_forward)(x, params)
    jax.block_until_ready(out)
    assert out.shape == (N, inplanes, H, W)
    assert bool(jnp.all(jnp.isfinite(out)))
    print("KERNEL_OK")
</pallas_src>

<mosaic_0001>
module attributes {stable_mosaic.version = 11 : i64} {
  func.func @_fused_kernel(%arg0: i32, %arg1: memref<1x16x16x16xf32, #tpu.memory_space<vmem>>, %arg2: memref<16x4xbf16, #tpu.memory_space<vmem>>, %arg3: memref<36x4xbf16, #tpu.memory_space<vmem>>, %arg4: memref<4x16xbf16, #tpu.memory_space<vmem>>, %arg5: memref<224x16xbf16, #tpu.memory_space<vmem>>, %arg6: memref<224x16xbf16, #tpu.memory_space<vmem>>, %arg7: memref<224x16xbf16, #tpu.memory_space<vmem>>, %arg8: memref<1x16x16x16xf32, #tpu.memory_space<vmem>>, %arg9: memref<18x18x4xf32, #tpu.memory_space<vmem>>, %arg10: memref<22x32xf32, #tpu.memory_space<vmem>>, %arg11: memref<22x32xf32, #tpu.memory_space<vmem>>, %arg12: memref<22x32xf32, #tpu.memory_space<vmem>>) attributes {dimension_semantics = [#tpu.dimension_semantics<parallel>], iteration_bounds = array<i64: 2>, scalar_prefetch = 0 : i64, scratch_operands = 4 : i64, tpu.core_type = #tpu.core_type<tc>, window_params = [{transform_indices = @transform_0, window_bounds = array<i64: 1, 16, 16, 16>}, {pipeline_mode = #tpu.pipeline_mode<synchronous>, transform_indices = @transform_1, window_bounds = array<i64: 16, 4>}, {pipeline_mode = #tpu.pipeline_mode<synchronous>, transform_indices = @transform_2, window_bounds = array<i64: 36, 4>}, {pipeline_mode = #tpu.pipeline_mode<synchronous>, transform_indices = @transform_3, window_bounds = array<i64: 4, 16>}, {pipeline_mode = #tpu.pipeline_mode<synchronous>, transform_indices = @transform_4, window_bounds = array<i64: 224, 16>}, {pipeline_mode = #tpu.pipeline_mode<synchronous>, transform_indices = @transform_5, window_bounds = array<i64: 224, 16>}, {pipeline_mode = #tpu.pipeline_mode<synchronous>, transform_indices = @transform_6, window_bounds = array<i64: 224, 16>}, {transform_indices = @transform_7, window_bounds = array<i64: 1, 16, 16, 16>}]} {
    %c0 = arith.constant 0 : index
    %c0_0 = arith.constant 0 : index
    %c0_1 = arith.constant 0 : index
    %c0_2 = arith.constant 0 : index
    %0 = vector.load %arg1[%c0, %c0_0, %c0_1, %c0_2] : memref<1x16x16x16xf32, #tpu.memory_space<vmem>>, vector<1x16x16x16xf32>
    %1 = vector.shape_cast %0 : vector<1x16x16x16xf32> to vector<16x16x16xf32>
    %2 = vector.shape_cast %1 : vector<16x16x16xf32> to vector<256x16xf32>
    %3 = arith.truncf %2 : vector<256x16xf32> to vector<256x16xbf16>
    %c0_3 = arith.constant 0 : index
    %c0_4 = arith.constant 0 : index
    %4 = vector.load %arg2[%c0_3, %c0_4] : memref<16x4xbf16, #tpu.memory_space<vmem>>, vector<16x4xbf16>
    %cst = arith.constant dense<0.000000e+00> : vector<256x4xf32>
    %5 = tpu.matmul %3, %4, %cst {dimension_numbers = #tpu.dot_dimension_numbers<[1], [0], [0], [1], [0, 0, 1, 1], [], []>} : vector<256x16xbf16>, vector<16x4xbf16>, vector<256x4xf32> -> vector<256x4xf32>
    %cst_5 = arith.constant 0.000000e+00 : f32
    %6 = vector.broadcast %cst_5 : f32 to vector<256x4xf32>
    %7 = arith.maximumf %5, %6 : vector<256x4xf32>
    %cst_6 = arith.constant 0.000000e+00 : f32
    %8 = vector.broadcast %cst_6 : f32 to vector<1x18x4xf32>
    %c0_7 = arith.constant 0 : index
    %c0_8 = arith.constant 0 : index
    %c0_9 = arith.constant 0 : index
    %9 = vector.load %arg9[%c0_7, %c0_8, %c0_9] : memref<18x18x4xf32, #tpu.memory_space<vmem>>, vector<1x18x4xf32>
    tpu.vector_store %arg9[%c0_7, %c0_8, %c0_9], %8 {strides = array<i32>} : memref<18x18x4xf32, #tpu.memory_space<vmem>>, vector<1x18x4xf32>,
    %cst_10 = arith.constant 0.000000e+00 : f32
    %10 = vector.broadcast %cst_10 : f32 to vector<1x18x4xf32>
    %c17 = arith.constant 17 : index
    %c0_11 = arith.constant 0 : index
    %c0_12 = arith.constant 0 : index
    %11 = vector.load %arg9[%c17, %c0_11, %c0_12] : memref<18x18x4xf32, #tpu.memory_space<vmem>>, vector<1x18x4xf32>
    tpu.vector_store %arg9[%c17, %c0_11, %c0_12], %10 {strides = array<i32>} : memref<18x18x4xf32, #tpu.memory_space<vmem>>, vector<1x18x4xf32>,
    %cst_13 = arith.constant 0.000000e+00 : f32
    %12 = vector.broadcast %cst_13 : f32 to vector<18x1x4xf32>
    %c0_14 = arith.constant 0 : index
    %c0_15 = arith.constant 0 : index
    %c0_16 = arith.constant 0 : index
    %13 = vector.load %arg9[%c0_14, %c0_15, %c0_16] : memref<18x18x4xf32, #tpu.memory_space<vmem>>, vector<18x1x4xf32>
    tpu.vector_store %arg9[%c0_14, %c0_15, %c0_16], %12 {strides = array<i32>} : memref<18x18x4xf32, #tpu.memory_space<vmem>>, vector<18x1x4xf32>,
    %cst_17 = arith.constant 0.000000e+00 : f32
    %14 = vector.broadcast %cst_17 : f32 to vector<18x1x4xf32>
    %c0_18 = arith.constant 0 : index
    %c17_19 = arith.constant 17 : index
    %c0_20 = arith.constant 0 : index
    %15 = vector.load %arg9[%c0_18, %c17_19, %c0_20] : memref<18x18x4xf32, #tpu.memory_space<vmem>>, vector<18x1x4xf32>
    tpu.vector_store %arg9[%c0_18, %c17_19, %c0_20], %14 {strides = array<i32>} : memref<18x18x4xf32, #tpu.memory_space<vmem>>, vector<18x1x4xf32>,
    %16 = vector.shape_cast %7 : vector<256x4xf32> to vector<16x16x4xf32>
    %c1 = arith.constant 1 : index
    %c1_21 = arith.constant 1 : index
    %c0_22 = arith.constant 0 : index
    %17 = vector.load %arg9[%c1, %c1_21, %c0_22] : memref<18x18x4xf32, #tpu.memory_space<vmem>>, vector<16x16x4xf32>
    tpu.vector_store %arg9[%c1, %c1_21, %c0_22], %16 {strides = array<i32>} : memref<18x18x4xf32, #tpu.memory_space<vmem>>, vector<16x16x4xf32>,
    %c0_23 = arith.constant 0 : index
    %c0_24 = arith.constant 0 : index
    %c0_25 = arith.constant 0 : index
    %18 = vector.load %arg9[%c0_23, %c0_24, %c0_25] : memref<18x18x4xf32, #tpu.memory_space<vmem>>, vector<16x16x4xf32>
    %c0_26 = arith.constant 0 : index
    %c1_27 = arith.constant 1 : index
    %c0_28 = arith.constant 0 : index
    %19 = vector.load %arg9[%c0_26, %c1_27, %c0_28] : memref<18x18x4xf32, #tpu.memory_space<vmem>>, vector<16x16x4xf32>
    %c0_29 = arith.constant 0 : index
    %c2 = arith.constant 2 : index
    %c0_30 = arith.constant 0 : index
    %20 = vector.load %arg9[%c0_29, %c2, %c0_30] : memref<18x18x4xf32, #tpu.memory_space<vmem>>, vector<16x16x4xf32>
    %c1_31 = arith.constant 1 : index
    %c0_32 = arith.constant 0 : index
    %c0_33 = arith.constant 0 : index
    %21 = vector.load %arg9[%c1_31, %c0_32, %c0_33] : memref<18x18x4xf32, #tpu.memory_space<vmem>>, vector<16x16x4xf32>
    %c1_34 = arith.constant 1 : index
    %c1_35 = arith.constant 1 : index
    %c0_36 = arith.constant 0 : index
    %22 = vector.load %arg9[%c1_34, %c1_35, %c0_36] : memref<18x18x4xf32, #tpu.memory_space<vmem>>, vector<16x16x4xf32>
    %c1_37 = arith.constant 1 : index
    %c2_38 = arith.constant 2 : index
    %c0_39 = arith.constant 0 : index
    %23 = vector.load %arg9[%c1_37, %c2_38, %c0_39] : memref<18x18x4xf32, #tpu.memory_space<vmem>>, vector<16x16x4xf32>
    %c2_40 = arith.constant 2 : index
    %c0_41 = arith.constant 0 : index
    %c0_42 = arith.constant 0 : index
    %24 = vector.load %arg9[%c2_40, %c0_41, %c0_42] : memref<18x18x4xf32, #tpu.memory_space<vmem>>, vector<16x16x4xf32>
    %c2_43 = arith.constant 2 : index
    %c1_44 = arith.constant 1 : index
    %c0_45 = arith.constant 0 : index
    %25 = vector.load %arg9[%c2_43, %c1_44, %c0_45] : memref<18x18x4xf32, #tpu.memory_space<vmem>>, vector<16x16x4xf32>
    %c2_46 = arith.constant 2 : index
    %c2_47 = arith.constant 2 : index
    %c0_48 = arith.constant 0 : index
    %26 = vector.load %arg9[%c2_46, %c2_47, %c0_48] : memref<18x18x4xf32, #tpu.memory_space<vmem>>, vector<16x16x4xf32>
    %27 = tpu.concatenate %18, %19, %20, %21, %22, %23, %24, %25, %26 in 2 : vector<16x16x4xf32>, vector<16x16x4xf32>, vector<16x16x4xf32>, vector<16x16x4xf32>, vector<16x16x4xf32>, vector<16x16x4xf32>, vector<16x16x4xf32>, vector<16x16x4xf32>, vector<16x16x4xf32> -> vector<16x16x36xf32>
    %28 = vector.shape_cast %27 : vector<16x16x36xf32> to vector<256x36xf32>
    %29 = arith.truncf %28 : vector<256x36xf32> to vector<256x36xbf16>
    %c0_49 = arith.constant 0 : index
    %c0_50 = arith.constant 0 : index
    %30 = vector.load %arg3[%c0_49, %c0_50] : memref<36x4xbf16, #tpu.memory_space<vmem>>, vector<36x4xbf16>
    %cst_51 = arith.constant dense<0.000000e+00> : vector<256x4xf32>
    %31 = tpu.matmul %29, %30, %cst_51 {dimension_numbers = #tpu.dot_dimension_numbers<[1], [0], [0], [1], [0, 0, 1, 1], [], []>} : vector<256x36xbf16>, vector<36x4xbf16>, vector<256x4xf32> -> vector<256x4xf32>
    %cst_52 = arith.constant 0.000000e+00 : f32
    %32 = vector.broadcast %cst_52 : f32 to vector<256x4xf32>
    %33 = arith.maximumf %31, %32 : vector<256x4xf32>
    %34 = arith.truncf %33 : vector<256x4xf32> to vector<256x4xbf16>
    %c0_53 = arith.constant 0 : index
    %c0_54 = arith.constant 0 : index
    %35 = vector.load %arg4[%c0_53, %c0_54] : memref<4x16xbf16, #tpu.memory_space<vmem>>, vector<4x16xbf16>
    %cst_55 = arith.constant dense<0.000000e+00> : vector<256x16xf32>
    %36 = tpu.matmul %34, %35, %cst_55 {dimension_numbers = #tpu.dot_dimension_numbers<[1], [0], [0], [1], [0, 0, 1, 1], [], []>} : vector<256x4xbf16>, vector<4x16xbf16>, vector<256x16xf32> -> vector<256x16xf32>
    %37 = vector.shape_cast %36 : vector<256x16xf32> to vector<16x16x16xf32>
    %cst_56 = arith.constant dense<0xFF800000> : vector<16x16xf32>
    %38 = vector.multi_reduction <maximumf>, %37, %cst_56 [2] : vector<16x16x16xf32> to vector<16x16xf32>
    %cst_57 = arith.constant dense<0.000000e+00> : vector<16x16xf32>
    %39 = vector.multi_reduction <add>, %37, %cst_57 [2] : vector<16x16x16xf32> to vector<16x16xf32>
    %cst_58 = arith.constant 1.600000e+01 : f32
    %40 = vector.broadcast %cst_58 : f32 to vector<16x16xf32>
    %41 = arith.divf %39, %40 : vector<16x16xf32>
    %cst_59 = arith.constant 0.000000e+00 : f32
    %42 = vector.broadcast %cst_59 : f32 to vector<3x32xf32>
    %c0_60 = arith.constant 0 : index
    %c0_61 = arith.constant 0 : index
    %43 = vector.load %arg10[%c0_60, %c0_61] : memref<22x32xf32, #tpu.memory_space<vmem>>, vector<3x32xf32>
    tpu.vector_store %arg10[%c0_60, %c0_61], %42 {strides = array<i32>} : memref<22x32xf32, #tpu.memory_space<vmem>>, vector<3x32xf32>,
    %cst_62 = arith.constant 0.000000e+00 : f32
    %44 = vector.broadcast %cst_62 : f32 to vector<3x32xf32>
    %c19 = arith.constant 19 : index
    %c0_63 = arith.constant 0 : index
    %45 = vector.load %arg10[%c19, %c0_63] : memref<22x32xf32, #tpu.memory_space<vmem>>, vector<3x32xf32>
    tpu.vector_store %arg10[%c19, %c0_63], %44 {strides = array<i32>} : memref<22x32xf32, #tpu.memory_space<vmem>>, vector<3x32xf32>,
    %c3 = arith.constant 3 : index
    %c0_64 = arith.constant 0 : index
    %46 = vector.load %arg10[%c3, %c0_64] : memref<22x32xf32, #tpu.memory_space<vmem>>, vector<16x16xf32>
    tpu.vector_store %arg10[%c3, %c0_64], %38 {strides = array<i32>} : memref<22x32xf32, #tpu.memory_space<vmem>>, vector<16x16xf32>,
    %c3_65 = arith.constant 3 : index
    %c16 = arith.constant 16 : index
    %47 = vector.load %arg10[%c3_65, %c16] : memref<22x32xf32, #tpu.memory_space<vmem>>, vector<16x16xf32>
    tpu.vector_store %arg10[%c3_65, %c16], %41 {strides = array<i32>} : memref<22x32xf32, #tpu.memory_space<vmem>>, vector<16x16xf32>,
    %c0_66 = arith.constant 0 : index
    %c0_67 = arith.constant 0 : index
    %48 = vector.load %arg10[%c0_66, %c0_67] : memref<22x32xf32, #tpu.memory_space<vmem>>, vector<16x32xf32>
    %c1_68 = arith.constant 1 : index
    %c0_69 = arith.constant 0 : index
    %49 = vector.load %arg10[%c1_68, %c0_69] : memref<22x32xf32, #tpu.memory_space<vmem>>, vector<16x32xf32>
    %c2_70 = arith.constant 2 : index
    %c0_71 = arith.constant 0 : index
    %50 = vector.load %arg10[%c2_70, %c0_71] : memref<22x32xf32, #tpu.memory_space<vmem>>, vector<16x32xf32>
    %c3_72 = arith.constant 3 : index
    %c0_73 = arith.constant 0 : index
    %51 = vector.load %arg10[%c3_72, %c0_73] : memref<22x32xf32, #tpu.memory_space<vmem>>, vector<16x32xf32>
    %c4 = arith.constant 4 : index
    %c0_74 = arith.constant 0 : index
    %52 = vector.load %arg10[%c4, %c0_74] : memref<22x32xf32, #tpu.memory_space<vmem>>, vector<16x32xf32>
    %c5 = arith.constant 5 : index
    %c0_75 = arith.constant 0 : index
    %53 = vector.load %arg10[%c5, %c0_75] : memref<22x32xf32, #tpu.memory_space<vmem>>, vector<16x32xf32>
    %c6 = arith.constant 6 : index
    %c0_76 = arith.constant 0 : index
    %54 = vector.load %arg10[%c6, %c0_76] : memref<22x32xf32, #tpu.memory_space<vmem>>, vector<16x32xf32>
    %55 = tpu.concatenate %48, %49, %50, %51, %52, %53, %54 in 1 : vector<16x32xf32>, vector<16x32xf32>, vector<16x32xf32>, vector<16x32xf32>, vector<16x32xf32>, vector<16x32xf32>, vector<16x32xf32> -> vector<16x224xf32>
    %56 = arith.truncf %55 : vector<16x224xf32> to vector<16x224xbf16>
    %c0_77 = arith.constant 0 : index
    %c0_78 = arith.constant 0 : index
    %57 = vector.load %arg5[%c0_77, %c0_78] : memref<224x16xbf16, #tpu.memory_space<vmem>>, vector<224x16xbf16>
    %cst_79 = arith.constant dense<0.000000e+00> : vector<16x16xf32>
    %58 = tpu.matmul %56, %57, %cst_79 {dimension_numbers = #tpu.dot_dimension_numbers<[1], [0], [0], [1], [0, 0, 1, 1], [], []>} : vector<16x224xbf16>, vector<224x16xbf16>, vector<16x16xf32> -> vector<16x16xf32>
    %59 = arith.negf %58 : vector<16x16xf32>
    %60 = math.exp %59 : vector<16x16xf32>
    %cst_80 = arith.constant 1.000000e+00 : f32
    %61 = vector.broadcast %cst_80 : f32 to vector<16x16xf32>
    %62 = arith.addf %61, %60 : vector<16x16xf32>
    %63 = arith.divf %61, %62 : vector<16x16xf32>
    %cst_81 = arith.constant 0.333333343 : f32
    %64 = vector.broadcast %cst_81 : f32 to vector<16x16xf32>
    %65 = arith.mulf %63, %64 : vector<16x16xf32>
    %cst_82 = arith.constant dense<0xFF800000> : vector<16x16xf32>
    %66 = vector.multi_reduction <maximumf>, %37, %cst_82 [0] : vector<16x16x16xf32> to vector<16x16xf32>
    %cst_83 = arith.constant dense<0.000000e+00> : vector<16x16xf32>
    %67 = vector.multi_reduction <add>, %37, %cst_83 [0] : vector<16x16x16xf32> to vector<16x16xf32>
    %cst_84 = arith.constant 1.600000e+01 : f32
    %68 = vector.broadcast %cst_84 : f32 to vector<16x16xf32>
    %69 = arith.divf %67, %68 : vector<16x16xf32>
    %cst_85 = arith.constant 0.000000e+00 : f32
    %70 = vector.broadcast %cst_85 : f32 to vector<3x32xf32>
    %c0_86 = arith.constant 0 : index
    %c0_87 = arith.constant 0 : index
    %71 = vector.load %arg11[%c0_86, %c0_87] : memref<22x32xf32, #tpu.memory_space<vmem>>, vector<3x32xf32>
    tpu.vector_store %arg11[%c0_86, %c0_87], %70 {strides = array<i32>} : memref<22x32xf32, #tpu.memory_space<vmem>>, vector<3x32xf32>,
    %cst_88 = arith.constant 0.000000e+00 : f32
    %72 = vector.broadcast %cst_88 : f32 to vector<3x32xf32>
    %c19_89 = arith.constant 19 : index
    %c0_90 = arith.constant 0 : index
    %73 = vector.load %arg11[%c19_89, %c0_90] : memref<22x32xf32, #tpu.memory_space<vmem>>, vector<3x32xf32>
    tpu.vector_store %arg11[%c19_89, %c0_90], %72 {strides = array<i32>} : memref<22x32xf32, #tpu.memory_space<vmem>>, vector<3x32xf32>,
    %c3_91 = arith.constant 3 : index
    %c0_92 = arith.constant 0 : index
    %74 = vector.load %arg11[%c3_91, %c0_92] : memref<22x32xf32, #tpu.memory_space<vmem>>, vector<16x16xf32>
    tpu.vector_store %arg11[%c3_91, %c0_92], %66 {strides = array<i32>} : memref<22x32xf32, #tpu.memory_space<vmem>>, vector<16x16xf32>,
    %c3_93 = arith.constant 3 : index
    %c16_94 = arith.constant 16 : index
    %75 = vector.load %arg11[%c3_93, %c16_94] : memref<22x32xf32, #tpu.memory_space<vmem>>, vector<16x16xf32>
    tpu.vector_store %arg11[%c3_93, %c16_94], %69 {strides = array<i32>} : memref<22x32xf32, #tpu.memory_space<vmem>>, vector<16x16xf32>,
    %c0_95 = arith.constant 0 : index
    %c0_96 = arith.constant 0 : index
    %76 = vector.load %arg11[%c0_95, %c0_96] : memref<22x32xf32, #tpu.memory_space<vmem>>, vector<16x32xf32>
    %c1_97 = arith.constant 1 : index
    %c0_98 = arith.constant 0 : index
    %77 = vector.load %arg11[%c1_97, %c0_98] : memref<22x32xf32, #tpu.memory_space<vmem>>, vector<16x32xf32>
    %c2_99 = arith.constant 2 : index
    %c0_100 = arith.constant 0 : index
    %78 = vector.load %arg11[%c2_99, %c0_100] : memref<22x32xf32, #tpu.memory_space<vmem>>, vector<16x32xf32>
    %c3_101 = arith.constant 3 : index
    %c0_102 = arith.constant 0 : index
    %79 = vector.load %arg11[%c3_101, %c0_102] : memref<22x32xf32, #tpu.memory_space<vmem>>, vector<16x32xf32>
    %c4_103 = arith.constant 4 : index
    %c0_104 = arith.constant 0 : index
    %80 = vector.load %arg11[%c4_103, %c0_104] : memref<22x32xf32, #tpu.memory_space<vmem>>, vector<16x32xf32>
    %c5_105 = arith.constant 5 : index
    %c0_106 = arith.constant 0 : index
    %81 = vector.load %arg11[%c5_105, %c0_106] : memref<22x32xf32, #tpu.memory_space<vmem>>, vector<16x32xf32>
    %c6_107 = arith.constant 6 : index
    %c0_108 = arith.constant 0 : index
    %82 = vector.load %arg11[%c6_107, %c0_108] : memref<22x32xf32, #tpu.memory_space<vmem>>, vector<16x32xf32>
    %83 = tpu.concatenate %76, %77, %78, %79, %80, %81, %82 in 1 : vector<16x32xf32>, vector<16x32xf32>, vector<16x32xf32>, vector<16x32xf32>, vector<16x32xf32>, vector<16x32xf32>, vector<16x32xf32> -> vector<16x224xf32>
    %84 = arith.truncf %83 : vector<16x224xf32> to vector<16x224xbf16>
    %c0_109 = arith.constant 0 : index
    %c0_110 = arith.constant 0 : index
    %85 = vector.load %arg6[%c0_109, %c0_110] : memref<224x16xbf16, #tpu.memory_space<vmem>>, vector<224x16xbf16>
    %cst_111 = arith.constant dense<0.000000e+00> : vector<16x16xf32>
    %86 = tpu.matmul %84, %85, %cst_111 {dimension_numbers = #tpu.dot_dimension_numbers<[1], [0], [0], [1], [0, 0, 1, 1], [], []>} : vector<16x224xbf16>, vector<224x16xbf16>, vector<16x16xf32> -> vector<16x16xf32>
    %87 = arith.negf %86 : vector<16x16xf32>
    %88 = math.exp %87 : vector<16x16xf32>
    %cst_112 = arith.constant 1.000000e+00 : f32
    %89 = vector.broadcast %cst_112 : f32 to vector<16x16xf32>
    %90 = arith.addf %89, %88 : vector<16x16xf32>
    %91 = arith.divf %89, %90 : vector<16x16xf32>
    %cst_113 = arith.constant 0.333333343 : f32
    %92 = vector.broadcast %cst_113 : f32 to vector<16x16xf32>
    %93 = arith.mulf %91, %92 : vector<16x16xf32>
    %cst_114 = arith.constant dense<0xFF800000> : vector<16x16xf32>
    %94 = vector.multi_reduction <maximumf>, %37, %cst_114 [1] : vector<16x16x16xf32> to vector<16x16xf32>
    %cst_115 = arith.constant dense<0.000000e+00> : vector<16x16xf32>
    %95 = vector.multi_reduction <add>, %37, %cst_115 [1] : vector<16x16x16xf32> to vector<16x16xf32>
    %cst_116 = arith.constant 1.600000e+01 : f32
    %96 = vector.broadcast %cst_116 : f32 to vector<16x16xf32>
    %97 = arith.divf %95, %96 : vector<16x16xf32>
    %cst_117 = arith.constant 0.000000e+00 : f32
    %98 = vector.broadcast %cst_117 : f32 to vector<3x32xf32>
    %c0_118 = arith.constant 0 : index
    %c0_119 = arith.constant 0 : index
    %99 = vector.load %arg12[%c0_118, %c0_119] : memref<22x32xf32, #tpu.memory_space<vmem>>, vector<3x32xf32>
    tpu.vector_store %arg12[%c0_118, %c0_119], %98 {strides = array<i32>} : memref<22x32xf32, #tpu.memory_space<vmem>>, vector<3x32xf32>,
    %cst_120 = arith.constant 0.000000e+00 : f32
    %100 = vector.broadcast %cst_120 : f32 to vector<3x32xf32>
    %c19_121 = arith.constant 19 : index
    %c0_122 = arith.constant 0 : index
    %101 = vector.load %arg12[%c19_121, %c0_122] : memref<22x32xf32, #tpu.memory_space<vmem>>, vector<3x32xf32>
    tpu.vector_store %arg12[%c19_121, %c0_122], %100 {strides = array<i32>} : memref<22x32xf32, #tpu.memory_space<vmem>>, vector<3x32xf32>,
    %c3_123 = arith.constant 3 : index
    %c0_124 = arith.constant 0 : index
    %102 = vector.load %arg12[%c3_123, %c0_124] : memref<22x32xf32, #tpu.memory_space<vmem>>, vector<16x16xf32>
    tpu.vector_store %arg12[%c3_123, %c0_124], %94 {strides = array<i32>} : memref<22x32xf32, #tpu.memory_space<vmem>>, vector<16x16xf32>,
    %c3_125 = arith.constant 3 : index
    %c16_126 = arith.constant 16 : index
    %103 = vector.load %arg12[%c3_125, %c16_126] : memref<22x32xf32, #tpu.memory_space<vmem>>, vector<16x16xf32>
    tpu.vector_store %arg12[%c3_125, %c16_126], %97 {strides = array<i32>} : memref<22x32xf32, #tpu.memory_space<vmem>>, vector<16x16xf32>,
    %c0_127 = arith.constant 0 : index
    %c0_128 = arith.constant 0 : index
    %104 = vector.load %arg12[%c0_127, %c0_128] : memref<22x32xf32, #tpu.memory_space<vmem>>, vector<16x32xf32>
    %c1_129 = arith.constant 1 : index
    %c0_130 = arith.constant 0 : index
    %105 = vector.load %arg12[%c1_129, %c0_130] : memref<22x32xf32, #tpu.memory_space<vmem>>, vector<16x32xf32>
    %c2_131 = arith.constant 2 : index
    %c0_132 = arith.constant 0 : index
    %106 = vector.load %arg12[%c2_131, %c0_132] : memref<22x32xf32, #tpu.memory_space<vmem>>, vector<16x32xf32>
    %c3_133 = arith.constant 3 : index
    %c0_134 = arith.constant 0 : index
    %107 = vector.load %arg12[%c3_133, %c0_134] : memref<22x32xf32, #tpu.memory_space<vmem>>, vector<16x32xf32>
    %c4_135 = arith.constant 4 : index
    %c0_136 = arith.constant 0 : index
    %108 = vector.load %arg12[%c4_135, %c0_136] : memref<22x32xf32, #tpu.memory_space<vmem>>, vector<16x32xf32>
    %c5_137 = arith.constant 5 : index
    %c0_138 = arith.constant 0 : index
    %109 = vector.load %arg12[%c5_137, %c0_138] : memref<22x32xf32, #tpu.memory_space<vmem>>, vector<16x32xf32>
    %c6_139 = arith.constant 6 : index
    %c0_140 = arith.constant 0 : index
    %110 = vector.load %arg12[%c6_139, %c0_140] : memref<22x32xf32, #tpu.memory_space<vmem>>, vector<16x32xf32>
    %111 = tpu.concatenate %104, %105, %106, %107, %108, %109, %110 in 1 : vector<16x32xf32>, vector<16x32xf32>, vector<16x32xf32>, vector<16x32xf32>, vector<16x32xf32>, vector<16x32xf32>, vector<16x32xf32> -> vector<16x224xf32>
    %112 = arith.truncf %111 : vector<16x224xf32> to vector<16x224xbf16>
    %c0_141 = arith.constant 0 : index
    %c0_142 = arith.constant 0 : index
    %113 = vector.load %arg7[%c0_141, %c0_142] : memref<224x16xbf16, #tpu.memory_space<vmem>>, vector<224x16xbf16>
    %cst_143 = arith.constant dense<0.000000e+00> : vector<16x16xf32>
    %114 = tpu.matmul %112, %113, %cst_143 {dimension_numbers = #tpu.dot_dimension_numbers<[1], [0], [0], [1], [0, 0, 1, 1], [], []>} : vector<16x224xbf16>, vector<224x16xbf16>, vector<16x16xf32> -> vector<16x16xf32>
    %115 = arith.negf %114 : vector<16x16xf32>
    %116 = math.exp %115 : vector<16x16xf32>
    %cst_144 = arith.constant 1.000000e+00 : f32
    %117 = vector.broadcast %cst_144 : f32 to vector<16x16xf32>
    %118 = arith.addf %117, %116 : vector<16x16xf32>
    %119 = arith.divf %117, %118 : vector<16x16xf32>
    %cst_145 = arith.constant 0.333333343 : f32
    %120 = vector.broadcast %cst_145 : f32 to vector<16x16xf32>
    %121 = arith.mulf %119, %120 : vector<16x16xf32>
    %122 = vector.shape_cast %65 : vector<16x16xf32> to vector<16x16x1xf32>
    %123 = vector.shape_cast %93 : vector<16x16xf32> to vector<1x16x16xf32>
    %124 = vector.broadcast %122 : vector<16x16x1xf32> to vector<16x16x16xf32>
    %125 = vector.broadcast %123 : vector<1x16x16xf32> to vector<16x16x16xf32>
    %126 = arith.addf %124, %125 : vector<16x16x16xf32>
    %127 = vector.shape_cast %121 : vector<16x16xf32> to vector<16x1x16xf32>
    %128 = vector.broadcast %127 : vector<16x1x16xf32> to vector<16x16x16xf32>
    %129 = arith.addf %126, %128 : vector<16x16x16xf32>
    %130 = arith.mulf %37, %129 : vector<16x16x16xf32>
    %131 = arith.addf %130, %1 : vector<16x16x16xf32>
    %cst_146 = arith.constant 0.000000e+00 : f32
    %132 = vector.broadcast %cst_146 : f32 to vector<16x16x16xf32>
    %133 = arith.maximumf %131, %132 : vector<16x16x16xf32>
    %c0_147 = arith.constant 0 : index
    %c0_148 = arith.constant 0 : index
    %c0_149 = arith.constant 0 : index
    %c0_150 = arith.constant 0 : index
    %134 = vector.load %arg8[%c0_147, %c0_148, %c0_149, %c0_150] : memref<1x16x16x16xf32, #tpu.memory_space<vmem>>, vector<1x16x16x16xf32>
    %135 = vector.shape_cast %134 : vector<1x16x16x16xf32> to vector<16x16x16xf32>
    %136 = vector.shape_cast %133 : vector<16x16x16xf32> to vector<1x16x16x16xf32>
    tpu.vector_store %arg8[%c0_147, %c0_148, %c0_149, %c0_150], %136 {strides = array<i32>} : memref<1x16x16x16xf32, #tpu.memory_space<vmem>>, vector<1x16x16x16xf32>,
    return
  }
  func.func @transform_0(%arg0: i32) -> (i32, i32, i32, i32) {
    %c0_i32 = arith.constant 0 : i32
    %c0_i32_0 = arith.constant 0 : i32
    %c0_i32_1 = arith.constant 0 : i32
    %c0_i32_2 = arith.constant 0 : i32
    return %arg0, %c0_i32, %c0_i32_0, %c0_i32_1 : i32, i32, i32, i32
  }
  func.func @transform_1(%arg0: i32) -> (i32, i32) {
    %c0_i32 = arith.constant 0 : i32
    %c0_i32_0 = arith.constant 0 : i32
    %c0_i32_1 = arith.constant 0 : i32
    return %c0_i32, %c0_i32_0 : i32, i32
  }
  func.func @transform_2(%arg0: i32) -> (i32, i32) {
    %c0_i32 = arith.constant 0 : i32
    %c0_i32_0 = arith.constant 0 : i32
    %c0_i32_1 = arith.constant 0 : i32
    return %c0_i32, %c0_i32_0 : i32, i32
  }
  func.func @transform_3(%arg0: i32) -> (i32, i32) {
    %c0_i32 = arith.constant 0 : i32
    %c0_i32_0 = arith.constant 0 : i32
    %c0_i32_1 = arith.constant 0 : i32
    return %c0_i32, %c0_i32_0 : i32, i32
  }
  func.func @transform_4(%arg0: i32) -> (i32, i32) {
    %c0_i32 = arith.constant 0 : i32
    %c0_i32_0 = arith.constant 0 : i32
    %c0_i32_1 = arith.constant 0 : i32
    return %c0_i32, %c0_i32_0 : i32, i32
  }
  func.func @transform_5(%arg0: i32) -> (i32, i32) {
    %c0_i32 = arith.constant 0 : i32
    %c0_i32_0 = arith.constant 0 : i32
    %c0_i32_1 = arith.constant 0 : i32
    return %c0_i32, %c0_i32_0 : i32, i32
  }
  func.func @transform_6(%arg0: i32) -> (i32, i32) {
    %c0_i32 = arith.constant 0 : i32
    %c0_i32_0 = arith.constant 0 : i32
    %c0_i32_1 = arith.constant 0 : i32
    return %c0_i32, %c0_i32_0 : i32, i32
  }
  func.func @transform_7(%arg0: i32) -> (i32, i32, i32, i32) {
    %c0_i32 = arith.constant 0 : i32
    %c0_i32_0 = arith.constant 0 : i32
    %c0_i32_1 = arith.constant 0 : i32
    %c0_i32_2 = arith.constant 0 : i32
    return %arg0, %c0_i32, %c0_i32_0, %c0_i32_1 : i32, i32, i32, i32
  }
}

</mosaic_0001>

<bundles_post_ra>
// kernel: triplet_bottleneck_forward.1
= control target key start
LH: loop header
LB: loop body
LE: loop exit
PB: predicated region body
PF: predicated region fallthrough
CT: control target
= control target key end

     0   :  { %s6255_s24 = smov 0   ;;  %s8392_s0 = inlined_call_operand.vmem [shape: f32[2,16,16,16], index: 0, kind: input, shape index: {}]   ;;  %s8393_s1 = inlined_call_operand.vmem [shape: bf16[16,4], index: 1, kind: input, shape index: {}]   ;;  %s8394_s2 = inlined_call_operand.vmem [shape: bf16[36,4], index: 2, kind: input, shape index: {}]   ;;  %s8395_s3 = inlined_call_operand.vmem [shape: bf16[4,16], index: 3, kind: input, shape index: {}]   ;;  %s8396_s4 = inlined_call_operand.vmem [shape: bf16[224,16], index: 4, kind: input, shape index: {}]   ;;  %s8397_s5 = inlined_call_operand.vmem [shape: bf16[224,16], index: 5, kind: input, shape index: {}]   ;;  %s8398_s6 = inlined_call_operand.vmem [shape: bf16[224,16], index: 6, kind: input, shape index: {}]   ;;  %s8399_s7 = inlined_call_operand.vmem [shape: f32[2,16,16,16], index: 7, kind: output, shape index: {}]  }
   0x1 LB: > { %s5077_s25 = sadd.s32 4294967295, %s6200_s24   ;;  %p5081_p0 = scmp.ge.s32.totalorder %s6200_s24, 1  ;;  %s6200_s24 = sphi %s6255_s24, %s17_s24  }
   0x2   : > { %p237_p1 = scmp.lt.s32.totalorder %s6200_s24, 3 }
   0x4   : > { %p238_p2 = pnand %p5081_p0, %p237_p1 }
   0x6   : > { %241 = sbr.rel (%p238_p2) target bundleno = 1710 (0x6ae), region = 48 }
   0xb   : > { %v6090_v0 = vld [vmem:[%s8393_s1] sm:$0xff]   ;;  %p269_p3 = scmp.lt.s32.totalorder %s5077_s25, 1  ;;  %vm336_vm0 = vcmask 130048   ;;  %vm581_vm1 = vcmask 25600   ;;  %vm578_vm2 = vcmask 31744   ;;  %v6202_v43 = vmov 0.0  }
   0xc   : > { %5246 = vmatprep.subr.bf16.mxu0 %v6090_v0  ;;  %582 = vst.msk [vmem:[#allocation2 + $0x10] sm:$0x3] %vm581_vm1, %v6202_v43  ;;  %586 = vst.msk [vmem:[#allocation2 + $0x1a8] sm:$0x3] %vm581_vm1, %v6202_v43  ;;  %vm587_vm3 = vcmask 24576   ;;  %s6203_s9 = smov 8  }
   0xd   : > { %s8511_s25 = smov (!%p269_p3, %s5077_s25), 1  ;;  %5247 = vmatpush3.bf16.msra.mxu0 %v6090_v0  ;;  %579 = vst.msk [vmem:[#allocation2] sm:$0xff] %vm578_vm2, %v6202_v43  ;;  %580 = vst.msk [vmem:[#allocation2 + $0x8] sm:$0xff] %vm578_vm2, %v6202_v43  ;;  %s6204_s10 = smov 4   ;;  %vm2317_vm4 = vcmask 1041408   ;;  %vm2002_vm5 = vcmask 64512  }
   0xe   : > { %s5191_s28 = sshll.u32 %s8511_s25, 8  ;;  %606 = vst.msk [vmem:[#allocation2 + $0x11] sm:$0x1] %vm587_vm3, %v6202_v43  ;;  %623 = vst.msk [vmem:[#allocation2 + $0x1a9] sm:$0x1] %vm587_vm3, %v6202_v43  ;;  %s6205_s11 = smov 24  }
   0xf   : > { %s6274_s8 = scalar_lea.vmem %s8392_s0, %s5191_s28  ;;  %584 = vst.msk [vmem:[#allocation2 + $0x198] sm:$0xff] %vm578_vm2, %v6202_v43  ;;  %585 = vst.msk [vmem:[#allocation2 + $0x1a0] sm:$0xff] %vm578_vm2, %v6202_v43  ;;  %s6206_s12 = smov 12   ;;  %vm2035_vm6 = vcmask 97280   ;;  %vm2100_vm7 = vcmask 162816   ;;  %vm2133_vm8 = vcmask 195584  }
  0x10   : > { %v280_v1 = vld [vmem:[%s6274_s8] sm:$0xff]  ;;  %v281_v2 = vld [vmem:[%s6274_s8 + $0x8] sm:$0xff]  ;;  %v282_v3 = vld [vmem:[%s6274_s8 + $0x10] sm:$0xff]  ;;  %589 = vst.msk [vmem:[#allocation2 + $0x18] sm:$0x1] %vm587_vm3, %v6202_v43  ;;  %s6207_s13 = smov 28   ;;  %s8202_s21 = scalar_lea.vmem %s8399_s7, %s5191_s28 }
  0x11   : > { %v312_v4 = vpack.c.bf16 %v281_v2, %v280_v1  ;;  %v283_v5 = vld [vmem:[%s6274_s8 + $0x18] sm:$0xff]  ;;  %v284_v6 = vld [vmem:[%s6274_s8 + $0x20] sm:$0xff]  ;;  %v285_v7 = vld [vmem:[%s6274_s8 + $0x28] sm:$0xff]  ;;  %590 = vst.msk [vmem:[#allocation2 + $0x30] sm:$0x1] %vm587_vm3, %v6202_v43  ;;  %s6208_s14 = smov 16  }
  0x12   : > { %v313_v8 = vpack.c.bf16 %v283_v5, %v282_v3  ;;  %v314_v9 = vpack.c.bf16 %v285_v7, %v284_v6  ;;  %v286_v10 = vld [vmem:[%s6274_s8 + $0x30] sm:$0xff]  ;;  %v287_v11 = vld [vmem:[%s6274_s8 + $0x38] sm:$0xff]  ;;  %v288_v12 = vld [vmem:[%s6274_s8 + $0x40] sm:$0xff]  ;;  %591 = vst.msk [vmem:[#allocation2 + $0x48] sm:$0x1] %vm587_vm3, %v6202_v43  ;;  %s6209_s15 = smov 32  }
  0x13   : > { %5248 = vmatprep.mubr.msk.bf16.mxu0 %vm336_vm0, %v312_v4  ;;  %v289_v13 = vld [vmem:[%s6274_s8 + $0x48] sm:$0xff]  ;;  %v315_v14 = vpack.c.bf16 %v287_v11, %v286_v10  ;;  %v290_v16 = vld [vmem:[%s6274_s8 + $0x50] sm:$0xff]  ;;  %v291_v17 = vld [vmem:[%s6274_s8 + $0x58] sm:$0xff]  ;;  %592 = vst.msk [vmem:[#allocation2 + $0x60] sm:$0x1] %vm587_vm3, %v6202_v43  ;;  %s6210_s16 = smov 20  }
  0x14   : > { %5249 = vmatmul.mubr.msk.bf16.vlgmr.msra.gmra.mxu0 %vm336_vm0, %v313_v8  ;;  %v316_v15 = vpack.c.bf16 %v289_v13, %v288_v12  ;;  %v292_v18 = vld [vmem:[%s6274_s8 + $0x60] sm:$0xff]  ;;  %v293_v19 = vld [vmem:[%s6274_s8 + $0x68] sm:$0xff]  ;;  %v317_v20 = vpack.c.bf16 %v291_v17, %v290_v16  ;;  %v294_v22 = vld [vmem:[%s6274_s8 + $0x70] sm:$0xff]  ;;  %593 = vst.msk [vmem:[#allocation2 + $0x78] sm:$0x1] %vm587_vm3, %v6202_v43  ;;  %vm2166_vm9 = vcmask 228352  }
  0x15   : > { %5252 = vmatprep.mubr.msk.bf16.mxu0 %vm336_vm0, %v314_v9  ;;  %v318_v21 = vpack.c.bf16 %v293_v19, %v292_v18  ;;  %v295_v23 = vld [vmem:[%s6274_s8 + $0x78] sm:$0xff]  ;;  %v296_v24 = vld [vmem:[%s6274_s8 + $0x80] sm:$0xff]  ;;  %v297_v25 = vld [vmem:[%s6274_s8 + $0x88] sm:$0xff]  ;;  %594 = vst.msk [vmem:[#allocation2 + $0x90] sm:$0x1] %vm587_vm3, %v6202_v43  ;;  %vm2199_vm10 = vcmask 261120  }
  0x16   : > { %v319_v26 = vpack.c.bf16 %v295_v23, %v294_v22  ;;  %v320_v27 = vpack.c.bf16 %v297_v25, %v296_v24  ;;  %v298_v28 = vld [vmem:[%s6274_s8 + $0x90] sm:$0xff]  ;;  %v299_v29 = vld [vmem:[%s6274_s8 + $0x98] sm:$0xff]  ;;  %v300_v30 = vld [vmem:[%s6274_s8 + $0xa0] sm:$0xff]  ;;  %595 = vst.msk [vmem:[#allocation2 + $0xa8] sm:$0x1] %vm587_vm3, %v6202_v43  ;;  %vm2268_vm11 = vcmask 293888  }
  0x17   : > { %v301_v31 = vld [vmem:[%s6274_s8 + $0xa8] sm:$0xff]  ;;  %v321_v32 = vpack.c.bf16 %v299_v29, %v298_v28  ;;  %v302_v34 = vld [vmem:[%s6274_s8 + $0xb0] sm:$0xff]  ;;  %v303_v35 = vld [vmem:[%s6274_s8 + $0xb8] sm:$0xff]  ;;  %596 = vst.msk [vmem:[#allocation2 + $0xc0] sm:$0x1] %vm587_vm3, %v6202_v43  ;;  %vm3151_vm12 = vcmask 1041409  }
  0x18   : > { %v322_v33 = vpack.c.bf16 %v301_v31, %v300_v30  ;;  %v304_v36 = vld [vmem:[%s6274_s8 + $0xc0] sm:$0xff]  ;;  %v305_v37 = vld [vmem:[%s6274_s8 + $0xc8] sm:$0xff]  ;;  %v323_v38 = vpack.c.bf16 %v303_v35, %v302_v34  ;;  %v306_v40 = vld [vmem:[%s6274_s8 + $0xd0] sm:$0xff]  ;;  %597 = vst.msk [vmem:[#allocation2 + $0xd8] sm:$0x1] %vm587_vm3, %v6202_v43  ;;  %vm3153_vm13 = vcmask 1042434  }
  0x19   : > { %v324_v39 = vpack.c.bf16 %v305_v37, %v304_v36  ;;  %v307_v41 = vld [vmem:[%s6274_s8 + $0xd8] sm:$0xff]  ;;  %598 = vst.msk [vmem:[#allocation2 + $0xf0] sm:$0x1] %vm587_vm3, %v6202_v43  ;;  %599 = vst.msk [vmem:[#allocation2 + $0x108] sm:$0x1] %vm587_vm3, %v6202_v43  ;;  %v721_v44 = vld [vmem:[#allocation2 + $0x2] sm:$0xff] }
  0x1a   : > { %v325_v42 = vpack.c.bf16 %v307_v41, %v306_v40  ;;  %600 = vst.msk [vmem:[#allocation2 + $0x120] sm:$0x1] %vm587_vm3, %v6202_v43  ;;  %601 = vst.msk [vmem:[#allocation2 + $0x138] sm:$0x1] %vm587_vm3, %v6202_v43  ;;  %v722_v45 = vld [vmem:[#allocation2 + $0xa] sm:$0xff]  ;;  %v689_v47 = vld [vmem:[#allocation2 + $0x1] sm:$0xff] }
  0x1b   : > { %602 = vst.msk [vmem:[#allocation2 + $0x150] sm:$0x1] %vm587_vm3, %v6202_v43  ;;  %603 = vst.msk [vmem:[#allocation2 + $0x168] sm:$0x1] %vm587_vm3, %v6202_v43  ;;  %v5380_v46 = vpack.i.bf16 %v722_v45, %v721_v44  ;;  %v690_v48 = vld [vmem:[#allocation2 + $0x9] sm:$0xff]  ;;  %v881_v51 = vld [vmem:[#allocation2 + $0x1a0] sm:$0xff] }
  0x1c   : > { %5253 = vmatmul.mubr.msk.bf16.gmra.mxu0 %vm336_vm0, %v315_v14  ;;  %604 = vst.msk [vmem:[#allocation2 + $0x180] sm:$0x1] %vm587_vm3, %v6202_v43  ;;  %607 = vst.msk [vmem:[#allocation2 + $0x29] sm:$0x1] %vm587_vm3, %v6202_v43  ;;  %v5375_v50 = vpack.i.bf16 %v690_v48, %v689_v47  ;;  %v308_v52 = vld [vmem:[%s6274_s8 + $0xe0] sm:$0xff]  ;;  %v309_v53 = vld [vmem:[%s6274_s8 + $0xe8] sm:$0xff] }
  0x1d   : > { %5256 = vmatprep.mubr.msk.bf16.mxu0 %vm336_vm0, %v316_v15  ;;  %608 = vst.msk [vmem:[#allocation2 + $0x41] sm:$0x1] %vm587_vm3, %v6202_v43  ;;  %609 = vst.msk [vmem:[#allocation2 + $0x59] sm:$0x1] %vm587_vm3, %v6202_v43  ;;  %5381 = vrot.lane.b32.xlu1 %v5380_v46, %s6203_s9  ;;  %v326_v55 = vpack.c.bf16 %v309_v53, %v308_v52  ;;  %v310_v56 = vld [vmem:[%s6274_s8 + $0xf0] sm:$0xff]  ;;  %v311_v57 = vld [vmem:[%s6274_s8 + $0xf8] sm:$0xff] }
  0x1e   : > { %610 = vst.msk [vmem:[#allocation2 + $0x71] sm:$0x1] %vm587_vm3, %v6202_v43  ;;  %611 = vst.msk [vmem:[#allocation2 + $0x89] sm:$0x1] %vm587_vm3, %v6202_v43  ;;  %5376 = vrot.lane.b32.xlu0 %v5375_v50, %s6204_s10  ;;  %v327_v58 = vpack.c.bf16 %v311_v57, %v310_v56  ;;  %vm3155_vm14 = vcmask 1043459   ;;  %vm3157_vm15 = vcmask 1044484  }
  0x1f   : > { %612 = vst.msk [vmem:[#allocation2 + $0xa1] sm:$0x1] %vm587_vm3, %v6202_v43  ;;  %613 = vst.msk [vmem:[#allocation2 + $0xb9] sm:$0x1] %vm587_vm3, %v6202_v43  ;;  %vm3159_vm1 = vcmask 1045509   ;;  %s6213_s20 = smov 96  }
  0x20   : > { %614 = vst.msk [vmem:[#allocation2 + $0xd1] sm:$0x1] %vm587_vm3, %v6202_v43  ;;  %615 = vst.msk [vmem:[#allocation2 + $0xe9] sm:$0x1] %vm587_vm3, %v6202_v43 }
  0x21   : > { %616 = vst.msk [vmem:[#allocation2 + $0x101] sm:$0x1] %vm587_vm3, %v6202_v43  ;;  %617 = vst.msk [vmem:[#allocation2 + $0x119] sm:$0x1] %vm587_vm3, %v6202_v43 }
  0x22   : > { %618 = vst.msk [vmem:[#allocation2 + $0x131] sm:$0x1] %vm587_vm3, %v6202_v43  ;;  %619 = vst.msk [vmem:[#allocation2 + $0x149] sm:$0x1] %vm587_vm3, %v6202_v43 }
  0x23   : > { %620 = vst.msk [vmem:[#allocation2 + $0x161] sm:$0x1] %vm587_vm3, %v6202_v43  ;;  %621 = vst.msk [vmem:[#allocation2 + $0x179] sm:$0x1] %vm587_vm3, %v6202_v43 }
  0x24   : > { %5257 = vmatmul.mubr.msk.bf16.gmra.mxu0 %vm336_vm0, %v317_v20  ;;  %622 = vst.msk [vmem:[#allocation2 + $0x191] sm:$0x1] %vm587_vm3, %v6202_v43  ;;  %588 = vst.msk [vmem:[#allocation2] sm:$0x1] %vm587_vm3, %v6202_v43 }
  0x25   : > { %5260 = vmatprep.mubr.msk.bf16.mxu0 %vm336_vm0, %v318_v21  ;;  %605 = vst.msk [vmem:[#allocation2 + $0x198] sm:$0x1] %vm587_vm3, %v6202_v43  ;;  %vm3163_vm3 = vcmask 1047559  }
  0x2c   : > { %5261 = vmatmul.mubr.msk.bf16.gmra.mxu0 %vm336_vm0, %v319_v26  ;;  %v880_v49 = vld [vmem:[#allocation2 + $0x198] sm:$0xff] }
  0x2d   : > { %5264 = vmatprep.mubr.msk.bf16.mxu0 %vm336_vm0, %v320_v27  ;;  %v5385_v54 = vpack.i.bf16 %v881_v51, %v880_v49 }
  0x2f   : > { %5386 = vrot.lane.b32.xlu1 %v5385_v54, %s6205_s11 }
  0x34   : > { %5265 = vmatmul.mubr.msk.bf16.gmra.mxu0 %vm336_vm0, %v321_v32 }
  0x35   : > { %5268 = vmatprep.mubr.msk.bf16.mxu0 %vm336_vm0, %v322_v33 }
  0x3c   : > { %5269 = vmatmul.mubr.msk.bf16.gmra.mxu0 %vm336_vm0, %v323_v38 }
  0x3d   : > { %5272 = vmatprep.mubr.msk.bf16.mxu0 %vm336_vm0, %v324_v39 }
  0x44   : > { %5273 = vmatmul.mubr.msk.bf16.gmra.mxu0 %vm336_vm0, %v325_v42 }
  0x45   : > { %5276 = vmatprep.mubr.msk.bf16.mxu0 %vm336_vm0, %v326_v55 }
  0x4c   : > { %5277 = vmatmul.mubr.msk.bf16.gmra.mxu0 %vm336_vm0, %v327_v58 }
  0xd4   : > { %v5250_v59 = vpop.f32.mrf.mxu0 }
  0xd5   : > { %v548_v60 = vmax.f32 %v5250_v59, 0.0 }
  0xd6   : > { %v419_v61 = vpop.f32.mrf.mxu0 }
  0xd7   : > { %627 = vst.msk [vmem:[#allocation2 + $0x31] sm:$0xff] %vm578_vm2, %v548_v60  ;;  %v546_v62 = vmax.f32 %v419_v61, 0.0 }
  0xd8   : > { %v5251_v63 = vpop.f32.mrf.mxu0 }
  0xd9   : > { %625 = vst.msk [vmem:[#allocation2 + $0x19] sm:$0xff] %vm578_vm2, %v546_v62  ;;  %v549_v0 = vmax.f32 %v5251_v63, 0.0 }
  0xda   : > { %v422_v1 = vpop.f32.mrf.mxu0 }
  0xdb   : > { %628 = vst.msk [vmem:[#allocation2 + $0x39] sm:$0xff] %vm578_vm2, %v549_v0  ;;  %v547_v2 = vmax.f32 %v422_v1, 0.0 }
  0xdc   : > { %v5254_v3 = vpop.f32.mrf.mxu0 }
  0xdd   : > { %626 = vst.msk [vmem:[#allocation2 + $0x21] sm:$0xff] %vm578_vm2, %v547_v2  ;;  %v552_v4 = vmax.f32 %v5254_v3, 0.0 }
  0xde   : > { %v435_v5 = vpop.f32.mrf.mxu0  ;;  %v6415_v9 = vld [vmem:[#allocation2 + $0x30] sm:$0xff] }
  0xdf   : > { %631 = vst.msk [vmem:[#allocation2 + $0x61] sm:$0xff] %vm578_vm2, %v552_v4  ;;  %v550_v6 = vmax.f32 %v435_v5, 0.0  ;;  %v882_v17 = vld [vmem:[#allocation2 + $0x31] sm:$0xff]  ;;  %v6091_v4 = vld [vmem:[%s8394_s2 + $0x10] ss:$0 sps:$4 sm:$0x33]  }
  0xe0   : > { %v5255_v7 = vpop.f32.mrf.mxu0  ;;  %v691_v37 = vld [vmem:[#allocation2 + $0x19] sm:$0xff]  ;;  %5352 = vmatprep.subr.msk.bf16.mxu1 %vm2317_vm4, %v6091_v4 }
  0xe1   : > { %629 = vst.msk [vmem:[#allocation2 + $0x49] sm:$0xff] %vm578_vm2, %v550_v6  ;;  %v553_v8 = vmax.f32 %v5255_v7, 0.0  ;;  %v6449_v49 = vld [vmem:[#allocation2 + $0x18] sm:$0xff]  ;;  %v2319_v7 = vsel %vm2317_vm4, %v6091_v4, 0 }
  0xe2   : > { %v6417_v10 = vld [vmem:[#allocation2 + $0x38] sm:$0xff]  ;;  %v438_v11 = vpop.f32.mrf.mxu0  ;;  %5281 = vmatpush3.bf16.msra.mxu1 %v2319_v7 }
  0xe3   : > { %v5405_v12 = vpack.i.bf16 %v6417_v10, %v6415_v9  ;;  %632 = vst.msk [vmem:[#allocation2 + $0x69] sm:$0xff] %vm578_vm2, %v553_v8  ;;  %v551_v13 = vmax.f32 %v438_v11, 0.0  ;;  %v883_v14 = vld [vmem:[#allocation2 + $0x39] sm:$0xff] }
  0xe4   : > { %v5258_v15 = vpop.f32.mrf.mxu0  ;;  %v5410_v19 = vpack.i.bf16 %v883_v14, %v882_v17  ;;  %v914_v21 = vld [vmem:[#allocation2 + $0x32] sm:$0xff]  ;;  %v915_v22 = vld [vmem:[#allocation2 + $0x3a] sm:$0xff]  ;;  %v724_v33 = vld [vmem:[#allocation2 + $0x22] sm:$0xff] }
  0xe5   : > { %5406 = vrot.lane.b32.xlu0 %v5405_v12, %s6205_s11  ;;  %5391 = vrot.lane.b32.xlu1 %v5405_v12, %s6206_s12  ;;  %630 = vst.msk [vmem:[#allocation2 + $0x51] sm:$0xff] %vm578_vm2, %v551_v13  ;;  %v556_v16 = vmax.f32 %v5258_v15, 0.0  ;;  %v5415_v26 = vpack.i.bf16 %v915_v22, %v914_v21  ;;  %v723_v32 = vld [vmem:[#allocation2 + $0x1a] sm:$0xff]  ;;  %v6092_v13 = vld [vmem:[%s8394_s2 + $0x8] sm:$0xff]  }
  0xe6   : > { %v451_v18 = vpop.f32.mrf.mxu0  ;;  %v692_v34 = vld [vmem:[#allocation2 + $0x21] sm:$0xff]  ;;  %v5435_v41 = vpack.i.bf16 %v724_v33, %v723_v32  ;;  %5282 = vmatprep.subr.bf16.mxu1 %v6092_v13 }
  0xe7   : > { %635 = vst.msk [vmem:[#allocation2 + $0x91] sm:$0xff] %vm578_vm2, %v556_v16  ;;  %v554_v20 = vmax.f32 %v451_v18, 0.0  ;;  %v6437_v38 = vld [vmem:[#allocation2 + $0x60] sm:$0xff]  ;;  %v5430_v42 = vpack.i.bf16 %v692_v34, %v691_v37  ;;  %5283 = vmatpush3.bf16.msra.mxu1 %v6092_v13 }
  0xe8   : > { %v5259_v23 = vpop.f32.mrf.mxu0  ;;  %v6442_v45 = vld [vmem:[#allocation2 + $0x20] sm:$0xff]  ;;  %v6471_v11 = vld [vmem:[#allocation2 + $0x48] sm:$0xff] }
  0xe9   : > { %5411 = vrot.lane.b32.xlu0 %v5410_v19, %s6207_s13  ;;  %5396 = vrot.lane.b32.xlu1 %v5410_v19, %s6208_s14  ;;  %633 = vst.msk [vmem:[#allocation2 + $0x79] sm:$0xff] %vm578_vm2, %v554_v20  ;;  %v557_v24 = vmax.f32 %v5259_v23, 0.0  ;;  %v5440_v51 = vpack.i.bf16 %v6442_v45, %v6449_v49  ;;  %v791_v53 = vld [vmem:[#allocation2 + $0x61] sm:$0xff]  ;;  %v884_v17 = vld [vmem:[#allocation2 + $0x49] sm:$0xff] }
  0xea   : > { %v454_v25 = vpop.f32.mrf.mxu0  ;;  %v6439_v39 = vld [vmem:[#allocation2 + $0x68] sm:$0xff] }
  0xeb   : > { %636 = vst.msk [vmem:[#allocation2 + $0x99] sm:$0xff] %vm578_vm2, %v557_v24  ;;  %v555_v27 = vmax.f32 %v454_v25, 0.0  ;;  %v5455_v47 = vpack.i.bf16 %v6439_v39, %v6437_v38  ;;  %v792_v54 = vld [vmem:[#allocation2 + $0x69] sm:$0xff] }
  0xec   : > { %v5262_v28 = vpop.f32.mrf.mxu0  ;;  %v5460_v58 = vpack.i.bf16 %v792_v54, %v791_v53  ;;  %v823_v60 = vld [vmem:[#allocation2 + $0x62] sm:$0xff]  ;;  %v824_v61 = vld [vmem:[#allocation2 + $0x6a] sm:$0xff] }
  0xed   : > { %5416 = vrot.lane.b32.xlu0 %v5415_v26, %s6209_s15  ;;  %5401 = vrot.lane.b32.xlu1 %v5415_v26, %s6210_s16  ;;  %634 = vst.msk [vmem:[#allocation2 + $0x81] sm:$0xff] %vm578_vm2, %v555_v27  ;;  %v560_v29 = vmax.f32 %v5262_v28, 0.0  ;;  %v5465_v1 = vpack.i.bf16 %v824_v61, %v823_v60  ;;  %v6473_v12 = vld [vmem:[#allocation2 + $0x50] sm:$0xff] }
  0xee   : > { %v467_v30 = vpop.f32.mrf.mxu0  ;;  %v5495_v15 = vpack.i.bf16 %v6473_v12, %v6471_v11  ;;  %v885_v18 = vld [vmem:[#allocation2 + $0x51] sm:$0xff] }
  0xef   : > { %639 = vst.msk [vmem:[#allocation2 + $0xc1] sm:$0xff] %vm578_vm2, %v560_v29  ;;  %v558_v31 = vmax.f32 %v467_v30, 0.0  ;;  %v5500_v21 = vpack.i.bf16 %v885_v18, %v884_v17  ;;  %v916_v27 = vld [vmem:[#allocation2 + $0x4a] sm:$0xff]  ;;  %v917_v28 = vld [vmem:[#allocation2 + $0x52] sm:$0xff] }
  0xf0   : > { %v5263_v35 = vpop.f32.mrf.mxu0  ;;  %v6496_v29 = vld [vmem:[#allocation2 + $0x90] sm:$0xff] }
  0xf1   : > { %5426 = vrot.lane.b32.xlu0 %v5415_v26, %s6203_s9  ;;  %5421 = vrot.lane.b32.xlu1 %v5410_v19, %s6204_s10  ;;  %637 = vst.msk [vmem:[#allocation2 + $0xa9] sm:$0xff] %vm578_vm2, %v558_v31  ;;  %v561_v36 = vmax.f32 %v5263_v35, 0.0  ;;  %v6093_v19 = vld [vmem:[%s8394_s2] sm:$0xff]   ;;  %v5505_v31 = vpack.i.bf16 %v917_v28, %v916_v27  ;;  %v795_v33 = vld [vmem:[#allocation2 + $0x91] sm:$0xff] }
  0xf2   : > { %v470_v40 = vpop.f32.mrf.mxu0  ;;  %5284 = vmatprep.subr.bf16.mxu1 %v6093_v19  ;;  %v6498_v30 = vld [vmem:[#allocation2 + $0x98] sm:$0xff] }
  0xf3   : > { %640 = vst.msk [vmem:[#allocation2 + $0xc9] sm:$0xff] %vm578_vm2, %v561_v36  ;;  %v559_v44 = vmax.f32 %v470_v40, 0.0  ;;  %5285 = vmatpush3.bf16.msra.mxu1 %v6093_v19  ;;  %v5535_v32 = vpack.i.bf16 %v6498_v30, %v6496_v29  ;;  %v796_v34 = vld [vmem:[#allocation2 + $0x99] sm:$0xff]  ;;  %v5377_v19 = vpop.permute.xlu0 %5376 }
  0xf4   : > { %v5266_v46 = vpop.f32.mrf.mxu0  ;;  %v5540_v35 = vpack.i.bf16 %v796_v34, %v795_v33  ;;  %v827_v36 = vld [vmem:[#allocation2 + $0x92] sm:$0xff]  ;;  %v828_v37 = vld [vmem:[#allocation2 + $0x9a] sm:$0xff] }
  0xf5   : > { %5436 = vrot.lane.b32.xlu1 %v5435_v41, %s6203_s9  ;;  %5431 = vrot.lane.b32.xlu0 %v5430_v42, %s6204_s10  ;;  %638 = vst.msk [vmem:[#allocation2 + $0xb1] sm:$0xff] %vm578_vm2, %v559_v44  ;;  %v564_v48 = vmax.f32 %v5266_v46, 0.0  ;;  %v5545_v40 = vpack.i.bf16 %v828_v37, %v827_v36 }
  0xf6   : > { %v483_v50 = vpop.f32.mrf.mxu0  ;;  %v767_v60 = vld [vmem:[#allocation2 + $0xc0] sm:$0xff] }
  0xf7   : > { %643 = vst.msk [vmem:[#allocation2 + $0xf1] sm:$0xff] %vm578_vm2, %v564_v48  ;;  %v562_v52 = vmax.f32 %v483_v50, 0.0  ;;  %v888_v48 = vld [vmem:[#allocation2 + $0x79] sm:$0xff]  ;;  %v889_v50 = vld [vmem:[#allocation2 + $0x81] sm:$0xff] }
  0xf8   : > { %v5267_v55 = vpop.f32.mrf.mxu0  ;;  %v892_v13 = vld [vmem:[#allocation2 + $0xa9] sm:$0xff] }
  0xf9   : > { %5441 = vrot.lane.b32.xlu0 %v5440_v51, %s6206_s12  ;;  %5456 = vrot.lane.b32.xlu1 %v5455_v47, %s6206_s12  ;;  %641 = vst.msk [vmem:[#allocation2 + $0xd9] sm:$0xff] %vm578_vm2, %v562_v52  ;;  %v565_v56 = vmax.f32 %v5267_v55, 0.0  ;;  %v5580_v52 = vpack.i.bf16 %v889_v50, %v888_v48 }
  0xfa   : > { %v486_v57 = vpop.f32.mrf.mxu0  ;;  %v768_v61 = vld [vmem:[#allocation2 + $0xc8] sm:$0xff] }
  0xfb   : > { %644 = vst.msk [vmem:[#allocation2 + $0xf9] sm:$0xff] %vm578_vm2, %v565_v56  ;;  %v563_v59 = vmax.f32 %v486_v57, 0.0  ;;  %v832_v4 = vld [vmem:[#allocation2 + $0xca] sm:$0xff] }
  0xfc   : > { %v5270_v62 = vpop.f32.mrf.mxu0  ;;  %v861_v7 = vld [vmem:[#allocation2 + $0xb0] sm:$0xff] }
  0xfd   : > { %5446 = vrot.lane.b32.xlu0 %v5430_v42, %s6208_s14  ;;  %5461 = vrot.lane.b32.xlu1 %v5460_v58, %s6208_s14  ;;  %642 = vst.msk [vmem:[#allocation2 + $0xe1] sm:$0xff] %vm578_vm2, %v563_v59  ;;  %v568_v63 = vmax.f32 %v5270_v62, 0.0  ;;  %v857_v42 = vld [vmem:[#allocation2 + $0x80] sm:$0xff]  ;;  %v924_v17 = vld [vmem:[#allocation2 + $0xaa] sm:$0xff]  ;;  %v925_v18 = vld [vmem:[#allocation2 + $0xb2] sm:$0xff] }
  0xfe   : > { %v499_v0 = vpop.f32.mrf.mxu0  ;;  %v921_v59 = vld [vmem:[#allocation2 + $0x82] sm:$0xff]  ;;  %v803_v27 = vld [vmem:[#allocation2 + $0xf1] sm:$0xff] }
  0xff   : > { %647 = vst.msk [vmem:[#allocation2 + $0x121] sm:$0xff] %vm578_vm2, %v568_v63  ;;  %v566_v2 = vmax.f32 %v499_v0, 0.0  ;;  %v5615_v63 = vpack.i.bf16 %v768_v61, %v767_v60  ;;  %v799_v0 = vld [vmem:[#allocation2 + $0xc1] sm:$0xff] }
 0x100   : > { %v5271_v3 = vpop.f32.mrf.mxu0 }
 0x101   : > { %5451 = vrot.lane.b32.xlu0 %v5435_v41, %s6210_s16  ;;  %5466 = vrot.lane.b32.xlu1 %v5465_v1, %s6210_s16  ;;  %645 = vst.msk [vmem:[#allocation2 + $0x109] sm:$0xff] %vm578_vm2, %v566_v2  ;;  %v569_v5 = vmax.f32 %v5271_v3, 0.0  ;;  %v856_v41 = vld [vmem:[#allocation2 + $0x78] sm:$0xff]  ;;  %v831_v3 = vld [vmem:[#allocation2 + $0xc2] sm:$0xff] }
 0x102   : > { %v502_v6 = vpop.f32.mrf.mxu0  ;;  %v5575_v46 = vpack.i.bf16 %v857_v42, %v856_v41  ;;  %v804_v28 = vld [vmem:[#allocation2 + $0xf9] sm:$0xff] }
 0x103   : > { %648 = vst.msk [vmem:[#allocation2 + $0x129] sm:$0xff] %vm578_vm2, %v569_v5  ;;  %v567_v8 = vmax.f32 %v502_v6, 0.0  ;;  %v5625_v5 = vpack.i.bf16 %v832_v4, %v831_v3  ;;  %v860_v6 = vld [vmem:[#allocation2 + $0xa8] sm:$0xff]  ;;  %v5700_v33 = vpack.i.bf16 %v804_v28, %v803_v27  ;;  %v835_v34 = vld [vmem:[#allocation2 + $0xf2] sm:$0xff] }
 0x104   : > { %v5274_v14 = vpop.f32.mrf.mxu0 }
 0x105   : > { %5471 = vrot.lane.b32.xlu0 %v5455_v47, %s6205_s11  ;;  %5486 = vrot.lane.b32.xlu1 %v5460_v58, %s6204_s10  ;;  %646 = vst.msk [vmem:[#allocation2 + $0x111] sm:$0xff] %vm578_vm2, %v567_v8  ;;  %v572_v16 = vmax.f32 %v5274_v14, 0.0  ;;  %v5655_v8 = vpack.i.bf16 %v861_v7, %v860_v6  ;;  %v893_v14 = vld [vmem:[#allocation2 + $0xb1] sm:$0xff] }
 0x106   : > { %v515_v20 = vpop.f32.mrf.mxu0  ;;  %v775_v6 = vld [vmem:[#allocation2 + $0x120] sm:$0xff] }
 0x107   : > { %651 = vst.msk [vmem:[#allocation2 + $0x151] sm:$0xff] %vm578_vm2, %v572_v16  ;;  %v570_v22 = vmax.f32 %v515_v20, 0.0  ;;  %v6534_v16 = vpop.permute.xlu1 %5381 }
 0x108   : > { %v5275_v23 = vpop.f32.mrf.mxu0  ;;  %v5383_v60 = vunpack.i.l.bf16 %v6534_v16  ;;  %v5384_v61 = vunpack.i.h.bf16 %v6534_v16 }
 0x109   : > { %5476 = vrot.lane.b32.xlu0 %v5460_v58, %s6207_s13  ;;  %5496 = vrot.lane.b32.xlu1 %v5495_v15, %s6205_s11  ;;  %v573_v24 = vmax.f32 %v5275_v23, 0.0  ;;  %649 = vst.msk [vmem:[#allocation2 + $0x139] sm:$0xff] %vm578_vm2, %v570_v22  ;;  %v920_v58 = vld [vmem:[#allocation2 + $0x7a] sm:$0xff]  ;;  %v5665_v23 = vpack.i.bf16 %v925_v18, %v924_v17 }
 0x10a   : > { %v518_v25 = vpop.f32.mrf.mxu0  ;;  %v5585_v62 = vpack.i.bf16 %v921_v59, %v920_v58  ;;  %v772_v22 = vld [vmem:[#allocation2 + $0xf8] sm:$0xff]  ;;  %v658_v59 = vld [vmem:[#allocation2 + $0x8] sm:$0xff] }
 0x10b   : > { %652 = vst.msk [vmem:[#allocation2 + $0x159] sm:$0xff] %vm578_vm2, %v573_v24  ;;  %v571_v26 = vmax.f32 %v518_v25, 0.0  ;;  %v6540_v20 = vpop.permute.xlu1 %5386  ;;  %v776_v7 = vld [vmem:[#allocation2 + $0x128] sm:$0xff] }
 0x10c   : > { %v5278_v44 = vpop.f32.mrf.mxu0 }
 0x10d   : > { %5481 = vrot.lane.b32.xlu0 %v5465_v1, %s6209_s15  ;;  %5501 = vrot.lane.b32.xlu1 %v5500_v21, %s6207_s13  ;;  %650 = vst.msk [vmem:[#allocation2 + $0x141] sm:$0xff] %vm578_vm2, %v571_v26  ;;  %v576_v47 = vmax.f32 %v5278_v44, 0.0  ;;  %v864_v44 = vld [vmem:[#allocation2 + $0xd8] sm:$0xff] }
 0x10e   : > { %v531_v51 = vpop.f32.mrf.mxu0 }
 0x10f   : > { %655 = vst.msk [vmem:[#allocation2 + $0x181] sm:$0xff] %vm578_vm2, %v576_v47  ;;  %v574_v53 = vmax.f32 %v531_v51, 0.0  ;;  %v896_v51 = vld [vmem:[#allocation2 + $0xd9] sm:$0xff] }
 0x110   : > { %v5279_v54 = vpop.f32.mrf.mxu0 }
 0x111   : > { %5491 = vrot.lane.b32.xlu0 %v5465_v1, %s6203_s9  ;;  %5511 = vrot.lane.b32.xlu1 %v5500_v21, %s6204_s10  ;;  %v577_v55 = vmax.f32 %v5279_v54, 0.0  ;;  %653 = vst.msk [vmem:[#allocation2 + $0x169] sm:$0xff] %vm578_vm2, %v574_v53  ;;  %v800_v1 = vld [vmem:[#allocation2 + $0xc9] sm:$0xff]  ;;  %v5378_v53 = vunpack.i.l.bf16 %v5377_v19  ;;  %v5379_v54 = vunpack.i.h.bf16 %v5377_v19  ;;  %v6597_v19 = vpack.i.bf16 %v776_v7, %v775_v6 }
 0x112   : > { %v534_v56 = vpop.f32.mrf.mxu0  ;;  %v5620_v2 = vpack.i.bf16 %v800_v1, %v799_v0  ;;  %v840_v7 = vld [vmem:[#allocation2 + $0x12a] sm:$0xff] }
 0x113   : > { %656 = vst.msk [vmem:[#allocation2 + $0x189] sm:$0xff] %vm578_vm2, %v577_v55  ;;  %v575_v57 = vmax.f32 %v534_v56, 0.0  ;;  %v657_v55 = vld [vmem:[#allocation2] sm:$0xff] }
 0x115   : > { %5506 = vrot.lane.b32.xlu0 %v5505_v31, %s6209_s15  ;;  %5516 = vrot.lane.b32.xlu1 %v5505_v31, %s6203_s9  ;;  %654 = vst.msk [vmem:[#allocation2 + $0x171] sm:$0xff] %vm578_vm2, %v575_v57 }
 0x119   : > { %5521 = vrot.lane.b32.xlu0 %v5495_v15, %s6206_s12  ;;  %5536 = vrot.lane.b32.xlu1 %v5535_v32, %s6206_s12  ;;  %v5660_v15 = vpack.i.bf16 %v893_v14, %v892_v13 }
 0x11d   : > { %5526 = vrot.lane.b32.xlu0 %v5500_v21, %s6208_s14  ;;  %5541 = vrot.lane.b32.xlu1 %v5540_v35, %s6208_s14  ;;  %v771_v21 = vld [vmem:[#allocation2 + $0xf0] sm:$0xff] }
 0x11e   : > { %v5695_v24 = vpack.i.bf16 %v772_v22, %v771_v21 }
 0x121   : > { %5531 = vrot.lane.b32.xlu0 %v5505_v31, %s6210_s16  ;;  %5546 = vrot.lane.b32.xlu1 %v5545_v40, %s6210_s16 }
 0x125   : > { %5551 = vrot.lane.b32.xlu0 %v5535_v32, %s6205_s11  ;;  %5566 = vrot.lane.b32.xlu1 %v5540_v35, %s6204_s10 }
 0x129   : > { %5556 = vrot.lane.b32.xlu0 %v5540_v35, %s6207_s13  ;;  %5576 = vrot.lane.b32.xlu1 %v5575_v46, %s6205_s11  ;;  %v836_v35 = vld [vmem:[#allocation2 + $0xfa] sm:$0xff] }
 0x12d   : > { %5561 = vrot.lane.b32.xlu0 %v5545_v40, %s6209_s15  ;;  %5581 = vrot.lane.b32.xlu1 %v5580_v52, %s6207_s13 }
 0x131   : > { %5571 = vrot.lane.b32.xlu0 %v5545_v40, %s6203_s9  ;;  %5591 = vrot.lane.b32.xlu1 %v5580_v52, %s6204_s10  ;;  %v5705_v40 = vpack.i.bf16 %v836_v35, %v835_v34 }
 0x135   : > { %5586 = vrot.lane.b32.xlu0 %v5585_v62, %s6209_s15  ;;  %5596 = vrot.lane.b32.xlu1 %v5585_v62, %s6203_s9 }
 0x139   : > { %5601 = vrot.lane.b32.xlu0 %v5575_v46, %s6206_s12  ;;  %5616 = vrot.lane.b32.xlu1 %v5615_v63, %s6206_s12  ;;  %v865_v46 = vld [vmem:[#allocation2 + $0xe0] sm:$0xff] }
 0x13a   : > { %v6572_v50 = vpack.i.bf16 %v865_v46, %v864_v44 }
 0x13d   : > { %5606 = vrot.lane.b32.xlu0 %v5580_v52, %s6208_s14  ;;  %5621 = vrot.lane.b32.xlu1 %v5620_v2, %s6208_s14  ;;  %v897_v52 = vld [vmem:[#allocation2 + $0xe1] sm:$0xff] }
 0x13e   : > { %v6579_v58 = vpack.i.bf16 %v897_v52, %v896_v51 }
 0x141   : > { %5611 = vrot.lane.b32.xlu0 %v5585_v62, %s6210_s16  ;;  %5626 = vrot.lane.b32.xlu1 %v5625_v5, %s6210_s16  ;;  %v1970_v62 = vsel %vm578_vm2, %v657_v55, %v5378_v53 }
 0x145   : > { %5631 = vrot.lane.b32.xlu0 %v5615_v63, %s6205_s11  ;;  %5646 = vrot.lane.b32.xlu1 %v5620_v2, %s6204_s10  ;;  %v1971_v63 = vsel %vm578_vm2, %v658_v59, %v5379_v54 }
 0x149   : > { %5636 = vrot.lane.b32.xlu0 %v5620_v2, %s6207_s13  ;;  %5656 = vrot.lane.b32.xlu1 %v5655_v8, %s6205_s11  ;;  %v928_v2 = vld [vmem:[#allocation2 + $0xda] sm:$0xff] }
 0x14d   : > { %5641 = vrot.lane.b32.xlu0 %v5625_v5, %s6209_s15  ;;  %5661 = vrot.lane.b32.xlu1 %v5660_v15, %s6207_s13 }
 0x151   : > { %5651 = vrot.lane.b32.xlu0 %v5625_v5, %s6203_s9  ;;  %5671 = vrot.lane.b32.xlu1 %v5660_v15, %s6204_s10  ;;  %v929_v5 = vld [vmem:[#allocation2 + $0xe2] sm:$0xff] }
 0x152   : > { %v5745_v18 = vpack.i.bf16 %v929_v5, %v928_v2 }
 0x155   : > { %5666 = vrot.lane.b32.xlu0 %v5665_v23, %s6209_s15  ;;  %5676 = vrot.lane.b32.xlu1 %v5665_v23, %s6203_s9 }
 0x157   : > { %v6544_v25 = vpop.permute.xlu0 %5406  ;;  %v6546_v26 = vpop.permute.xlu1 %5391 }
 0x158   : > { %v5409_v27 = vunpack.i.h.bf16 %v6544_v25  ;;  %v5408_v28 = vunpack.i.l.bf16 %v6544_v25 }
 0x159   : > { %5681 = vrot.lane.b32.xlu0 %v5655_v8, %s6206_s12  ;;  %5696 = vrot.lane.b32.xlu1 %v5695_v24, %s6206_s12  ;;  %v2003_v8 = vsel %vm2002_vm5, %v1970_v62, %v5383_v60  ;;  %v807_v60 = vld [vmem:[#allocation2 + $0x121] sm:$0xff] }
 0x15b   : > { %v6550_v31 = vpop.permute.xlu0 %5411  ;;  %v6552_v32 = vpop.permute.xlu1 %5396 }
 0x15c   : > { %v5414_v35 = vunpack.i.h.bf16 %v6550_v31 }
 0x15d   : > { %5686 = vrot.lane.b32.xlu0 %v5660_v15, %s6208_s14  ;;  %5701 = vrot.lane.b32.xlu1 %v5700_v33, %s6208_s14  ;;  %v2004_v15 = vsel %vm2002_vm5, %v1971_v63, %v5384_v61  ;;  %v808_v61 = vld [vmem:[#allocation2 + $0x129] sm:$0xff] }
 0x15e   : > { %v5780_v6 = vpack.i.bf16 %v808_v61, %v807_v60  ;;  %v900_v61 = vld [vmem:[#allocation2 + $0x109] sm:$0xff] }
 0x15f   : > { %v6556_v36 = vpop.permute.xlu0 %5416  ;;  %v6558_v37 = vpop.permute.xlu1 %5401 }
 0x161   : > { %5691 = vrot.lane.b32.xlu0 %v5665_v23, %s6210_s16  ;;  %5706 = vrot.lane.b32.xlu1 %v5705_v40, %s6210_s16 }
 0x163   : > { %v6562_v41 = vpop.permute.xlu0 %5426  ;;  %v6564_v42 = vpop.permute.xlu1 %5421 }
 0x165   : > { %5711 = vrot.lane.b32.xlu0 %v5695_v24, %s6205_s11  ;;  %5726 = vrot.lane.b32.xlu1 %v5700_v33, %s6204_s10 }
 0x167   : > { %v6568_v47 = vpop.permute.xlu1 %5436  ;;  %v6570_v48 = vpop.permute.xlu0 %5431 }
 0x168   : > { %v5434_v51 = vunpack.i.h.bf16 %v6570_v48  ;;  %v5433_v25 = vunpack.i.l.bf16 %v6570_v48  ;;  %v5439_v62 = vunpack.i.h.bf16 %v6568_v47  ;;  %v5438_v63 = vunpack.i.l.bf16 %v6568_v47  ;;  %v839_v47 = vld [vmem:[#allocation2 + $0x122] sm:$0xff] }
 0x169   : > { %5716 = vrot.lane.b32.xlu0 %v5700_v33, %s6207_s13  ;;  %5736 = vrot.lane.b32.xlu1 %v6572_v50, %s6205_s11 }
 0x16a   : > { %v1973_v2 = vsel %vm578_vm2, %v6442_v45, %v5434_v51  ;;  %v5394_v45 = vunpack.i.h.bf16 %v6546_v26 }
 0x16b   : > { %v5442_v56 = vpop.permute.xlu0 %5441  ;;  %v6577_v57 = vpop.permute.xlu1 %5456 }
 0x16c   : > { %v5444_v3 = vunpack.i.h.bf16 %v5442_v56  ;;  %v5443_v4 = vunpack.i.l.bf16 %v5442_v56  ;;  %v5419_v56 = vunpack.i.h.bf16 %v6556_v36 }
 0x16d   : > { %5721 = vrot.lane.b32.xlu0 %v5705_v40, %s6209_s15  ;;  %5741 = vrot.lane.b32.xlu1 %v6579_v58, %s6207_s13 }
 0x16e   : > { %v2037_v21 = vsel %vm2035_vm6, %v2004_v15, %v5444_v3  ;;  %v2036_v22 = vsel %vm2035_vm6, %v2003_v8, %v5443_v4 }
 0x16f   : > { %v5447_v0 = vpop.permute.xlu0 %5446  ;;  %v6588_v1 = vpop.permute.xlu1 %5461 }
 0x170   : > { %v5449_v13 = vunpack.i.h.bf16 %v5447_v0  ;;  %v5448_v14 = vunpack.i.l.bf16 %v5447_v0 }
 0x171   : > { %5731 = vrot.lane.b32.xlu0 %v5705_v40, %s6203_s9  ;;  %5751 = vrot.lane.b32.xlu1 %v6579_v58, %s6204_s10  ;;  %v5413_v40 = vunpack.i.l.bf16 %v6550_v31  ;;  %v5418_v31 = vunpack.i.l.bf16 %v6556_v36 }
 0x172   : > { %v2068_v33 = vsel %vm336_vm0, %v2036_v22, %v5448_v14  ;;  %v2069_v34 = vsel %vm336_vm0, %v2037_v21, %v5449_v13  ;;  %v2006_v13 = vsel %vm2002_vm5, %v1973_v2, %v5439_v62  ;;  %v5399_v22 = vunpack.i.h.bf16 %v6552_v32  ;;  %v901_v62 = vld [vmem:[#allocation2 + $0x111] sm:$0xff] }
 0x173   : > { %v5452_v16 = vpop.permute.xlu0 %5451  ;;  %v6595_v17 = vpop.permute.xlu1 %5466 }
 0x174   : > { %v5454_v23 = vunpack.i.h.bf16 %v5452_v16  ;;  %v5453_v24 = vunpack.i.l.bf16 %v5452_v16  ;;  %v5785_v16 = vpack.i.bf16 %v840_v7, %v839_v47  ;;  %v6683_v47 = vpack.i.bf16 %v901_v62, %v900_v61 }
 0x175   : > { %5746 = vrot.lane.b32.xlu0 %v5745_v18, %s6209_s15  ;;  %5756 = vrot.lane.b32.xlu1 %v5745_v18, %s6203_s9  ;;  %v5428_v7 = vunpack.i.l.bf16 %v6562_v41 }
 0x176   : > { %v2101_v44 = vsel %vm2100_vm7, %v2068_v33, %v5453_v24  ;;  %v2102_v46 = vsel %vm2100_vm7, %v2069_v34, %v5454_v23  ;;  %v5398_v23 = vunpack.i.l.bf16 %v6552_v32 }
 0x177   : > { %v6613_v52 = vpop.permute.xlu0 %5471  ;;  %v6615_v53 = vpop.permute.xlu1 %5486  ;;  %v2134_v54 = vsel %vm2133_vm8, %v2101_v44, %v5408_v28  ;;  %v2135_v55 = vsel %vm2133_vm8, %v2102_v46, %v5409_v27  ;;  %v5403_v44 = vunpack.i.l.bf16 %v6558_v37 }
 0x178   : > { %v2167_v48 = vsel %vm2166_vm9, %v2134_v54, %v5413_v40  ;;  %v2168_v59 = vsel %vm2166_vm9, %v2135_v55, %v5414_v35  ;;  %v868_v35 = vld [vmem:[#allocation2 + $0x108] sm:$0xff]  ;;  %v869_v40 = vld [vmem:[#allocation2 + $0x110] sm:$0xff] }
 0x179   : > { %5761 = vrot.lane.b32.xlu0 %v6572_v50, %s6206_s12  ;;  %5776 = vrot.lane.b32.xlu1 %v6597_v19, %s6206_s12  ;;  %v2200_v0 = vsel %vm2199_vm10, %v2167_v48, %v5418_v31  ;;  %v2201_v36 = vsel %vm2199_vm10, %v2168_v59, %v5419_v56  ;;  %v1972_v50 = vsel %vm578_vm2, %v6449_v49, %v5433_v25  ;;  %v5393_v49 = vunpack.i.l.bf16 %v6546_v26 }
 0x17a   : > { %v2232_v5 = vpack.c.bf16 %v2201_v36, %v2200_v0  ;;  %v2005_v8 = vsel %vm2002_vm5, %v1972_v50, %v5438_v63  ;;  %v6668_v56 = vpack.i.bf16 %v869_v40, %v868_v35 }
 0x17b   : > { %v6635_v3 = vpop.permute.xlu0 %5476  ;;  %v5497_v4 = vpop.permute.xlu1 %5496  ;;  %v2038_v21 = vsel %vm2035_vm6, %v2005_v8, %v5393_v49 }
 0x17c   : > { %5286 = vmatprep.mubr.msk.bf16.mxu1 %vm2268_vm11, %v2232_v5  ;;  %v2070_v26 = vsel %vm336_vm0, %v2038_v21, %v5398_v23  ;;  %v5499_v33 = vunpack.i.h.bf16 %v5497_v4  ;;  %v5498_v34 = vunpack.i.l.bf16 %v5497_v4  ;;  %v5424_v4 = vunpack.i.h.bf16 %v6564_v42  ;;  %v932_v21 = vld [vmem:[#allocation2 + $0x10a] sm:$0xff] }
 0x17d   : > { %5766 = vrot.lane.b32.xlu0 %v6579_v58, %s6208_s14  ;;  %5781 = vrot.lane.b32.xlu1 %v5780_v6, %s6208_s14  ;;  %v2039_v58 = vsel %vm2035_vm6, %v2006_v13, %v5394_v45  ;;  %v2103_v51 = vsel %vm2100_vm7, %v2070_v26, %v5403_v44  ;;  %v5423_v5 = vunpack.i.l.bf16 %v6564_v42 }
 0x17e   : > { %v2071_v28 = vsel %vm336_vm0, %v2039_v58, %v5399_v22  ;;  %v1975_v42 = vsel %vm578_vm2, %v6417_v10, %v5424_v4  ;;  %v933_v58 = vld [vmem:[#allocation2 + $0x112] sm:$0xff] }
 0x17f   : > { %v6645_v14 = vpop.permute.xlu0 %5481  ;;  %v5502_v15 = vpop.permute.xlu1 %5501  ;;  %v1974_v45 = vsel %vm578_vm2, %v6415_v9, %v5423_v5  ;;  %v779_v10 = vld [vmem:[#allocation2 + $0x150] sm:$0xff]  ;;  %v812_v4 = vld [vmem:[#allocation2 + $0x159] sm:$0xff] }
 0x180   : > { %v5504_v46 = vunpack.i.h.bf16 %v5502_v15  ;;  %v5503_v32 = vunpack.i.l.bf16 %v5502_v15  ;;  %v5484_v61 = vunpack.i.h.bf16 %v6645_v14  ;;  %v5483_v62 = vunpack.i.l.bf16 %v6645_v14 }
 0x181   : > { %5771 = vrot.lane.b32.xlu0 %v5745_v18, %s6210_s16  ;;  %5786 = vrot.lane.b32.xlu1 %v5785_v16, %s6210_s16  ;;  %v5404_v18 = vunpack.i.h.bf16 %v6558_v37  ;;  %v2136_v37 = vsel %vm2133_vm8, %v2103_v51, %v5498_v34  ;;  %v780_v34 = vld [vmem:[#allocation2 + $0x158] sm:$0xff] }
 0x182   : > { %v2169_v60 = vsel %vm2166_vm9, %v2136_v37, %v5503_v32  ;;  %v5479_v37 = vunpack.i.h.bf16 %v6635_v3 }
 0x183   : > { %v6653_v24 = vpop.permute.xlu0 %5491  ;;  %v6655_v27 = vpop.permute.xlu1 %5511  ;;  %v2104_v25 = vsel %vm2100_vm7, %v2071_v28, %v5404_v18 }
 0x184   : > { %v2137_v31 = vsel %vm2133_vm8, %v2104_v25, %v5499_v33  ;;  %v5825_v33 = vpack.i.bf16 %v933_v58, %v932_v21 }
 0x185   : > { %5791 = vrot.lane.b32.xlu0 %v6597_v19, %s6205_s11  ;;  %5806 = vrot.lane.b32.xlu1 %v5780_v6, %s6204_s10  ;;  %v2170_v19 = vsel %vm2166_vm9, %v2137_v31, %v5504_v46  ;;  %v5473_v46 = vunpack.i.l.bf16 %v6613_v52  ;;  %v5855_v31 = vpack.i.bf16 %v780_v34, %v779_v10  ;;  %v5463_v10 = vunpack.i.l.bf16 %v6588_v1 }
 0x187   : > { %v5507_v54 = vpop.permute.xlu0 %5506  ;;  %v6666_v55 = vpop.permute.xlu1 %5516 }
 0x188   : > { %v5509_v48 = vunpack.i.h.bf16 %v5507_v54  ;;  %v5508_v59 = vunpack.i.l.bf16 %v5507_v54  ;;  %v5519_v5 = vunpack.i.h.bf16 %v6666_v55 }
 0x189   : > { %5796 = vrot.lane.b32.xlu0 %v5780_v6, %s6207_s13  ;;  %5816 = vrot.lane.b32.xlu1 %v6668_v56, %s6205_s11  ;;  %v5429_v6 = vunpack.i.h.bf16 %v6562_v41  ;;  %v2007_v41 = vsel %vm2002_vm5, %v1974_v45, %v5428_v7 }
 0x18a   : > { %v2202_v63 = vsel %vm2199_vm10, %v2169_v60, %v5508_v59  ;;  %v2203_v0 = vsel %vm2199_vm10, %v2170_v19, %v5509_v48  ;;  %v5478_v48 = vunpack.i.l.bf16 %v6635_v3 }
 0x18b   : > { %v5522_v36 = vpop.permute.xlu0 %5521  ;;  %v6679_v50 = vpop.permute.xlu1 %5536  ;;  %v2233_v2 = vpack.c.bf16 %v2203_v0, %v2202_v63  ;;  %v2008_v26 = vsel %vm2002_vm5, %v1975_v42, %v5429_v6  ;;  %v5514_v63 = vunpack.i.h.bf16 %v6655_v27  ;;  %v5513_v0 = vunpack.i.l.bf16 %v6655_v27 }
 0x18c   : > { %v5524_v49 = vunpack.i.h.bf16 %v5522_v36  ;;  %v5523_v15 = vunpack.i.l.bf16 %v5522_v36  ;;  %v5518_v6 = vunpack.i.l.bf16 %v6666_v55  ;;  %v843_v55 = vld [vmem:[#allocation2 + $0x152] sm:$0xff] }
 0x18d   : > { %5287 = vmatmul.mubr.msk.bf16.vlgmr.msra.gmra.mxu1 %vm2268_vm11, %v2233_v2  ;;  %5801 = vrot.lane.b32.xlu0 %v5785_v16, %s6209_s15  ;;  %v811_v2 = vld [vmem:[#allocation2 + $0x151] sm:$0xff]  ;;  %v1976_v42 = vsel %vm578_vm2, %v6471_v11, %v5513_v0  ;;  %v5458_v11 = vunpack.i.l.bf16 %v6577_v57  ;;  %v904_v0 = vld [vmem:[#allocation2 + $0x139] sm:$0xff] }
 0x18e   : > { %5821 = vrot.lane.b32.xlu1 %v6683_v47, %s6207_s13  ;;  %v2041_v35 = vsel %vm2035_vm6, %v2008_v26, %v5524_v49  ;;  %v2040_v40 = vsel %vm2035_vm6, %v2007_v41, %v5523_v15  ;;  %v5860_v45 = vpack.i.bf16 %v812_v4, %v811_v2  ;;  %v1977_v49 = vsel %vm578_vm2, %v6473_v12, %v5514_v63  ;;  %v844_v15 = vld [vmem:[#allocation2 + $0x15a] sm:$0xff] }
 0x18f   : > { %v5527_v8 = vpop.permute.xlu0 %5526  ;;  %v6691_v13 = vpop.permute.xlu1 %5541  ;;  %v2009_v21 = vsel %vm2002_vm5, %v1976_v42, %v5518_v6  ;;  %v2010_v58 = vsel %vm2002_vm5, %v1977_v49, %v5519_v5  ;;  %v5865_v41 = vpack.i.bf16 %v844_v15, %v843_v55 }
 0x190   : > { %v5529_v22 = vunpack.i.h.bf16 %v5527_v8  ;;  %v5528_v23 = vunpack.i.l.bf16 %v5527_v8  ;;  %v2042_v26 = vsel %vm2035_vm6, %v2009_v21, %v5458_v11  ;;  %v936_v21 = vld [vmem:[#allocation2 + $0x13a] sm:$0xff] }
 0x191   : > { %5811 = vrot.lane.b32.xlu0 %v5785_v16, %s6203_s9  ;;  %v5474_v16 = vunpack.i.h.bf16 %v6613_v52 }
 0x192   : > { %5831 = vrot.lane.b32.xlu1 %v6683_v47, %s6204_s10  ;;  %v2072_v32 = vsel %vm336_vm0, %v2040_v40, %v5528_v23  ;;  %v2073_v51 = vsel %vm336_vm0, %v2041_v35, %v5529_v22  ;;  %v5459_v22 = vunpack.i.h.bf16 %v6577_v57  ;;  %v2074_v57 = vsel %vm336_vm0, %v2042_v26, %v5463_v10 }
 0x193   : > { %v5532_v28 = vpop.permute.xlu0 %5531  ;;  %v6702_v9 = vpop.permute.xlu1 %5546 }
 0x194   : > { %v5534_v18 = vunpack.i.h.bf16 %v5532_v28  ;;  %v5533_v44 = vunpack.i.l.bf16 %v5532_v28  ;;  %v5464_v28 = vunpack.i.h.bf16 %v6588_v1  ;;  %v5468_v1 = vunpack.i.l.bf16 %v6595_v17 }
 0x195   : > { %5826 = vrot.lane.b32.xlu0 %v5825_v33, %s6209_s15 }
 0x196   : > { %v2105_v25 = vsel %vm2100_vm7, %v2072_v32, %v5533_v44  ;;  %v2106_v54 = vsel %vm2100_vm7, %v2073_v51, %v5534_v18  ;;  %5836 = vrot.lane.b32.xlu1 %v5825_v33, %s6203_s9 }
 0x197   : > { %v2138_v59 = vsel %vm2133_vm8, %v2105_v25, %v5473_v46  ;;  %v2139_v52 = vsel %vm2133_vm8, %v2106_v54, %v5474_v16  ;;  %v6718_v60 = vpop.permute.xlu0 %5551  ;;  %v6720_v19 = vpop.permute.xlu1 %5566  ;;  %v6763_v16 = vld [vmem:[#allocation2 + $0x138] sm:$0xff]  ;;  %v6765_v46 = vld [vmem:[#allocation2 + $0x140] sm:$0xff]  ;;  %v2107_v25 = vsel %vm2100_vm7, %v2074_v57, %v5468_v1 }
 0x198   : > { %v2171_v3 = vsel %vm2166_vm9, %v2138_v59, %v5478_v48  ;;  %v2172_v36 = vsel %vm2166_vm9, %v2139_v52, %v5479_v37  ;;  %v6777_v59 = vpack.i.bf16 %v6765_v46, %v6763_v16  ;;  %v783_v57 = vld [vmem:[#allocation2 + $0x180] sm:$0xff] }
 0x199   : > { %5841 = vrot.lane.b32.xlu0 %v6668_v56, %s6206_s12  ;;  %v2204_v14 = vsel %vm2199_vm10, %v2171_v3, %v5483_v62  ;;  %v2205_v7 = vsel %vm2199_vm10, %v2172_v36, %v5484_v61  ;;  %v905_v3 = vld [vmem:[#allocation2 + $0x141] sm:$0xff] }
 0x19a   : > { %5856 = vrot.lane.b32.xlu1 %v5855_v31, %s6206_s12  ;;  %v2234_v56 = vpack.c.bf16 %v2205_v7, %v2204_v14  ;;  %v6790_v14 = vpack.i.bf16 %v905_v3, %v904_v0  ;;  %v5489_v7 = vunpack.i.h.bf16 %v6615_v53 }
 0x19b   : > { %v6735_v27 = vpop.permute.xlu0 %5556  ;;  %v5577_v8 = vpop.permute.xlu1 %5576 }
 0x19c   : > { %5290 = vmatprep.mubr.msk.bf16.mxu1 %vm2268_vm11, %v2234_v56  ;;  %v5579_v18 = vunpack.i.h.bf16 %v5577_v8  ;;  %v5578_v44 = vunpack.i.l.bf16 %v5577_v8  ;;  %v5488_v8 = vunpack.i.l.bf16 %v6615_v53  ;;  %v5494_v56 = vunpack.i.h.bf16 %v6653_v24 }
 0x19d   : > { %5846 = vrot.lane.b32.xlu0 %v6683_v47, %s6208_s14  ;;  %v2043_v47 = vsel %vm2035_vm6, %v2010_v58, %v5459_v22  ;;  %v937_v58 = vld [vmem:[#allocation2 + $0x142] sm:$0xff] }
 0x19e   : > { %5861 = vrot.lane.b32.xlu1 %v5860_v45, %s6208_s14  ;;  %v2075_v40 = vsel %vm336_vm0, %v2043_v47, %v5464_v28  ;;  %v1978_v53 = vsel %vm578_vm2, %v6437_v38, %v5488_v8  ;;  %v5905_v10 = vpack.i.bf16 %v937_v58, %v936_v21  ;;  %v848_v58 = vld [vmem:[#allocation2 + $0x18a] sm:$0xff] }
 0x19f   : > { %v6749_v23 = vpop.permute.xlu0 %5561  ;;  %v5582_v12 = vpop.permute.xlu1 %5581 }
 0x1a0   : > { %v5584_v32 = vunpack.i.h.bf16 %v5582_v12  ;;  %v5583_v51 = vunpack.i.l.bf16 %v5582_v12  ;;  %v1979_v12 = vsel %vm578_vm2, %v6439_v39, %v5489_v7  ;;  %v5554_v39 = vunpack.i.h.bf16 %v6718_v60 }
 0x1a1   : > { %5851 = vrot.lane.b32.xlu0 %v5825_v33, %s6210_s16  ;;  %v5469_v33 = vunpack.i.h.bf16 %v6595_v17  ;;  %v2140_v17 = vsel %vm2133_vm8, %v2107_v25, %v5578_v44  ;;  %v2012_v26 = vsel %vm2002_vm5, %v1979_v12, %v5494_v56  ;;  %v5538_v12 = vunpack.i.l.bf16 %v6679_v50 }
 0x1a2   : > { %5866 = vrot.lane.b32.xlu1 %v5865_v41, %s6210_s16 }
 0x1a3   : > { %v6757_v34 = vpop.permute.xlu0 %5571  ;;  %v6759_v35 = vpop.permute.xlu1 %5591  ;;  %v2108_v54 = vsel %vm2100_vm7, %v2075_v40, %v5469_v33  ;;  %v784_v40 = vld [vmem:[#allocation2 + $0x188] sm:$0xff]  ;;  %v5553_v33 = vunpack.i.l.bf16 %v6718_v60 }
 0x1a4   : > { %v2141_v52 = vsel %vm2133_vm8, %v2108_v54, %v5579_v18  ;;  %v5935_v54 = vpack.i.bf16 %v784_v40, %v783_v57  ;;  %v5594_v0 = vunpack.i.h.bf16 %v6759_v35  ;;  %v5593_v3 = vunpack.i.l.bf16 %v6759_v35  ;;  %v6860_v57 = vld [vmem:[#allocation2 + $0x168] sm:$0xff] }
 0x1a5   : > { %5871 = vrot.lane.b32.xlu0 %v5855_v31, %s6205_s11  ;;  %v2173_v31 = vsel %vm2166_vm9, %v2140_v17, %v5583_v51  ;;  %v2174_v63 = vsel %vm2166_vm9, %v2141_v52, %v5584_v32  ;;  %v5558_v52 = vunpack.i.l.bf16 %v6735_v27 }
 0x1a6   : > { %5886 = vrot.lane.b32.xlu1 %v5860_v45, %s6204_s10 }
 0x1a7   : > { %v5587_v37 = vpop.permute.xlu0 %5586  ;;  %v6773_v48 = vpop.permute.xlu1 %5596 }
 0x1a8   : > { %v5589_v61 = vunpack.i.h.bf16 %v5587_v37  ;;  %v5588_v62 = vunpack.i.l.bf16 %v5587_v37  ;;  %v5559_v37 = vunpack.i.h.bf16 %v6735_v27  ;;  %v5598_v7 = vunpack.i.l.bf16 %v6773_v48 }
 0x1a9   : > { %5876 = vrot.lane.b32.xlu0 %v5860_v45, %s6207_s13  ;;  %v5493_v45 = vunpack.i.l.bf16 %v6653_v24 }
 0x1aa   : > { %v2206_v36 = vsel %vm2199_vm10, %v2173_v31, %v5588_v62  ;;  %v2207_v2 = vsel %vm2199_vm10, %v2174_v63, %v5589_v61  ;;  %5896 = vrot.lane.b32.xlu1 %v6777_v59, %s6205_s11  ;;  %v5564_v31 = vunpack.i.h.bf16 %v6749_v23  ;;  %v5563_v63 = vunpack.i.l.bf16 %v6749_v23 }
 0x1ab   : > { %v5602_v4 = vpop.permute.xlu0 %5601  ;;  %v6788_v5 = vpop.permute.xlu1 %5616  ;;  %v2235_v6 = vpack.c.bf16 %v2207_v2, %v2206_v36  ;;  %v2011_v24 = vsel %vm2002_vm5, %v1978_v53, %v5493_v45  ;;  %v815_v2 = vld [vmem:[#allocation2 + $0x181] sm:$0xff]  ;;  %v667_v45 = vld [vmem:[#allocation2 + $0x78] sm:$0xff]  ;;  %v5539_v53 = vunpack.i.h.bf16 %v6679_v50 }
 0x1ac   : > { %v5604_v55 = vunpack.i.h.bf16 %v5602_v4  ;;  %v5603_v15 = vunpack.i.l.bf16 %v5602_v4  ;;  %v816_v4 = vld [vmem:[#allocation2 + $0x189] sm:$0xff] }
 0x1ad   : > { %5291 = vmatmul.mubr.msk.bf16.gmra.mxu1 %vm2268_vm11, %v2235_v6  ;;  %5881 = vrot.lane.b32.xlu0 %v5865_v41, %s6209_s15  ;;  %v5599_v6 = vunpack.i.h.bf16 %v6773_v48  ;;  %v847_v48 = vld [vmem:[#allocation2 + $0x182] sm:$0xff] }
 0x1ae   : > { %5901 = vrot.lane.b32.xlu1 %v6790_v14, %s6207_s13  ;;  %v2044_v38 = vsel %vm2035_vm6, %v2011_v24, %v5603_v15  ;;  %v1980_v15 = vsel %vm578_vm2, %v667_v45, %v5593_v3 }
 0x1af   : > { %v5607_v42 = vpop.permute.xlu0 %5606  ;;  %v6800_v49 = vpop.permute.xlu1 %5621 }
 0x1b0   : > { %v5609_v22 = vunpack.i.h.bf16 %v5607_v42  ;;  %v5608_v11 = vunpack.i.l.bf16 %v5607_v42  ;;  %v668_v42 = vld [vmem:[#allocation2 + $0x80] sm:$0xff] }
 0x1b1   : > { %5891 = vrot.lane.b32.xlu0 %v5865_v41, %s6203_s9  ;;  %v2045_v41 = vsel %vm2035_vm6, %v2012_v26, %v5604_v55  ;;  %v5940_v55 = vpack.i.bf16 %v816_v4, %v815_v2  ;;  %v1981_v21 = vsel %vm578_vm2, %v668_v42, %v5594_v0  ;;  %v940_v4 = vld [vmem:[#allocation2 + $0x16a] sm:$0xff] }
 0x1b2   : > { %5911 = vrot.lane.b32.xlu1 %v6790_v14, %s6204_s10  ;;  %v2076_v1 = vsel %vm336_vm0, %v2044_v38, %v5608_v11  ;;  %v2077_v32 = vsel %vm336_vm0, %v2045_v41, %v5609_v22  ;;  %v2013_v22 = vsel %vm2002_vm5, %v1980_v15, %v5598_v7  ;;  %v2014_v11 = vsel %vm2002_vm5, %v1981_v21, %v5599_v6  ;;  %v941_v6 = vld [vmem:[#allocation2 + $0x172] sm:$0xff] }
 0x1b3   : > { %v5612_v47 = vpop.permute.xlu0 %5611  ;;  %v6811_v28 = vpop.permute.xlu1 %5626  ;;  %v2046_v40 = vsel %vm2035_vm6, %v2013_v22, %v5538_v12  ;;  %v2047_v41 = vsel %vm2035_vm6, %v2014_v11, %v5539_v53  ;;  %v5544_v38 = vunpack.i.h.bf16 %v6691_v13  ;;  %v5970_v42 = vpack.i.bf16 %v941_v6, %v940_v4  ;;  %v912_v11 = vld [vmem:[#allocation2 + $0x199] sm:$0xff]  ;;  %v913_v53 = vld [vmem:[#allocation2 + $0x1a1] sm:$0xff] }
 0x1b4   : > { %v5614_v18 = vunpack.i.h.bf16 %v5612_v47  ;;  %v5613_v44 = vunpack.i.l.bf16 %v5612_v47  ;;  %v6858_v47 = vpack.i.bf16 %v848_v58, %v847_v48  ;;  %v5569_v15 = vunpack.i.h.bf16 %v6720_v19 }
 0x1b5   : > { %5906 = vrot.lane.b32.xlu0 %v5905_v10, %s6209_s15  ;;  %v5568_v21 = vunpack.i.l.bf16 %v6720_v19  ;;  %v5573_v48 = vunpack.i.l.bf16 %v6757_v34 }
 0x1b6   : > { %v2109_v51 = vsel %vm2100_vm7, %v2076_v1, %v5613_v44  ;;  %v2110_v25 = vsel %vm2100_vm7, %v2077_v32, %v5614_v18  ;;  %5916 = vrot.lane.b32.xlu1 %v5905_v10, %s6203_s9  ;;  %v5543_v18 = vunpack.i.l.bf16 %v6691_v13  ;;  %v2079_v1 = vsel %vm336_vm0, %v2047_v41, %v5544_v38 }
 0x1b7   : > { %v2142_v17 = vsel %vm2133_vm8, %v2109_v51, %v5553_v33  ;;  %v2143_v60 = vsel %vm2133_vm8, %v2110_v25, %v5554_v39  ;;  %v6827_v61 = vpop.permute.xlu0 %5631  ;;  %v6829_v62 = vpop.permute.xlu1 %5646  ;;  %v908_v51 = vld [vmem:[#allocation2 + $0x169] sm:$0xff]  ;;  %v909_v25 = vld [vmem:[#allocation2 + $0x171] sm:$0xff]  ;;  %v5549_v13 = vunpack.i.h.bf16 %v6702_v9  ;;  %v1982_v19 = vsel %vm578_vm2, %v6496_v29, %v5568_v21 }
 0x1b8   : > { %v2175_v27 = vsel %vm2166_vm9, %v2142_v17, %v5558_v52  ;;  %v2176_v36 = vsel %vm2166_vm9, %v2143_v60, %v5559_v37  ;;  %v2078_v33 = vsel %vm336_vm0, %v2046_v40, %v5543_v18  ;;  %v5548_v37 = vunpack.i.l.bf16 %v6702_v9 }
 0x1b9   : > { %5921 = vrot.lane.b32.xlu0 %v6777_v59, %s6206_s12  ;;  %v2208_v23 = vsel %vm2199_vm10, %v2175_v27, %v5563_v63  ;;  %v2209_v8 = vsel %vm2199_vm10, %v2176_v36, %v5564_v31  ;;  %v2112_v31 = vsel %vm2100_vm7, %v2079_v1, %v5549_v13  ;;  %v5965_v3 = vpack.i.bf16 %v909_v25, %v908_v51  ;;  %v945_v51 = vld [vmem:[#allocation2 + $0x1a2] sm:$0xff] }
 0x1ba   : > { %5936 = vrot.lane.b32.xlu1 %v5935_v54, %s6206_s12  ;;  %v2236_v59 = vpack.c.bf16 %v2209_v8, %v2208_v23  ;;  %v2111_v60 = vsel %vm2100_vm7, %v2078_v33, %v5548_v37  ;;  %v1983_v38 = vsel %vm578_vm2, %v6498_v30, %v5569_v15  ;;  %v2015_v18 = vsel %vm2002_vm5, %v1982_v19, %v5573_v48 }
 0x1bb   : > { %v6844_v35 = vpop.permute.xlu0 %5636  ;;  %v5657_v56 = vpop.permute.xlu1 %5656  ;;  %v5634_v30 = vunpack.i.h.bf16 %v6827_v61  ;;  %v5633_v37 = vunpack.i.l.bf16 %v6827_v61 }
 0x1bc   : > { %5294 = vmatprep.mubr.msk.bf16.mxu1 %vm2268_vm11, %v2236_v59  ;;  %v5659_v32 = vunpack.i.h.bf16 %v5657_v56 }
 0x1bd   : > { %5926 = vrot.lane.b32.xlu0 %v6790_v14, %s6208_s14  ;;  %v6862_v14 = vld [vmem:[#allocation2 + $0x170] sm:$0xff] }
 0x1be   : > { %5941 = vrot.lane.b32.xlu1 %v5940_v55, %s6208_s14  ;;  %v5960_v39 = vpack.i.bf16 %v6862_v14, %v6860_v57  ;;  %v2145_v27 = vsel %vm2133_vm8, %v2112_v31, %v5659_v32 }
 0x1bf   : > { %v6856_v24 = vpop.permute.xlu0 %5641  ;;  %v5662_v26 = vpop.permute.xlu1 %5661 }
 0x1c0   : > { %v5664_v52 = vunpack.i.h.bf16 %v5662_v26  ;;  %v5663_v17 = vunpack.i.l.bf16 %v5662_v26 }
 0x1c1   : > { %5931 = vrot.lane.b32.xlu0 %v5905_v10, %s6210_s16  ;;  %v5658_v10 = vunpack.i.l.bf16 %v5657_v56 }
 0x1c2   : > { %5946 = vrot.lane.b32.xlu1 %v6858_v47, %s6210_s16  ;;  %v2178_v7 = vsel %vm2166_vm9, %v2145_v27, %v5664_v52 }
 0x1c3   : > { %v6871_v50 = vpop.permute.xlu0 %5651  ;;  %v6873_v44 = vpop.permute.xlu1 %5671  ;;  %v2144_v36 = vsel %vm2133_vm8, %v2111_v60, %v5658_v10  ;;  %v944_v10 = vld [vmem:[#allocation2 + $0x19a] sm:$0xff] }
 0x1c4   : > { %v2530_v60 = vld [vmem:[%s8395_s3] sm:$0x3]  ;;  %v6010_v27 = vpack.i.bf16 %v945_v51, %v944_v10 }
 0x1c5   : > { %5951 = vrot.lane.b32.xlu0 %v5935_v54, %s6205_s11  ;;  %v2177_v54 = vsel %vm2166_vm9, %v2144_v36, %v5663_v17  ;;  %5353 = vmatprep.subr.msk.bf16.mxu0 %vm2317_vm4, %v2530_v60  ;;  %v2580_v61 = vsel %vm2317_vm4, %v2530_v60, 0  ;;  %v5639_v36 = vunpack.i.h.bf16 %v6844_v35  ;;  %vm2968_vm4 = vcmask 256000  }
 0x1c6   : > { %5961 = vrot.lane.b32.xlu1 %v5960_v39, %s6205_s11  ;;  %5319 = vmatpush3.bf16.msra.mxu0 %v2580_v61  ;;  %2970 = vst.msk [vmem:[#allocation3 + $0x13] sm:$0x7] %vm2968_vm4, %v6202_v43  ;;  %2969 = vst.msk [vmem:[#allocation3] sm:$0x7] %vm2968_vm4, %v6202_v43 }
 0x1c7   : > { %v5667_v63 = vpop.permute.xlu0 %5666  ;;  %v6885_v0 = vpop.permute.xlu1 %5676  ;;  %3674 = vst.msk [vmem:[#allocation4] sm:$0x7] %vm2968_vm4, %v6202_v43  ;;  %3675 = vst.msk [vmem:[#allocation4 + $0x13] sm:$0x7] %vm2968_vm4, %v6202_v43 }
 0x1c8   : > { %v5669_v2 = vunpack.i.h.bf16 %v5667_v63  ;;  %v5668_v9 = vunpack.i.l.bf16 %v5667_v63  ;;  %v5678_v15 = vunpack.i.l.bf16 %v6885_v0  ;;  %4164 = vst.msk [vmem:[#allocation5] sm:$0x7] %vm2968_vm4, %v6202_v43  ;;  %4165 = vst.msk [vmem:[#allocation5 + $0x13] sm:$0x7] %vm2968_vm4, %v6202_v43 }
 0x1c9   : > { %5956 = vrot.lane.b32.xlu0 %v5940_v55, %s6207_s13  ;;  %v5574_v55 = vunpack.i.h.bf16 %v6757_v34  ;;  %v5985_v34 = vpack.i.bf16 %v913_v53, %v912_v11 }
 0x1ca   : > { %v2210_v23 = vsel %vm2199_vm10, %v2177_v54, %v5668_v9  ;;  %v2211_v8 = vsel %vm2199_vm10, %v2178_v7, %v5669_v2  ;;  %5966 = vrot.lane.b32.xlu1 %v5965_v3, %s6207_s13  ;;  %v5638_v2 = vunpack.i.l.bf16 %v6844_v35  ;;  %v5644_v54 = vunpack.i.h.bf16 %v6856_v24 }
 0x1cb   : > { %v5682_v56 = vpop.permute.xlu0 %5681  ;;  %v6895_v59 = vpop.permute.xlu1 %5696  ;;  %v2237_v45 = vpack.c.bf16 %v2211_v8, %v2210_v23  ;;  %v2016_v33 = vsel %vm2002_vm5, %v1983_v38, %v5574_v55  ;;  %v5643_v7 = vunpack.i.l.bf16 %v6856_v24  ;;  %v5674_v23 = vunpack.i.h.bf16 %v6873_v44 }
 0x1cc   : > { %v5684_v12 = vunpack.i.h.bf16 %v5682_v56  ;;  %v5683_v26 = vunpack.i.l.bf16 %v5682_v56  ;;  %v5673_v8 = vunpack.i.l.bf16 %v6873_v44 }
 0x1cd   : > { %5295 = vmatmul.mubr.msk.bf16.gmra.mxu1 %vm2268_vm11, %v2237_v45  ;;  %5971 = vrot.lane.b32.xlu0 %v5970_v42, %s6209_s15  ;;  %v5679_v45 = vunpack.i.h.bf16 %v6885_v0 }
 0x1ce   : > { %5976 = vrot.lane.b32.xlu1 %v5965_v3, %s6204_s10  ;;  %v2048_v25 = vsel %vm2035_vm6, %v2015_v18, %v5683_v26  ;;  %v5619_v26 = vunpack.i.h.bf16 %v6788_v5  ;;  %v5624_v18 = vunpack.i.h.bf16 %v6800_v49 }
 0x1cf   : > { %v5687_v58 = vpop.permute.xlu0 %5686  ;;  %v6904_v22 = vpop.permute.xlu1 %5701 }
 0x1d0   : > { %v5689_v40 = vunpack.i.h.bf16 %v5687_v58  ;;  %v5688_v41 = vunpack.i.l.bf16 %v5687_v58  ;;  %v671_v58 = vld [vmem:[#allocation2 + $0xa8] sm:$0xff] }
 0x1d1   : > { %5991 = vrot.lane.b32.xlu0 %v5960_v39, %s6206_s12  ;;  %v2049_v39 = vsel %vm2035_vm6, %v2016_v33, %v5684_v12  ;;  %v1984_v11 = vsel %vm578_vm2, %v671_v58, %v5673_v8  ;;  %v5623_v33 = vunpack.i.l.bf16 %v6800_v49  ;;  %v5654_v8 = vunpack.i.h.bf16 %v6871_v50  ;;  %s6212_s12 = smov 64  }
 0x1d2   : > { %5981 = vrot.lane.b32.xlu1 %v5970_v42, %s6203_s9  ;;  %v2080_v52 = vsel %vm336_vm0, %v2048_v25, %v5688_v41  ;;  %v2081_v17 = vsel %vm336_vm0, %v2049_v39, %v5689_v40  ;;  %v2017_v0 = vsel %vm2002_vm5, %v1984_v11, %v5678_v15  ;;  %v5618_v40 = vunpack.i.l.bf16 %v6788_v5 }
 0x1d3   : > { %v5692_v1 = vpop.permute.xlu0 %5691  ;;  %v6914_v32 = vpop.permute.xlu1 %5706  ;;  %v5629_v25 = vunpack.i.h.bf16 %v6811_v28 }
 0x1d4   : > { %v5694_v29 = vunpack.i.h.bf16 %v5692_v1  ;;  %v5693_v13 = vunpack.i.l.bf16 %v5692_v1  ;;  %v2050_v38 = vsel %vm2035_vm6, %v2017_v0, %v5618_v40 }
 0x1d5   : > { %5996 = vrot.lane.b32.xlu0 %v5965_v3, %s6208_s14  ;;  %v2082_v10 = vsel %vm336_vm0, %v2050_v38, %v5623_v33 }
 0x1d6   : > { %v2113_v31 = vsel %vm2100_vm7, %v2080_v52, %v5693_v13  ;;  %v2114_v63 = vsel %vm2100_vm7, %v2081_v17, %v5694_v29  ;;  %5986 = vrot.lane.b32.xlu1 %v5985_v34, %s6207_s13  ;;  %v5628_v29 = vunpack.i.l.bf16 %v6811_v28 }
 0x1d7   : > { %v2146_v3 = vsel %vm2133_vm8, %v2113_v31, %v5633_v37  ;;  %v2147_v9 = vsel %vm2133_vm8, %v2114_v63, %v5634_v30  ;;  %v6935_v4 = vpop.permute.xlu0 %5711  ;;  %v6937_v6 = vpop.permute.xlu1 %5726 }
 0x1d8   : > { %v2179_v35 = vsel %vm2166_vm9, %v2146_v3, %v5638_v2  ;;  %v2180_v56 = vsel %vm2166_vm9, %v2147_v9, %v5639_v36  ;;  %v2115_v37 = vsel %vm2100_vm7, %v2082_v10, %v5628_v29  ;;  %v5714_v38 = vunpack.i.h.bf16 %v6935_v4 }
 0x1d9   : > { %6001 = vrot.lane.b32.xlu0 %v5970_v42, %s6210_s16  ;;  %v2212_v21 = vsel %vm2199_vm10, %v2179_v35, %v5643_v7  ;;  %v2213_v24 = vsel %vm2199_vm10, %v2180_v56, %v5644_v54  ;;  %v672_v42 = vld [vmem:[#allocation2 + $0xb0] sm:$0xff]  ;;  %v5649_v7 = vunpack.i.h.bf16 %v6829_v62  ;;  %v5653_v35 = vunpack.i.l.bf16 %v6871_v50 }
 0x1da   : > { %6011 = vrot.lane.b32.xlu1 %v6010_v27, %s6209_s15  ;;  %v2238_v44 = vpack.c.bf16 %v2213_v24, %v2212_v21  ;;  %v1985_v53 = vsel %vm578_vm2, %v672_v42, %v5674_v23  ;;  %v5648_v23 = vunpack.i.l.bf16 %v6829_v62  ;;  %v673_v24 = vld [vmem:[#allocation2 + $0xc0] sm:$0xff] }
 0x1db   : > { %v6951_v55 = vpop.permute.xlu0 %5716  ;;  %v5737_v48 = vpop.permute.xlu1 %5736  ;;  %v2018_v12 = vsel %vm2002_vm5, %v1985_v53, %v5679_v45 }
 0x1dc   : > { %5298 = vmatprep.mubr.msk.bf16.mxu1 %vm2268_vm11, %v2238_v44  ;;  %v2051_v34 = vsel %vm2035_vm6, %v2018_v12, %v5619_v26  ;;  %v5739_v5 = vunpack.i.h.bf16 %v5737_v48  ;;  %v5738_v39 = vunpack.i.l.bf16 %v5737_v48  ;;  %v674_v48 = vld [vmem:[#allocation2 + $0xc8] sm:$0xff]  ;;  %v1986_v42 = vsel %vm578_vm2, %v673_v24, %v5648_v23 }
 0x1dd   : > { %6006 = vrot.lane.b32.xlu0 %v6858_v47, %s6209_s15  ;;  %v2083_v51 = vsel %vm336_vm0, %v2051_v34, %v5624_v18  ;;  %v1987_v11 = vsel %vm578_vm2, %v674_v48, %v5649_v7  ;;  %v2019_v53 = vsel %vm2002_vm5, %v1986_v42, %v5653_v35  ;;  %v5713_v34 = vunpack.i.l.bf16 %v6935_v4 }
 0x1de   : > { %v2116_v49 = vsel %vm2100_vm7, %v2083_v51, %v5629_v25  ;;  %v2148_v31 = vsel %vm2133_vm8, %v2115_v37, %v5738_v39  ;;  %v2020_v62 = vsel %vm2002_vm5, %v1987_v11, %v5654_v8  ;;  %v5719_v10 = vunpack.i.h.bf16 %v6951_v55 }
 0x1df   : > { %v6962_v41 = vpop.permute.xlu0 %5721  ;;  %v5742_v19 = vpop.permute.xlu1 %5741  ;;  %v2149_v60 = vsel %vm2133_vm8, %v2116_v49, %v5739_v5  ;;  %v5718_v51 = vunpack.i.l.bf16 %v6951_v55  ;;  %v5699_v8 = vunpack.i.h.bf16 %v6895_v59  ;;  %v5704_v24 = vunpack.i.h.bf16 %v6904_v22 }
 0x1e0   : > { %v5744_v13 = vunpack.i.h.bf16 %v5742_v19  ;;  %v5743_v30 = vunpack.i.l.bf16 %v5742_v19  ;;  %v5724_v25 = vunpack.i.h.bf16 %v6962_v41  ;;  %v5723_v29 = vunpack.i.l.bf16 %v6962_v41 }
 0x1e1   : > { %v5703_v48 = vunpack.i.l.bf16 %v6904_v22 }
 0x1e2   : > { %v2181_v61 = vsel %vm2166_vm9, %v2148_v31, %v5743_v30  ;;  %v2182_v36 = vsel %vm2166_vm9, %v2149_v60, %v5744_v13 }
 0x1e3   : > { %v6968_v47 = vpop.permute.xlu0 %5731  ;;  %v6970_v1 = vpop.permute.xlu1 %5751 }
 0x1e4   : > { %v5753_v60 = vunpack.i.l.bf16 %v6970_v1 }
 0x1e7   : > { %v5747_v52 = vpop.permute.xlu0 %5746  ;;  %v6978_v17 = vpop.permute.xlu1 %5756 }
 0x1e8   : > { %v5749_v63 = vunpack.i.h.bf16 %v5747_v52  ;;  %v5748_v27 = vunpack.i.l.bf16 %v5747_v52  ;;  %v5754_v52 = vunpack.i.h.bf16 %v6970_v1 }
 0x1ea   : > { %v2214_v28 = vsel %vm2199_vm10, %v2181_v61, %v5748_v27  ;;  %v2215_v2 = vsel %vm2199_vm10, %v2182_v36, %v5749_v63  ;;  %v5759_v63 = vunpack.i.h.bf16 %v6978_v17  ;;  %v5758_v27 = vunpack.i.l.bf16 %v6978_v17 }
 0x1eb   : > { %v5762_v3 = vpop.permute.xlu0 %5761  ;;  %v6986_v9 = vpop.permute.xlu1 %5776  ;;  %v2239_v54 = vpack.c.bf16 %v2215_v2, %v2214_v28  ;;  %v675_v28 = vld [vmem:[#allocation2 + $0xd8] sm:$0xff]  ;;  %v676_v2 = vld [vmem:[#allocation2 + $0xe0] sm:$0xff]  ;;  %v5698_v17 = vunpack.i.l.bf16 %v6895_v59 }
 0x1ec   : > { %v5764_v45 = vunpack.i.h.bf16 %v5762_v3  ;;  %v5763_v15 = vunpack.i.l.bf16 %v5762_v3  ;;  %v1989_v1 = vsel %vm578_vm2, %v676_v2, %v5754_v52  ;;  %v5733_v52 = vunpack.i.l.bf16 %v6968_v47 }
 0x1ed   : > { %5299 = vmatmul.mubr.msk.bf16.gmra.mxu1 %vm2268_vm11, %v2239_v54  ;;  %v1988_v54 = vsel %vm578_vm2, %v675_v28, %v5753_v60  ;;  %v2022_v23 = vsel %vm2002_vm5, %v1989_v1, %v5759_v63 }
 0x1ee   : > { %v2053_v50 = vsel %vm2035_vm6, %v2020_v62, %v5764_v45  ;;  %v2052_v12 = vsel %vm2035_vm6, %v2019_v53, %v5763_v15  ;;  %v2021_v7 = vsel %vm2002_vm5, %v1988_v54, %v5758_v27  ;;  %v2055_v15 = vsel %vm2035_vm6, %v2022_v23, %v5699_v8  ;;  %v677_v27 = vld [vmem:[#allocation2 + $0xf0] sm:$0xff] }
 0x1ef   : > { %v5767_v56 = vpop.permute.xlu0 %5766  ;;  %v6993_v21 = vpop.permute.xlu1 %5781  ;;  %v2054_v45 = vsel %vm2035_vm6, %v2021_v7, %v5698_v17  ;;  %v2087_v42 = vsel %vm336_vm0, %v2055_v15, %v5704_v24  ;;  %v5709_v62 = vunpack.i.h.bf16 %v6914_v32 }
 0x1f0   : > { %v5769_v44 = vunpack.i.h.bf16 %v5767_v56  ;;  %v5768_v58 = vunpack.i.l.bf16 %v5767_v56 }
 0x1f1   : > { %v2120_v22 = vsel %vm2100_vm7, %v2087_v42, %v5709_v62 }
 0x1f2   : > { %v2084_v18 = vsel %vm336_vm0, %v2052_v12, %v5768_v58  ;;  %v2085_v33 = vsel %vm336_vm0, %v2053_v50, %v5769_v44  ;;  %v2086_v58 = vsel %vm336_vm0, %v2054_v45, %v5703_v48 }
 0x1f3   : > { %v5772_v0 = vpop.permute.xlu0 %5771  ;;  %v7001_v19 = vpop.permute.xlu1 %5786 }
 0x1f4   : > { %v5774_v26 = vunpack.i.h.bf16 %v5772_v0  ;;  %v5773_v40 = vunpack.i.l.bf16 %v5772_v0  ;;  %v5708_v0 = vunpack.i.l.bf16 %v6914_v32 }
 0x1f6   : > { %v2117_v5 = vsel %vm2100_vm7, %v2084_v18, %v5773_v40  ;;  %v2118_v39 = vsel %vm2100_vm7, %v2085_v33, %v5774_v26  ;;  %v2119_v26 = vsel %vm2100_vm7, %v2086_v58, %v5708_v0 }
 0x1f7   : > { %v2150_v13 = vsel %vm2133_vm8, %v2117_v5, %v5713_v34  ;;  %v2151_v4 = vsel %vm2133_vm8, %v2118_v39, %v5714_v38  ;;  %v7015_v30 = vpop.permute.xlu0 %5791  ;;  %v7017_v37 = vpop.permute.xlu1 %5806 }
 0x1f8   : > { %v2183_v49 = vsel %vm2166_vm9, %v2150_v13, %v5718_v51  ;;  %v2184_v55 = vsel %vm2166_vm9, %v2151_v4, %v5719_v10  ;;  %v5729_v4 = vunpack.i.h.bf16 %v6937_v6  ;;  %v5794_v45 = vunpack.i.h.bf16 %v7015_v30 }
 0x1f9   : > { %v2216_v31 = vsel %vm2199_vm10, %v2183_v49, %v5723_v29  ;;  %v2217_v41 = vsel %vm2199_vm10, %v2184_v55, %v5724_v25  ;;  %v5728_v49 = vunpack.i.l.bf16 %v6937_v6  ;;  %v5734_v55 = vunpack.i.h.bf16 %v6968_v47 }
 0x1fa   : > { %v2240_v61 = vpack.c.bf16 %v2217_v41, %v2216_v31  ;;  %v5793_v15 = vunpack.i.l.bf16 %v7015_v30 }
 0x1fb   : > { %v7027_v36 = vpop.permute.xlu0 %5796  ;;  %v5817_v3 = vpop.permute.xlu1 %5816 }
 0x1fc   : > { %5302 = vmatprep.mubr.msk.bf16.mxu1 %vm2268_vm11, %v2240_v61  ;;  %v5819_v11 = vunpack.i.h.bf16 %v5817_v3  ;;  %v5818_v53 = vunpack.i.l.bf16 %v5817_v3  ;;  %v678_v61 = vld [vmem:[#allocation2 + $0xf8] sm:$0xff]  ;;  %v1990_v3 = vsel %vm578_vm2, %v677_v27, %v5728_v49  ;;  %v5799_v58 = vunpack.i.h.bf16 %v7027_v36 }
 0x1fd   : > { %v1991_v54 = vsel %vm578_vm2, %v678_v61, %v5729_v4  ;;  %v2023_v1 = vsel %vm2002_vm5, %v1990_v3, %v5733_v52  ;;  %v5798_v42 = vunpack.i.l.bf16 %v7027_v36  ;;  %v5784_v27 = vunpack.i.h.bf16 %v6993_v21 }
 0x1fe   : > { %v2153_v38 = vsel %vm2133_vm8, %v2120_v22, %v5819_v11  ;;  %v2152_v34 = vsel %vm2133_vm8, %v2119_v26, %v5818_v53  ;;  %v2024_v6 = vsel %vm2002_vm5, %v1991_v54, %v5734_v55  ;;  %v5779_v55 = vunpack.i.h.bf16 %v6986_v9 }
 0x1ff   : > { %v7036_v35 = vpop.permute.xlu0 %5801  ;;  %v5783_v61 = vunpack.i.l.bf16 %v6993_v21 }
 0x200   : > { %v5822_v56 = vpop.permute.xlu1 %5821  ;;  %v5804_v62 = vunpack.i.h.bf16 %v7036_v35  ;;  %v5803_v0 = vunpack.i.l.bf16 %v7036_v35 }
 0x201   : > { %v5824_v50 = vunpack.i.h.bf16 %v5822_v56  ;;  %v5823_v12 = vunpack.i.l.bf16 %v5822_v56 }
 0x203   : > { %v7042_v44 = vpop.permute.xlu0 %5811  ;;  %v2185_v51 = vsel %vm2166_vm9, %v2152_v34, %v5823_v12  ;;  %v2186_v5 = vsel %vm2166_vm9, %v2153_v38, %v5824_v50 }
 0x204   : > { %v7046_v59 = vpop.permute.xlu1 %5831 }
 0x205   : > { %v5833_v38 = vunpack.i.l.bf16 %v7046_v59 }
 0x207   : > { %v5827_v40 = vpop.permute.xlu0 %5826 }
 0x208   : > { %v5829_v18 = vunpack.i.h.bf16 %v5827_v40  ;;  %v5828_v33 = vunpack.i.l.bf16 %v5827_v40  ;;  %v7054_v10 = vpop.permute.xlu1 %5836  ;;  %v5834_v40 = vunpack.i.h.bf16 %v7046_v59 }
 0x20a   : > { %v2218_v32 = vsel %vm2199_vm10, %v2185_v51, %v5828_v33  ;;  %v2219_v39 = vsel %vm2199_vm10, %v2186_v5, %v5829_v18  ;;  %v5839_v18 = vunpack.i.h.bf16 %v7054_v10  ;;  %v5838_v33 = vunpack.i.l.bf16 %v7054_v10 }
 0x20b   : > { %v5842_v25 = vpop.permute.xlu0 %5841  ;;  %v2241_v29 = vpack.c.bf16 %v2219_v39, %v2218_v32  ;;  %v679_v32 = vld [vmem:[#allocation2 + $0x108] sm:$0xff]  ;;  %v680_v39 = vld [vmem:[#allocation2 + $0x110] sm:$0xff]  ;;  %v5778_v10 = vunpack.i.l.bf16 %v6986_v9 }
 0x20c   : > { %v7060_v13 = vpop.permute.xlu1 %5856  ;;  %v5844_v31 = vunpack.i.h.bf16 %v5842_v25  ;;  %v5843_v41 = vunpack.i.l.bf16 %v5842_v25  ;;  %v1993_v59 = vsel %vm578_vm2, %v680_v39, %v5834_v40 }
 0x20d   : > { %5303 = vmatmul.mubr.msk.bf16.gmra.mxu1 %vm2268_vm11, %v2241_v29  ;;  %v1992_v29 = vsel %vm578_vm2, %v679_v32, %v5833_v38  ;;  %v2026_v49 = vsel %vm2002_vm5, %v1993_v59, %v5839_v18  ;;  %v681_v38 = vld [vmem:[#allocation2 + $0x120] sm:$0xff] }
 0x20e   : > { %v2057_v47 = vsel %vm2035_vm6, %v2024_v6, %v5844_v31  ;;  %v2056_v23 = vsel %vm2035_vm6, %v2023_v1, %v5843_v41  ;;  %v2025_v4 = vsel %vm2002_vm5, %v1992_v29, %v5838_v33  ;;  %v2059_v41 = vsel %vm2035_vm6, %v2026_v49, %v5779_v55 }
 0x20f   : > { %v5847_v60 = vpop.permute.xlu0 %5846  ;;  %v2058_v31 = vsel %vm2035_vm6, %v2025_v4, %v5778_v10  ;;  %v2091_v3 = vsel %vm336_vm0, %v2059_v41, %v5784_v27  ;;  %v5789_v6 = vunpack.i.h.bf16 %v7001_v19  ;;  %v5859_v49 = vunpack.i.h.bf16 %v7060_v13 }
 0x210   : > { %v7067_v63 = vpop.permute.xlu1 %5861  ;;  %v5849_v28 = vunpack.i.h.bf16 %v5847_v60  ;;  %v5848_v2 = vunpack.i.l.bf16 %v5847_v60  ;;  %v5858_v55 = vunpack.i.l.bf16 %v7060_v13 }
 0x212   : > { %v2088_v24 = vsel %vm336_vm0, %v2056_v23, %v5848_v2  ;;  %v2089_v48 = vsel %vm336_vm0, %v2057_v47, %v5849_v28  ;;  %v2090_v2 = vsel %vm336_vm0, %v2058_v31, %v5783_v61 }
 0x213   : > { %v5852_v7 = vpop.permute.xlu0 %5851 }
 0x214   : > { %v5854_v8 = vunpack.i.h.bf16 %v5852_v7  ;;  %v5853_v17 = vunpack.i.l.bf16 %v5852_v7  ;;  %v7075_v56 = vpop.permute.xlu1 %5866  ;;  %v5788_v7 = vunpack.i.l.bf16 %v7001_v19 }
 0x216   : > { %v2121_v11 = vsel %vm2100_vm7, %v2088_v24, %v5853_v17  ;;  %v2122_v53 = vsel %vm2100_vm7, %v2089_v48, %v5854_v8  ;;  %v2123_v8 = vsel %vm2100_vm7, %v2090_v2, %v5788_v7  ;;  %v2124_v17 = vsel %vm2100_vm7, %v2091_v3, %v5789_v6 }
 0x217   : > { %v2154_v50 = vsel %vm2133_vm8, %v2121_v11, %v5793_v15  ;;  %v2155_v30 = vsel %vm2133_vm8, %v2122_v53, %v5794_v45  ;;  %v7089_v12 = vpop.permute.xlu0 %5871 }
 0x218   : > { %v7091_v26 = vpop.permute.xlu1 %5886  ;;  %v2187_v22 = vsel %vm2166_vm9, %v2154_v50, %v5798_v42  ;;  %v2188_v36 = vsel %vm2166_vm9, %v2155_v30, %v5799_v58  ;;  %v5874_v31 = vunpack.i.h.bf16 %v7089_v12  ;;  %v5873_v41 = vunpack.i.l.bf16 %v7089_v12 }
 0x219   : > { %v2220_v34 = vsel %vm2199_vm10, %v2187_v22, %v5803_v0  ;;  %v2221_v35 = vsel %vm2199_vm10, %v2188_v36, %v5804_v62  ;;  %v5809_v62 = vunpack.i.h.bf16 %v7017_v37  ;;  %v5808_v0 = vunpack.i.l.bf16 %v7017_v37 }
 0x21a   : > { %v2242_v51 = vpack.c.bf16 %v2221_v35, %v2220_v34  ;;  %v5814_v22 = vunpack.i.h.bf16 %v7042_v44  ;;  %v5813_v36 = vunpack.i.l.bf16 %v7042_v44  ;;  %v682_v34 = vld [vmem:[#allocation2 + $0x128] sm:$0xff] }
 0x21b   : > { %v7101_v5 = vpop.permute.xlu0 %5876  ;;  %v1994_v35 = vsel %vm578_vm2, %v681_v38, %v5808_v0  ;;  %v1995_v18 = vsel %vm578_vm2, %v682_v34, %v5809_v62  ;;  %v5863_v62 = vunpack.i.l.bf16 %v7067_v63 }
 0x21c   : > { %v5897_v25 = vpop.permute.xlu1 %5896  ;;  %5306 = vmatprep.mubr.msk.bf16.mxu1 %vm2268_vm11, %v2242_v51  ;;  %v2027_v51 = vsel %vm2002_vm5, %v1994_v35, %v5813_v36  ;;  %v2028_v37 = vsel %vm2002_vm5, %v1995_v18, %v5814_v22  ;;  %v5879_v27 = vunpack.i.h.bf16 %v7101_v5  ;;  %v5878_v61 = vunpack.i.l.bf16 %v7101_v5 }
 0x21d   : > { %v5899_v54 = vunpack.i.h.bf16 %v5897_v25  ;;  %v5898_v1 = vunpack.i.l.bf16 %v5897_v25  ;;  %v5869_v35 = vunpack.i.h.bf16 %v7075_v56  ;;  %v5868_v18 = vunpack.i.l.bf16 %v7075_v56 }
 0x21f   : > { %v7110_v52 = vpop.permute.xlu0 %5881  ;;  %v2157_v45 = vsel %vm2133_vm8, %v2124_v17, %v5899_v54  ;;  %v2156_v15 = vsel %vm2133_vm8, %v2123_v8, %v5898_v1 }
 0x220   : > { %v5902_v60 = vpop.permute.xlu1 %5901 }
 0x221   : > { %v5904_v47 = vunpack.i.h.bf16 %v5902_v60  ;;  %v5903_v23 = vunpack.i.l.bf16 %v5902_v60 }
 0x223   : > { %v7116_v28 = vpop.permute.xlu0 %5891  ;;  %v2189_v42 = vsel %vm2166_vm9, %v2156_v15, %v5903_v23  ;;  %v2190_v11 = vsel %vm2166_vm9, %v2157_v45, %v5904_v47  ;;  %v5883_v45 = vunpack.i.l.bf16 %v7110_v52 }
 0x224   : > { %v5912_v9 = vpop.permute.xlu1 %5911 }
 0x225   : > { %v5914_v44 = vunpack.i.h.bf16 %v5912_v9  ;;  %v5913_v29 = vunpack.i.l.bf16 %v5912_v9 }
 0x227   : > { %v5907_v21 = vpop.permute.xlu0 %5906  ;;  %v1996_v13 = vsel %vm578_vm2, %v6763_v16, %v5913_v29  ;;  %v1997_v7 = vsel %vm578_vm2, %v6765_v46, %v5914_v44 }
 0x228   : > { %v5909_v24 = vunpack.i.h.bf16 %v5907_v21  ;;  %v5908_v48 = vunpack.i.l.bf16 %v5907_v21  ;;  %v5917_v58 = vpop.permute.xlu1 %5916  ;;  %v5884_v21 = vunpack.i.h.bf16 %v7110_v52  ;;  %v5864_v52 = vunpack.i.h.bf16 %v7067_v63 }
 0x229   : > { %v5919_v10 = vunpack.i.h.bf16 %v5917_v58  ;;  %v5918_v60 = vunpack.i.l.bf16 %v5917_v58  ;;  %v5889_v63 = vunpack.i.h.bf16 %v7091_v26 }
 0x22a   : > { %v2222_v19 = vsel %vm2199_vm10, %v2189_v42, %v5908_v48  ;;  %v2223_v53 = vsel %vm2199_vm10, %v2190_v11, %v5909_v24 }
 0x22b   : > { %v5922_v50 = vpop.permute.xlu0 %5921  ;;  %v2243_v30 = vpack.c.bf16 %v2223_v53, %v2222_v19  ;;  %v2029_v5 = vsel %vm2002_vm5, %v1996_v13, %v5918_v60  ;;  %v2030_v23 = vsel %vm2002_vm5, %v1997_v7, %v5919_v10  ;;  %v6161_v13 = vld [vmem:[#allocation2 + $0x158] sm:$0xff] }
 0x22c   : > { %v7134_v40 = vpop.permute.xlu1 %5936  ;;  %v5924_v32 = vunpack.i.h.bf16 %v5922_v50  ;;  %v5923_v39 = vunpack.i.l.bf16 %v5922_v50  ;;  %v2062_v42 = vsel %vm2035_vm6, %v2029_v5, %v5858_v55  ;;  %v2063_v11 = vsel %vm2035_vm6, %v2030_v23, %v5859_v49 }
 0x22d   : > { %5307 = vmatmul.mubr.msk.bf16.gmra.mxu1 %vm2268_vm11, %v2243_v30  ;;  %v2094_v30 = vsel %vm336_vm0, %v2062_v42, %v5863_v62  ;;  %v2095_v22 = vsel %vm336_vm0, %v2063_v11, %v5864_v52  ;;  %v1999_v7 = vsel %vm578_vm2, %v6161_v13, %v5889_v63  ;;  %v5939_v5 = vunpack.i.h.bf16 %v7134_v40 }
 0x22e   : > { %v2061_v3 = vsel %vm2035_vm6, %v2028_v37, %v5924_v32  ;;  %v2060_v54 = vsel %vm2035_vm6, %v2027_v51, %v5923_v39  ;;  %v5888_v37 = vunpack.i.l.bf16 %v7091_v26  ;;  %v5893_v32 = vunpack.i.l.bf16 %v7116_v28 }
 0x22f   : > { %v5927_v33 = vpop.permute.xlu0 %5926  ;;  %v2127_v39 = vsel %vm2100_vm7, %v2094_v30, %v5868_v18  ;;  %v2128_v44 = vsel %vm2100_vm7, %v2095_v22, %v5869_v35 }
 0x230   : > { %v7141_v25 = vpop.permute.xlu1 %5941  ;;  %v5929_v59 = vunpack.i.h.bf16 %v5927_v33  ;;  %v5928_v4 = vunpack.i.l.bf16 %v5927_v33 }
 0x232   : > { %v2092_v12 = vsel %vm336_vm0, %v2060_v54, %v5928_v4  ;;  %v2093_v47 = vsel %vm336_vm0, %v2061_v3, %v5929_v59  ;;  %v6160_v3 = vld [vmem:[#allocation2 + $0x150] sm:$0xff] }
 0x233   : > { %v5932_v2 = vpop.permute.xlu0 %5931  ;;  %v1998_v54 = vsel %vm578_vm2, %v6160_v3, %v5888_v37 }
 0x234   : > { %v5934_v1 = vunpack.i.h.bf16 %v5932_v2  ;;  %v5933_v9 = vunpack.i.l.bf16 %v5932_v2  ;;  %v7151_v6 = vpop.permute.xlu1 %5946  ;;  %v5388_v2 = vunpack.i.l.bf16 %v6540_v20 }
 0x235   : > { %v5948_v11 = vunpack.i.l.bf16 %v7151_v6 }
 0x236   : > { %v2125_v8 = vsel %vm2100_vm7, %v2092_v12, %v5933_v9  ;;  %v2126_v17 = vsel %vm2100_vm7, %v2093_v47, %v5934_v1  ;;  %v5894_v12 = vunpack.i.h.bf16 %v7116_v28  ;;  %v2031_v47 = vsel %vm2002_vm5, %v1998_v54, %v5893_v32 }
 0x237   : > { %v2158_v16 = vsel %vm2133_vm8, %v2125_v8, %v5873_v41  ;;  %v2159_v46 = vsel %vm2133_vm8, %v2126_v17, %v5874_v31  ;;  %v7167_v15 = vpop.permute.xlu0 %5951  ;;  %v5938_v8 = vunpack.i.l.bf16 %v7134_v40  ;;  %v5944_v17 = vunpack.i.h.bf16 %v7141_v25 }
 0x238   : > { %v5962_v24 = vpop.permute.xlu1 %5961  ;;  %v2191_v48 = vsel %vm2166_vm9, %v2158_v16, %v5878_v61  ;;  %v2192_v58 = vsel %vm2166_vm9, %v2159_v46, %v5879_v27  ;;  %v5389_v61 = vunpack.i.h.bf16 %v6540_v20  ;;  %v5949_v16 = vunpack.i.h.bf16 %v7151_v6 }
 0x239   : > { %v2224_v19 = vsel %vm2199_vm10, %v2191_v48, %v5883_v45  ;;  %v2225_v53 = vsel %vm2199_vm10, %v2192_v58, %v5884_v21  ;;  %v5964_v36 = vunpack.i.h.bf16 %v5962_v24  ;;  %v5963_v38 = vunpack.i.l.bf16 %v5962_v24 }
 0x23a   : > { %v2244_v0 = vpack.c.bf16 %v2225_v53, %v2224_v19  ;;  %v5943_v45 = vunpack.i.l.bf16 %v7141_v25  ;;  %v5954_v30 = vunpack.i.h.bf16 %v7167_v15  ;;  %v5953_v22 = vunpack.i.l.bf16 %v7167_v15 }
 0x23b   : > { %v7177_v50 = vpop.permute.xlu0 %5956  ;;  %v2161_v59 = vsel %vm2133_vm8, %v2128_v44, %v5964_v36  ;;  %v2160_v4 = vsel %vm2133_vm8, %v2127_v39, %v5963_v38 }
 0x23c   : > { %v5967_v34 = vpop.permute.xlu1 %5966  ;;  %5310 = vmatprep.mubr.msk.bf16.mxu1 %vm2268_vm11, %v2244_v0 }
 0x23d   : > { %v5969_v33 = vunpack.i.h.bf16 %v5967_v34  ;;  %v5968_v51 = vunpack.i.l.bf16 %v5967_v34 }
 0x23f   : > { %v5972_v29 = vpop.permute.xlu0 %5971  ;;  %v2193_v10 = vsel %vm2166_vm9, %v2160_v4, %v5968_v51  ;;  %v2194_v60 = vsel %vm2166_vm9, %v2161_v59, %v5969_v33 }
 0x240   : > { %v5974_v49 = vunpack.i.h.bf16 %v5972_v29  ;;  %v5973_v55 = vunpack.i.l.bf16 %v5972_v29  ;;  %v5977_v56 = vpop.permute.xlu1 %5976 }
 0x241   : > { %v5979_v41 = vunpack.i.h.bf16 %v5977_v56  ;;  %v5978_v27 = vunpack.i.l.bf16 %v5977_v56 }
 0x242   : > { %v2226_v26 = vsel %vm2199_vm10, %v2193_v10, %v5973_v55  ;;  %v2227_v31 = vsel %vm2199_vm10, %v2194_v60, %v5974_v49  ;;  %v5958_v49 = vunpack.i.l.bf16 %v7177_v50  ;;  %v5959_v10 = vunpack.i.h.bf16 %v7177_v50 }
 0x243   : > { %v5992_v1 = vpop.permute.xlu0 %5991  ;;  %v2245_v9 = vpack.c.bf16 %v2227_v31, %v2226_v26  ;;  %v2000_v28 = vsel %vm578_vm2, %v6860_v57, %v5978_v27  ;;  %v2001_v46 = vsel %vm578_vm2, %v6862_v14, %v5979_v41  ;;  %v2032_v57 = vsel %vm2002_vm5, %v1999_v7, %v5894_v12 }
 0x244   : > { %v5982_v23 = vpop.permute.xlu1 %5981  ;;  %v5994_v24 = vunpack.i.h.bf16 %v5992_v1  ;;  %v5993_v48 = vunpack.i.l.bf16 %v5992_v1 }
 0x245   : > { %v5984_v20 = vunpack.i.h.bf16 %v5982_v23  ;;  %v5983_v21 = vunpack.i.l.bf16 %v5982_v23  ;;  %5311 = vmatmul.mubr.msk.bf16.gmra.mxu1 %vm2268_vm11, %v2245_v9 }
 0x246   : > { %v2065_v38 = vsel %vm2035_vm6, %v2032_v57, %v5994_v24  ;;  %v2064_v34 = vsel %vm2035_vm6, %v2031_v47, %v5993_v48 }
 0x247   : > { %v2033_v40 = vsel %vm2002_vm5, %v2000_v28, %v5983_v21  ;;  %v2034_v58 = vsel %vm2002_vm5, %v2001_v46, %v5984_v20  ;;  %v5997_v42 = vpop.permute.xlu0 %5996  ;;  %vm3218_vm5 = vcmask 261312  }
 0x248   : > { %v2066_v19 = vsel %vm2035_vm6, %v2033_v40, %v5938_v8  ;;  %v2067_v25 = vsel %vm2035_vm6, %v2034_v58, %v5939_v5  ;;  %v5998_v53 = vunpack.i.l.bf16 %v5997_v42  ;;  %v5987_v52 = vpop.permute.xlu1 %5986  ;;  %v5999_v0 = vunpack.i.h.bf16 %v5997_v42 }
 0x249   : > { %v2098_v62 = vsel %vm336_vm0, %v2066_v19, %v5943_v45  ;;  %v2099_v14 = vsel %vm336_vm0, %v2067_v25, %v5944_v17  ;;  %v5989_v35 = vunpack.i.h.bf16 %v5987_v52  ;;  %v5988_v18 = vunpack.i.l.bf16 %v5987_v52 }
 0x24a   : > { %v2131_v36 = vsel %vm2100_vm7, %v2098_v62, %v5948_v11  ;;  %v2132_v6 = vsel %vm2100_vm7, %v2099_v14, %v5949_v16  ;;  %v2096_v51 = vsel %vm336_vm0, %v2064_v34, %v5998_v53  ;;  %v2097_v15 = vsel %vm336_vm0, %v2065_v38, %v5999_v0 }
 0x24b   : > { %v6002_v33 = vpop.permute.xlu0 %6001  ;;  %v2164_v63 = vsel %vm2133_vm8, %v2131_v36, %v5388_v2  ;;  %v2165_v44 = vsel %vm2133_vm8, %v2132_v6, %v5389_v61  ;;  %vm3014_vm6 = vcmask 130112  }
 0x24c   : > { %v6004_v37 = vunpack.i.h.bf16 %v6002_v33  ;;  %v6003_v32 = vunpack.i.l.bf16 %v6002_v33  ;;  %v6012_v39 = vpop.permute.xlu1 %6011  ;;  %v2197_v60 = vsel %vm2166_vm9, %v2164_v63, %v5988_v18  ;;  %v2198_v61 = vsel %vm2166_vm9, %v2165_v44, %v5989_v35 }
 0x24d   : > { %v6014_v29 = vunpack.i.h.bf16 %v6012_v39  ;;  %v6013_v59 = vunpack.i.l.bf16 %v6012_v39  ;;  %v5288_v4 = vpop.f32.mrf.mxu1 }
 0x24e   : > { %v2129_v55 = vsel %vm2100_vm7, %v2096_v51, %v6003_v32  ;;  %v2130_v56 = vsel %vm2100_vm7, %v2097_v15, %v6004_v37  ;;  %v2484_v21 = vmax.f32 %v5288_v4, 0.0  ;;  %vm3371_vm7 = vcmask 261248  }
 0x24f   : > { %v2162_v26 = vsel %vm2133_vm8, %v2129_v55, %v5953_v22  ;;  %v2163_v31 = vsel %vm2133_vm8, %v2130_v56, %v5954_v30  ;;  %v2355_v41 = vpop.f32.mrf.mxu1  ;;  %v6007_v27 = vpop.permute.xlu0 %6006  ;;  %v2230_v1 = vsel %vm2199_vm10, %v2197_v60, %v6013_v59  ;;  %v2231_v9 = vsel %vm2199_vm10, %v2198_v61, %v6014_v29 }
 0x250   : > { %v6009_v2 = vunpack.i.h.bf16 %v6007_v27  ;;  %v6008_v3 = vunpack.i.l.bf16 %v6007_v27  ;;  %v2195_v54 = vsel %vm2166_vm9, %v2162_v26, %v5958_v49  ;;  %v2196_v50 = vsel %vm2166_vm9, %v2163_v31, %v5959_v10 }
 0x251   : > { %v5289_v13 = vpop.f32.mrf.mxu1  ;;  %v2482_v8 = vmax.f32 %v2355_v41, 0.0  ;;  %v2247_v20 = vpack.c.bf16 %v2231_v9, %v2230_v1  ;;  %vm3430_vm8 = vcmask 523264   ;;  %vm3433_vm9 = vcmask 785408  }
 0x252   : > { %v2228_v7 = vsel %vm2199_vm10, %v2195_v54, %v6008_v3  ;;  %v2229_v12 = vsel %vm2199_vm10, %v2196_v50, %v6009_v2  ;;  %v2485_v47 = vmax.f32 %v5289_v13, 0.0 }
 0x253   : > { %v2358_v5 = vpop.f32.mrf.mxu1  ;;  %v2246_v23 = vpack.c.bf16 %v2229_v12, %v2228_v7 }
 0x254   : > { %v2483_v17 = vmax.f32 %v2358_v5, 0.0  ;;  %v2515_v16 = vpack.c.bf16 %v2485_v47, %v2484_v21 }
 0x255   : > { %5314 = vmatprep.mubr.msk.bf16.mxu1 %vm2268_vm11, %v2246_v23 }
 0x256   : > { %v2514_v45 = vpack.c.bf16 %v2483_v17, %v2482_v8  ;;  %5315 = vmatmul.mubr.msk.bf16.gmra.mxu1 %vm2268_vm11, %v2247_v20 }
 0x258   : > { %5320 = vmatprep.mubr.msk.bf16.mxu0 %vm578_vm2, %v2514_v45 }
 0x259   : > { %5321 = vmatmul.mubr.msk.bf16.vlgmr.msra.gmra.mxu0 %vm578_vm2, %v2515_v16 }
 0x26d   : > { %v5292_v28 = vpop.f32.mrf.mxu1 }
 0x26e   : > { %v2488_v11 = vmax.f32 %v5292_v28, 0.0 }
 0x26f   : > { %v2371_v46 = vpop.f32.mrf.mxu1 }
 0x270   : > { %v2486_v58 = vmax.f32 %v2371_v46, 0.0 }
 0x271   : > { %v5293_v24 = vpop.f32.mrf.mxu1 }
 0x272   : > { %v2489_v48 = vmax.f32 %v5293_v24, 0.0 }
 0x273   : > { %v2374_v40 = vpop.f32.mrf.mxu1 }
 0x274   : > { %v2487_v42 = vmax.f32 %v2374_v40, 0.0  ;;  %v2517_v25 = vpack.c.bf16 %v2489_v48, %v2488_v11 }
 0x276   : > { %v2516_v19 = vpack.c.bf16 %v2487_v42, %v2486_v58 }
 0x278   : > { %5324 = vmatprep.mubr.msk.bf16.mxu0 %vm578_vm2, %v2516_v19 }
 0x279   : > { %5325 = vmatmul.mubr.msk.bf16.gmra.mxu0 %vm578_vm2, %v2517_v25 }
 0x28d   : > { %v5296_v53 = vpop.f32.mrf.mxu1 }
 0x28e   : > { %v2492_v22 = vmax.f32 %v5296_v53, 0.0 }
 0x28f   : > { %v2387_v52 = vpop.f32.mrf.mxu1 }
 0x290   : > { %v2490_v0 = vmax.f32 %v2387_v52, 0.0 }
 0x291   : > { %v5297_v57 = vpop.f32.mrf.mxu1 }
 0x292   : > { %v2493_v62 = vmax.f32 %v5297_v57, 0.0 }
 0x293   : > { %v2390_v14 = vpop.f32.mrf.mxu1 }
 0x294   : > { %v2491_v30 = vmax.f32 %v2390_v14, 0.0  ;;  %v2519_v6 = vpack.c.bf16 %v2493_v62, %v2492_v22 }
 0x296   : > { %v2518_v36 = vpack.c.bf16 %v2491_v30, %v2490_v0 }
 0x298   : > { %5328 = vmatprep.mubr.msk.bf16.mxu0 %vm578_vm2, %v2518_v36 }
 0x299   : > { %5329 = vmatmul.mubr.msk.bf16.gmra.mxu0 %vm578_vm2, %v2519_v6 }
 0x2ad   : > { %v5300_v38 = vpop.f32.mrf.mxu1 }
 0x2ae   : > { %v2496_v37 = vmax.f32 %v5300_v38, 0.0 }
 0x2af   : > { %v2403_v34 = vpop.f32.mrf.mxu1 }
 0x2b0   : > { %v2494_v51 = vmax.f32 %v2403_v34, 0.0 }
 0x2b1   : > { %v5301_v35 = vpop.f32.mrf.mxu1 }
 0x2b2   : > { %v2497_v18 = vmax.f32 %v5301_v35, 0.0 }
 0x2b3   : > { %v2406_v33 = vpop.f32.mrf.mxu1 }
 0x2b4   : > { %v2495_v63 = vmax.f32 %v2406_v33, 0.0  ;;  %v2521_v39 = vpack.c.bf16 %v2497_v18, %v2496_v37 }
 0x2b6   : > { %v2520_v32 = vpack.c.bf16 %v2495_v63, %v2494_v51 }
 0x2b8   : > { %5332 = vmatprep.mubr.msk.bf16.mxu0 %vm578_vm2, %v2520_v32 }
 0x2b9   : > { %5333 = vmatmul.mubr.msk.bf16.gmra.mxu0 %vm578_vm2, %v2521_v39 }
 0x2cd   : > { %v5304_v15 = vpop.f32.mrf.mxu1 }
 0x2ce   : > { %v2500_v56 = vmax.f32 %v5304_v15, 0.0 }
 0x2cf   : > { %v2419_v44 = vpop.f32.mrf.mxu1 }
 0x2d0   : > { %v2498_v49 = vmax.f32 %v2419_v44, 0.0 }
 0x2d1   : > { %v5305_v29 = vpop.f32.mrf.mxu1 }
 0x2d2   : > { %v2501_v59 = vmax.f32 %v5305_v29, 0.0 }
 0x2d3   : > { %v2422_v4 = vpop.f32.mrf.mxu1 }
 0x2d4   : > { %v2499_v55 = vmax.f32 %v2422_v4, 0.0  ;;  %v2523_v60 = vpack.c.bf16 %v2501_v59, %v2500_v56 }
 0x2d6   : > { %v2522_v10 = vpack.c.bf16 %v2499_v55, %v2498_v49 }
 0x2d8   : > { %5336 = vmatprep.mubr.msk.bf16.mxu0 %vm578_vm2, %v2522_v10 }
 0x2d9   : > { %5337 = vmatmul.mubr.msk.bf16.gmra.mxu0 %vm578_vm2, %v2523_v60 }
 0x2ed   : > { %v5308_v26 = vpop.f32.mrf.mxu1 }
 0x2ee   : > { %v2504_v54 = vmax.f32 %v5308_v26, 0.0 }
 0x2ef   : > { %v2435_v31 = vpop.f32.mrf.mxu1 }
 0x2f0   : > { %v2502_v2 = vmax.f32 %v2435_v31, 0.0 }
 0x2f1   : > { %v5309_v41 = vpop.f32.mrf.mxu1 }
 0x2f2   : > { %v2505_v27 = vmax.f32 %v5309_v41, 0.0 }
 0x2f3   : > { %v2438_v61 = vpop.f32.mrf.mxu1 }
 0x2f4   : > { %v2503_v3 = vmax.f32 %v2438_v61, 0.0  ;;  %v2525_v9 = vpack.c.bf16 %v2505_v27, %v2504_v54 }
 0x2f6   : > { %v2524_v1 = vpack.c.bf16 %v2503_v3, %v2502_v2 }
 0x2f8   : > { %5340 = vmatprep.mubr.msk.bf16.mxu0 %vm578_vm2, %v2524_v1 }
 0x2f9   : > { %5341 = vmatmul.mubr.msk.bf16.gmra.mxu0 %vm578_vm2, %v2525_v9 }
 0x305   : > { %v5312_v50 = vpop.f32.mrf.mxu1 }
 0x306   : > { %v2508_v8 = vmax.f32 %v5312_v50, 0.0 }
 0x307   : > { %v2451_v13 = vpop.f32.mrf.mxu1 }
 0x308   : > { %v2506_v5 = vmax.f32 %v2451_v13, 0.0 }
 0x309   : > { %v5313_v7 = vpop.f32.mrf.mxu1 }
 0x30a   : > { %v2509_v12 = vmax.f32 %v5313_v7, 0.0 }
 0x30b   : > { %v2454_v47 = vpop.f32.mrf.mxu1 }
 0x30c   : > { %v2507_v23 = vmax.f32 %v2454_v47, 0.0  ;;  %v2527_v20 = vpack.c.bf16 %v2509_v12, %v2508_v8 }
 0x30e   : > { %v2526_v17 = vpack.c.bf16 %v2507_v23, %v2506_v5 }
 0x310   : > { %5344 = vmatprep.mubr.msk.bf16.mxu0 %vm578_vm2, %v2526_v17 }
 0x311   : > { %5345 = vmatmul.mubr.msk.bf16.gmra.mxu0 %vm578_vm2, %v2527_v20 }
 0x316   : > { %v5316_v21 = vpop.f32.mrf.mxu1 }
 0x317   : > { %v2512_v62 = vmax.f32 %v5316_v21, 0.0 }
 0x318   : > { %v2467_v45 = vpop.f32.mrf.mxu1 }
 0x319   : > { %v7259_v16 = vpop.f32.mrf.mxu0  ;;  %v2510_v19 = vmax.f32 %v2467_v45, 0.0 }
 0x31a   : > { %8432 = vst [vmem:[#allocation6_spill] sm:$0xff] %v7259_v16  ;;  %v5317_v28 = vpop.f32.mrf.mxu1  ;;  %v2845_v46 = vsel %vm336_vm0, %v7259_v16, 0.0  ;;  %v7265_v24 = vsel %vm336_vm0, %v7259_v16, -inf }
 0x31b   : > { %v7267_v48 = vpop.f32.mrf.mxu0  ;;  %2846 = vadd.xlane.f32.xlu0 %v2845_v46  ;;  %2750 = vmax.xlane.f32.xlu1 %v7265_v24  ;;  %v2513_v40 = vmax.f32 %v5317_v28, 0.0 }
 0x31c   : > { %8433 = vst [vmem:[#allocation7_spill] sm:$0xff] %v7267_v48  ;;  %v2470_v58 = vpop.f32.mrf.mxu1  ;;  %v2839_v42 = vsel %vm336_vm0, %v7267_v48, 0.0  ;;  %v2743_v11 = vsel %vm336_vm0, %v7267_v48, -inf }
 0x31d   : > { %v2511_v25 = vmax.f32 %v2470_v58, 0.0  ;;  %v7274_v53 = vpop.f32.mrf.mxu0  ;;  %v3642_v52 = vadd.f32 %v2845_v46, %v2839_v42  ;;  %v3613_v57 = vmax.f32 %v7265_v24, %v2743_v11  ;;  %v2529_v38 = vpack.c.bf16 %v2513_v40, %v2512_v62 }
 0x31e   : > { %8434 = vst [vmem:[#allocation8_spill] sm:$0xff] %v7274_v53  ;;  %v2848_v14 = vsel %vm336_vm0, %v7274_v53, 0.0  ;;  %v7281_v0 = vsel %vm336_vm0, %v7274_v53, -inf }
 0x31f   : > { %v2528_v30 = vpack.c.bf16 %v2511_v25, %v2510_v19  ;;  %v7283_v22 = vpop.f32.mrf.mxu0  ;;  %2840 = vadd.xlane.f32.xlu0 %v2839_v42  ;;  %2744 = vmax.xlane.f32.xlu1 %v2743_v11  ;;  %v4043_v36 = vadd.f32 %v2848_v14, %v2845_v46  ;;  %v3931_v6 = vmax.f32 %v7265_v24, %v7281_v0 }
 0x320   : > { %8435 = vst [vmem:[#allocation9_spill] sm:$0xff] %v7283_v22  ;;  %v2842_v34 = vsel %vm336_vm0, %v7283_v22, 0.0  ;;  %v7291_v35 = vsel %vm336_vm0, %v7283_v22, -inf }
 0x321   : > { %5348 = vmatprep.mubr.msk.bf16.mxu0 %vm578_vm2, %v2528_v30  ;;  %v4044_v18 = vrot.slane %v4043_v36, 4  ;;  %v3657_v33 = vadd.f32 %v2848_v14, %v2842_v34  ;;  %v4036_v51 = vadd.f32 %v2842_v34, %v2839_v42  ;;  %v3932_v63 = vrot.slane %v3931_v6, 4 }
 0x322   : > { %5349 = vmatmul.mubr.msk.bf16.gmra.mxu0 %vm578_vm2, %v2529_v38  ;;  %v3924_v37 = vmax.f32 %v2743_v11, %v7291_v35  ;;  %vm3161_vm2 = vcmask 1046534  }
 0x323   : > { %v4045_v32 = vadd.f32 %v4044_v18, %v4043_v36  ;;  %2849 = vadd.xlane.f32.xlu0 %v2848_v14  ;;  %v4037_v39 = vrot.slane %v4036_v51, 4  ;;  %2843 = vadd.xlane.f32.xlu1 %v2842_v34  ;;  %v3933_v15 = vmax.f32 %v3931_v6, %v3932_v63 }
 0x324   : > { %v3925_v44 = vrot.slane %v3924_v37, 4 }
 0x325   : > { %v4046_v29 = vrot.slane %v4045_v32, 2  ;;  %v4038_v59 = vadd.f32 %v4037_v39, %v4036_v51  ;;  %v3934_v4 = vrot.slane %v3933_v15, 2 }
 0x326   : > { %v3926_v49 = vmax.f32 %v3924_v37, %v3925_v44 }
 0x327   : > { %v4047_v55 = vadd.f32 %v4046_v29, %v4045_v32  ;;  %v4039_v56 = vrot.slane %v4038_v59, 2  ;;  %v3935_v10 = vmax.f32 %v3933_v15, %v3934_v4  ;;  %2753 = vmax.xlane.f32.xlu0 %v7281_v0 }
 0x328   : > { %v3927_v60 = vrot.slane %v3926_v49, 2 }
 0x329   : > { %v4048_v26 = vrot.slane %v4047_v55, 1  ;;  %v4040_v31 = vadd.f32 %v4039_v56, %v4038_v59  ;;  %v3936_v41 = vrot.slane %v3935_v10, 1 }
 0x32a   : > { %v3928_v27 = vmax.f32 %v3926_v49, %v3927_v60 }
 0x32b   : > { %v4049_v61 = vadd.f32 %v4048_v26, %v4047_v55  ;;  %v4041_v2 = vrot.slane %v4040_v31, 1  ;;  %2747 = vmax.xlane.f32.xlu0 %v7291_v35  ;;  %v3937_v1 = vmax.f32 %v3935_v10, %v3936_v41 }
 0x32c   : > { %v3929_v3 = vrot.slane %v3928_v27, 1 }
 0x32d   : > { %v4042_v54 = vadd.f32 %v4041_v2, %v4040_v31  ;;  %v4149_v50 = vmul.f32 0.0625, %v4049_v61 }
 0x32e   : > { %v3930_v9 = vmax.f32 %v3928_v27, %v3929_v3 }
 0x32f   : > { %v4148_v13 = vmul.f32 0.0625, %v4042_v54 }
 0x330   : > { %v7299_v7 = vsel %vm3151_vm12, %v3937_v1, %v3930_v9 }
 0x331   : > { %v7302_v12 = vsel %vm3151_vm12, %v4149_v50, %v4148_v13 }
 0x339   : > { %v7304_v47 = vpop.f32.mrf.mxu0 }
 0x33a   : > { %8436 = vst [vmem:[#allocation10_spill] sm:$0xff] %v7304_v47  ;;  %v2857_v5 = vsel %vm336_vm0, %v7304_v47, 0.0  ;;  %v2761_v23 = vsel %vm336_vm0, %v7304_v47, -inf }
 0x33b   : > { %v7310_v8 = vpop.f32.mrf.mxu0  ;;  %2858 = vadd.xlane.f32.xlu1 %v2857_v5  ;;  %v7312_v17 = vmax.f32 %v2761_v23, %v3613_v57 }
 0x33c   : > { %8437 = vst [vmem:[#allocation11_spill] sm:$0xff] %v7310_v8  ;;  %v2851_v20 = vsel %vm336_vm0, %v7310_v8, 0.0  ;;  %v7318_v21 = vsel %vm336_vm0, %v7310_v8, -inf }
 0x33d   : > { %v7320_v45 = vpop.f32.mrf.mxu0  ;;  %v3643_v28 = vadd.f32 %v3642_v52, %v2851_v20  ;;  %v3615_v46 = vmax.f32 %v7318_v21, %v7312_v17 }
 0x33e   : > { %8438 = vst [vmem:[#allocation12_spill] sm:$0xff] %v7320_v45  ;;  %v2860_v24 = vsel %vm336_vm0, %v7320_v45, 0.0  ;;  %v7328_v40 = vsel %vm336_vm0, %v7320_v45, -inf }
 0x33f   : > { %v7330_v58 = vpop.f32.mrf.mxu0  ;;  %v4057_v42 = vadd.f32 %v2860_v24, %v2857_v5  ;;  %2861 = vadd.xlane.f32.xlu0 %v2860_v24  ;;  %2762 = vmax.xlane.f32.xlu1 %v2761_v23  ;;  %v3628_v11 = vmax.f32 %v7281_v0, %v7328_v40  ;;  %v3945_v19 = vmax.f32 %v2761_v23, %v7328_v40 }
 0x340   : > { %8439 = vst [vmem:[#allocation13_spill] sm:$0xff] %v7330_v58  ;;  %v2854_v25 = vsel %vm336_vm0, %v7330_v58, 0.0  ;;  %v7339_v52 = vsel %vm336_vm0, %v7330_v58, -inf  ;;  %v3644_v57 = vadd.f32 %v3643_v28, %v2857_v5 }
 0x341   : > { %v4058_v62 = vrot.slane %v4057_v42, 4  ;;  %v3946_v14 = vrot.slane %v3945_v19, 4  ;;  %v3658_v30 = vadd.f32 %v3657_v33, %v2854_v25  ;;  %v4050_v36 = vadd.f32 %v2854_v25, %v2851_v20 }
 0x342   : > { %v3627_v6 = vmax.f32 %v7291_v35, %v7339_v52  ;;  %v3938_v38 = vmax.f32 %v7318_v21, %v7339_v52 }
 0x343   : > { %v4059_v34 = vadd.f32 %v4058_v62, %v4057_v42  ;;  %v3947_v18 = vmax.f32 %v3945_v19, %v3946_v14  ;;  %2765 = vmax.xlane.f32.xlu0 %v7328_v40  ;;  %2852 = vadd.xlane.f32.xlu1 %v2851_v20  ;;  %v4051_v51 = vrot.slane %v4050_v36, 4  ;;  %v3659_v63 = vadd.f32 %v3658_v30, %v2860_v24 }
 0x344   : > { %v3939_v37 = vrot.slane %v3938_v38, 4 }
 0x345   : > { %v4060_v32 = vrot.slane %v4059_v34, 2  ;;  %v3948_v39 = vrot.slane %v3947_v18, 2  ;;  %v4052_v15 = vadd.f32 %v4051_v51, %v4050_v36 }
 0x346   : > { %v3940_v44 = vmax.f32 %v3938_v38, %v3939_v37 }
 0x347   : > { %v4061_v33 = vadd.f32 %v4060_v32, %v4059_v34  ;;  %v3949_v29 = vmax.f32 %v3947_v18, %v3948_v39  ;;  %v4053_v59 = vrot.slane %v4052_v15, 2  ;;  %2855 = vadd.xlane.f32.xlu0 %v2854_v25  ;;  %2756 = vmax.xlane.f32.xlu1 %v7318_v21 }
 0x348   : > { %v3941_v35 = vrot.slane %v3940_v44, 2 }
 0x349   : > { %v4062_v4 = vrot.slane %v4061_v33, 1  ;;  %v4054_v49 = vadd.f32 %v4053_v59, %v4052_v15  ;;  %v3950_v56 = vrot.slane %v3949_v29, 1 }
 0x34a   : > { %v3942_v55 = vmax.f32 %v3940_v44, %v3941_v35 }
 0x34b   : > { %v4055_v10 = vrot.slane %v4054_v49, 1  ;;  %2759 = vmax.xlane.f32.xlu0 %v7339_v52  ;;  %v4063_v60 = vadd.f32 %v4062_v4, %v4061_v33  ;;  %v3951_v27 = vmax.f32 %v3949_v29, %v3950_v56 }
 0x34c   : > { %v3943_v26 = vrot.slane %v3942_v55, 1 }
 0x34d   : > { %v4056_v31 = vadd.f32 %v4055_v10, %v4054_v49  ;;  %v4151_v2 = vmul.f32 0.0625, %v4063_v60 }
 0x34e   : > { %v3944_v41 = vmax.f32 %v3942_v55, %v3943_v26 }
 0x34f   : > { %v4150_v61 = vmul.f32 0.0625, %v4056_v31 }
 0x350   : > { %v4183_v3 = vsel %vm3153_vm13, %v3944_v41, %v7299_v7 }
 0x351   : > { %v4217_v54 = vsel %vm3153_vm13, %v4150_v61, %v7302_v12  ;;  %v7353_v1 = vsel %vm3155_vm14, %v3951_v27, %v4183_v3 }
 0x352   : > { %v4218_v9 = vsel %vm3155_vm14, %v4151_v2, %v4217_v54 }
 0x359   : > { %v7356_v50 = vpop.f32.mrf.mxu0 }
 0x35a   : > { %8440 = vst [vmem:[#allocation14_spill] sm:$0xff] %v7356_v50  ;;  %v2869_v13 = vsel %vm336_vm0, %v7356_v50, 0.0  ;;  %v2773_v5 = vsel %vm336_vm0, %v7356_v50, -inf }
 0x35b   : > { %v7362_v23 = vpop.f32.mrf.mxu0  ;;  %2870 = vadd.xlane.f32.xlu1 %v2869_v13  ;;  %v3614_v7 = vmax.f32 %v2773_v5, %v3615_v46 }
 0x35c   : > { %8441 = vst [vmem:[#allocation15_spill] sm:$0xff] %v7362_v23  ;;  %v2863_v12 = vsel %vm336_vm0, %v7362_v23, 0.0  ;;  %v2767_v17 = vsel %vm336_vm0, %v7362_v23, -inf }
 0x35d   : > { %v7368_v20 = vpop.f32.mrf.mxu0  ;;  %v3645_v21 = vadd.f32 %v3644_v57, %v2863_v12  ;;  %v3617_v28 = vmax.f32 %v2767_v17, %v3614_v7 }
 0x35e   : > { %8442 = vst [vmem:[#allocation16_spill] sm:$0xff] %v7368_v20  ;;  %v2872_v24 = vsel %vm336_vm0, %v7368_v20, 0.0  ;;  %v2776_v42 = vsel %vm336_vm0, %v7368_v20, -inf }
 0x35f   : > { %v7374_v19 = vpop.f32.mrf.mxu0  ;;  %v4071_v25 = vadd.f32 %v2872_v24, %v2869_v13  ;;  %2873 = vadd.xlane.f32.xlu0 %v2872_v24  ;;  %2774 = vmax.xlane.f32.xlu1 %v2773_v5  ;;  %v7379_v46 = vmax.f32 %v3628_v11, %v2776_v42  ;;  %v3646_v62 = vadd.f32 %v3645_v21, %v2869_v13 }
 0x360   : > { %8443 = vst [vmem:[#allocation17_spill] sm:$0xff] %v7374_v19  ;;  %v2866_v52 = vsel %vm336_vm0, %v7374_v19, 0.0  ;;  %v2770_v57 = vsel %vm336_vm0, %v7374_v19, -inf  ;;  %v3959_v4 = vmax.f32 %v2773_v5, %v2776_v42 }
 0x361   : > { %v4072_v14 = vrot.slane %v4071_v25, 4  ;;  %v3660_v30 = vadd.f32 %v3659_v63, %v2866_v52  ;;  %v4064_v36 = vadd.f32 %v2866_v52, %v2863_v12  ;;  %v7385_v38 = vmax.f32 %v3627_v6, %v2770_v57 }
 0x362   : > { %v3952_v29 = vmax.f32 %v2767_v17, %v2770_v57  ;;  %v3960_v55 = vrot.slane %v3959_v4, 4 }
 0x363   : > { %v4073_v34 = vadd.f32 %v4072_v14, %v4071_v25  ;;  %2777 = vmax.xlane.f32.xlu0 %v2776_v42  ;;  %2864 = vadd.xlane.f32.xlu1 %v2863_v12  ;;  %v4065_v18 = vrot.slane %v4064_v36, 4  ;;  %v3661_v51 = vadd.f32 %v3660_v30, %v2872_v24 }
 0x364   : > { %v3953_v49 = vrot.slane %v3952_v29, 4  ;;  %v3961_v31 = vmax.f32 %v3959_v4, %v3960_v55 }
 0x365   : > { %v4074_v0 = vrot.slane %v4073_v34, 2  ;;  %v4066_v40 = vadd.f32 %v4065_v18, %v4064_v36 }
 0x366   : > { %v3954_v56 = vmax.f32 %v3952_v29, %v3953_v49  ;;  %v3962_v12 = vrot.slane %v3961_v31, 2 }
 0x367   : > { %v4075_v11 = vadd.f32 %v4074_v0, %v4073_v34  ;;  %v4067_v37 = vrot.slane %v4066_v40, 2  ;;  %2867 = vadd.xlane.f32.xlu0 %v2866_v52  ;;  %2768 = vmax.xlane.f32.xlu1 %v2767_v17 }
 0x368   : > { %v3955_v61 = vrot.slane %v3954_v56, 2 }
 0x369   : > { %v4076_v32 = vrot.slane %v4075_v11, 1  ;;  %v4068_v39 = vadd.f32 %v4067_v37, %v4066_v40 }
 0x36a   : > { %v3956_v42 = vmax.f32 %v3954_v56, %v3955_v61 }
 0x36b   : > { %v4069_v15 = vrot.slane %v4068_v39, 1  ;;  %2771 = vmax.xlane.f32.xlu0 %v2770_v57  ;;  %v4077_v44 = vadd.f32 %v4076_v32, %v4075_v11 }
 0x36c   : > { %v3957_v32 = vrot.slane %v3956_v42, 1 }
 0x36d   : > { %v4070_v63 = vadd.f32 %v4069_v15, %v4068_v39  ;;  %v4153_v6 = vmul.f32 0.0625, %v4077_v44  ;;  %v3963_v15 = vmax.f32 %v3961_v31, %v3962_v12 }
 0x36e   : > { %v3958_v4 = vmax.f32 %v3956_v42, %v3957_v32 }
 0x36f   : > { %v4152_v33 = vmul.f32 0.0625, %v4070_v63  ;;  %v3964_v55 = vrot.slane %v3963_v15, 1 }
 0x371   : > { %v4219_v59 = vsel %vm3157_vm15, %v4152_v33, %v4218_v9  ;;  %v3965_v12 = vmax.f32 %v3963_v15, %v3964_v55 }
 0x372   : > { %v7389_v35 = vsel %vm3159_vm1, %v4153_v6, %v4219_v59 }
 0x379   : > { %v7391_v10 = vpop.f32.mrf.mxu0 }
 0x37a   : > { %8444 = vst [vmem:[#allocation18_spill] sm:$0xff] %v7391_v10  ;;  %v2881_v60 = vsel %vm336_vm0, %v7391_v10, 0.0  ;;  %v2785_v26 = vsel %vm336_vm0, %v7391_v10, -inf }
 0x37b   : > { %v7397_v41 = vpop.f32.mrf.mxu0  ;;  %2882 = vadd.xlane.f32.xlu1 %v2881_v60  ;;  %v7399_v27 = vmax.f32 %v2785_v26, %v3617_v28 }
 0x37c   : > { %8445 = vst [vmem:[#allocation19_spill] sm:$0xff] %v7397_v41  ;;  %v2875_v2 = vsel %vm336_vm0, %v7397_v41, 0.0  ;;  %v7405_v3 = vsel %vm336_vm0, %v7397_v41, -inf }
 0x37d   : > { %v7407_v54 = vpop.f32.mrf.mxu0  ;;  %v3647_v9 = vadd.f32 %v3646_v62, %v2875_v2  ;;  %v3619_v13 = vmax.f32 %v7405_v3, %v7399_v27 }
 0x37e   : > { %8446 = vst [vmem:[#allocation20_spill] sm:$0xff] %v7407_v54  ;;  %v2884_v5 = vsel %vm336_vm0, %v7407_v54, 0.0  ;;  %v7415_v7 = vsel %vm336_vm0, %v7407_v54, -inf }
 0x37f   : > { %v7417_v17 = vpop.f32.mrf.mxu0  ;;  %v4085_v21 = vadd.f32 %v2884_v5, %v2881_v60  ;;  %2885 = vadd.xlane.f32.xlu0 %v2884_v5  ;;  %2786 = vmax.xlane.f32.xlu1 %v2785_v26  ;;  %v3632_v28 = vmax.f32 %v7379_v46, %v7415_v7  ;;  %v3973_v24 = vmax.f32 %v2785_v26, %v7415_v7 }
 0x380   : > { %8447 = vst [vmem:[#allocation21_spill] sm:$0xff] %v7417_v17  ;;  %v2878_v25 = vsel %vm336_vm0, %v7417_v17, 0.0  ;;  %v7426_v52 = vsel %vm336_vm0, %v7417_v17, -inf  ;;  %v3648_v57 = vadd.f32 %v3647_v9, %v2881_v60 }
 0x381   : > { %v4086_v62 = vrot.slane %v4085_v21, 4  ;;  %v3974_v14 = vrot.slane %v3973_v24, 4  ;;  %v3662_v30 = vadd.f32 %v3661_v51, %v2878_v25  ;;  %v4078_v36 = vadd.f32 %v2878_v25, %v2875_v2 }
 0x382   : > { %v3631_v34 = vmax.f32 %v7385_v38, %v7426_v52  ;;  %v3966_v18 = vmax.f32 %v7405_v3, %v7426_v52 }
 0x383   : > { %v4087_v0 = vadd.f32 %v4086_v62, %v4085_v21  ;;  %v3975_v40 = vmax.f32 %v3973_v24, %v3974_v14  ;;  %2789 = vmax.xlane.f32.xlu0 %v7415_v7  ;;  %2876 = vadd.xlane.f32.xlu1 %v2875_v2  ;;  %v4079_v11 = vrot.slane %v4078_v36, 4  ;;  %v3663_v37 = vadd.f32 %v3662_v30, %v2884_v5 }
 0x384   : > { %v3967_v39 = vrot.slane %v3966_v18, 4  ;;  %v4185_v5 = vsel %vm3157_vm15, %v3958_v4, %v7353_v1 }
 0x385   : > { %v4088_v44 = vrot.slane %v4087_v0, 2  ;;  %v3976_v63 = vrot.slane %v3975_v40, 2  ;;  %v4080_v51 = vadd.f32 %v4079_v11, %v4078_v36  ;;  %v4186_v62 = vsel %vm3159_vm1, %v3965_v12, %v4185_v5 }
 0x386   : > { %v3968_v33 = vmax.f32 %v3966_v18, %v3967_v39 }
 0x387   : > { %v4089_v6 = vadd.f32 %v4088_v44, %v4087_v0  ;;  %v3977_v29 = vmax.f32 %v3975_v40, %v3976_v63  ;;  %v4081_v59 = vrot.slane %v4080_v51, 2  ;;  %2879 = vadd.xlane.f32.xlu0 %v2878_v25  ;;  %2780 = vmax.xlane.f32.xlu1 %v7405_v3 }
 0x388   : > { %v3969_v49 = vrot.slane %v3968_v33, 2 }
 0x389   : > { %v4090_v56 = vrot.slane %v4089_v6, 1  ;;  %v4082_v60 = vadd.f32 %v4081_v59, %v4080_v51  ;;  %v3978_v61 = vrot.slane %v3977_v29, 1 }
 0x38a   : > { %v3970_v26 = vmax.f32 %v3968_v33, %v3969_v49 }
 0x38b   : > { %v4083_v2 = vrot.slane %v4082_v60, 1  ;;  %2783 = vmax.xlane.f32.xlu0 %v7426_v52  ;;  %v4091_v9 = vadd.f32 %v4090_v56, %v4089_v6  ;;  %v3979_v25 = vmax.f32 %v3977_v29, %v3978_v61 }
 0x38c   : > { %v3971_v31 = vrot.slane %v3970_v26, 1 }
 0x38d   : > { %v4084_v21 = vadd.f32 %v4083_v2, %v4082_v60  ;;  %v4155_v14 = vmul.f32 0.0625, %v4091_v9 }
 0x38e   : > { %v3972_v24 = vmax.f32 %v3970_v26, %v3971_v31 }
 0x38f   : > { %v4154_v42 = vmul.f32 0.0625, %v4084_v21 }
 0x390   : > { %v4187_v30 = vsel %vm3161_vm2, %v3972_v24, %v4186_v62 }
 0x391   : > { %v4221_v36 = vsel %vm3161_vm2, %v4154_v42, %v7389_v35  ;;  %v4188_v18 = vsel %vm3163_vm3, %v3979_v25, %v4187_v30 }
 0x392   : > { %v7443_v0 = vsel %vm3163_vm3, %v4155_v14, %v4221_v36  ;;  %4198 = vst.msk [vmem:[#allocation5 + $0x3] sm:$0xff] %vm336_vm0, %v4188_v18 }
 0x399   : > { %v7446_v1 = vpop.f32.mrf.mxu0 }
 0x39a   : > { %8448 = vst [vmem:[#allocation22_spill] sm:$0xff] %v7446_v1  ;;  %v2893_v40 = vsel %vm336_vm0, %v7446_v1, 0.0  ;;  %v7460_v44 = vsel %vm336_vm0, %v7446_v1, -inf }
 0x39b   : > { %v7450_v11 = vpop.f32.mrf.mxu0  ;;  %2894 = vadd.xlane.f32.xlu1 %v2893_v40 }
 0x39c   : > { %8449 = vst [vmem:[#allocation23_spill] sm:$0xff] %v7450_v11  ;;  %v2887_v32 = vsel %vm336_vm0, %v7450_v11, 0.0  ;;  %v7477_v59 = vsel %vm336_vm0, %v7450_v11, -inf }
 0x39d   : > { %v7454_v39 = vpop.f32.mrf.mxu0  ;;  %v3649_v35 = vadd.f32 %v3648_v57, %v2887_v32 }
 0x39e   : > { %8450 = vst [vmem:[#allocation24_spill] sm:$0xff] %v7454_v39  ;;  %v2896_v15 = vsel %vm336_vm0, %v7454_v39, 0.0  ;;  %v2800_v63 = vsel %vm336_vm0, %v7454_v39, -inf }
 0x39f   : > { %v7464_v51 = vpop.f32.mrf.mxu0  ;;  %v4099_v33 = vadd.f32 %v2896_v15, %v2893_v40  ;;  %2897 = vadd.xlane.f32.xlu0 %v2896_v15  ;;  %2798 = vmax.xlane.f32.xlu1 %v7460_v44  ;;  %v7470_v57 = vmax.f32 %v3632_v28, %v2800_v63  ;;  %v3987_v6 = vmax.f32 %v7460_v44, %v2800_v63 }
 0x3a0   : > { %8451 = vst [vmem:[#allocation25_spill] sm:$0xff] %v7464_v51  ;;  %v2890_v29 = vsel %vm336_vm0, %v7464_v51, 0.0  ;;  %v2794_v4 = vsel %vm336_vm0, %v7464_v51, -inf  ;;  %v7481_v49 = vadd.f32 %v3649_v35, %v2893_v40 }
 0x3a1   : > { %v4100_v55 = vrot.slane %v4099_v33, 4  ;;  %v3988_v56 = vrot.slane %v3987_v6, 4  ;;  %v3664_v60 = vadd.f32 %v3663_v37, %v2890_v29  ;;  %v4092_v46 = vadd.f32 %v2890_v29, %v2887_v32 }
 0x3a2   : > { %v7486_v7 = vmax.f32 %v3631_v34, %v2794_v4  ;;  %v3980_v28 = vmax.f32 %v7477_v59, %v2794_v4 }
 0x3a3   : > { %v4101_v26 = vadd.f32 %v4100_v55, %v4099_v33  ;;  %v3989_v61 = vmax.f32 %v3987_v6, %v3988_v56  ;;  %2801 = vmax.xlane.f32.xlu0 %v2800_v63  ;;  %2888 = vadd.xlane.f32.xlu1 %v2887_v32  ;;  %v4093_v2 = vrot.slane %v4092_v46, 4  ;;  %v7489_v31 = vadd.f32 %v3664_v60, %v2896_v15 }
 0x3a4   : > { %v3981_v9 = vrot.slane %v3980_v28, 4 }
 0x3a5   : > { %v4102_v5 = vrot.slane %v4101_v26, 2  ;;  %v3990_v12 = vrot.slane %v3989_v61, 2  ;;  %v4094_v38 = vadd.f32 %v4093_v2, %v4092_v46  ;;  %v7522_v46 = vpop.xlane.xlu0 %2846 }
 0x3a6   : > { %v3982_v52 = vmax.f32 %v3980_v28, %v3981_v9 }
 0x3a7   : > { %v4103_v34 = vadd.f32 %v4102_v5, %v4101_v26  ;;  %v3991_v37 = vmax.f32 %v3989_v61, %v3990_v12  ;;  %2891 = vadd.xlane.f32.xlu0 %v2890_v29  ;;  %2792 = vmax.xlane.f32.xlu1 %v7477_v59  ;;  %v4095_v21 = vrot.slane %v4094_v38, 2  ;;  %v7542_v12 = vpop.xlane.xlu1 %2750 }
 0x3a8   : > { %v3983_v24 = vrot.slane %v3982_v52, 2  ;;  %8456 = vst [vmem:[#allocation30_spill] sm:$0xff] %v7542_v12 }
 0x3a9   : > { %v4104_v42 = vrot.slane %v4103_v34, 1  ;;  %v3992_v25 = vrot.slane %v3991_v37, 1  ;;  %v4096_v62 = vadd.f32 %v4095_v21, %v4094_v38  ;;  %v7533_v2 = vpop.xlane.xlu0 %2840 }
 0x3aa   : > { %v3984_v14 = vmax.f32 %v3982_v52, %v3983_v24 }
 0x3ab   : > { %2795 = vmax.xlane.f32.xlu0 %v2794_v4  ;;  %v4105_v30 = vadd.f32 %v4104_v42, %v4103_v34  ;;  %v4097_v36 = vrot.slane %v4096_v62, 1  ;;  %v3993_v40 = vmax.f32 %v3991_v37, %v3992_v25  ;;  %v7551_v34 = vpop.xlane.xlu1 %2744 }
 0x3ac   : > { %v3985_v18 = vrot.slane %v3984_v14, 1 }
 0x3ad   : > { %v4098_v32 = vadd.f32 %v4097_v36, %v4096_v62  ;;  %v4157_v35 = vmul.f32 0.0625, %v4105_v30  ;;  %v7549_v52 = vpop.xlane.xlu0 %2849 }
 0x3ae   : > { %v3986_v43 = vmax.f32 %v3984_v14, %v3985_v18  ;;  %v3618_v14 = vmax.f32 %v7460_v44, %v3619_v13 }
 0x3af   : > { %v4156_v15 = vmul.f32 0.0625, %v4098_v32  ;;  %v7564_v25 = vpop.xlane.xlu1 %2843 }
 0x3b0   : > { %v7499_v63 = vsel %vm3151_vm12, %v3993_v40, %v3986_v43  ;;  %v3621_v43 = vmax.f32 %v7477_v59, %v3618_v14 }
 0x3b1   : > { %v7502_v33 = vsel %vm3151_vm12, %v4157_v35, %v4156_v15  ;;  %v7555_v21 = vpop.xlane.xlu0 %2753 }
 0x3b5   : > { %v7582_v32 = vpop.xlane.xlu0 %2747 }
 0x3b9   : > { %v7504_v6 = vpop.f32.mrf.mxu0 }
 0x3ba   : > { %8452 = vst [vmem:[#allocation26_spill] sm:$0xff] %v7504_v6  ;;  %v7508_v29 = vsel %vm336_vm0, %v7504_v6, 0.0  ;;  %v2809_v60 = vsel %vm336_vm0, %v7504_v6, -inf }
 0x3bb   : > { %v7510_v4 = vpop.f32.mrf.mxu0  ;;  %2906 = vadd.xlane.f32.xlu1 %v7508_v29 }
 0x3bc   : > { %8453 = vst [vmem:[#allocation27_spill] sm:$0xff] %v7510_v4  ;;  %v2899_v26 = vsel %vm336_vm0, %v7510_v4, 0.0  ;;  %v2803_v5 = vsel %vm336_vm0, %v7510_v4, -inf }
 0x3bd   : > { %v7513_v55 = vpop.f32.mrf.mxu0  ;;  %v3651_v17 = vadd.f32 %v7481_v49, %v2899_v26 }
 0x3be   : > { %8454 = vst [vmem:[#allocation28_spill] sm:$0xff] %v7513_v55  ;;  %v7517_v56 = vsel %vm336_vm0, %v7513_v55, 0.0  ;;  %v7526_v28 = vsel %vm336_vm0, %v7513_v55, -inf }
 0x3bf   : > { %2909 = vadd.xlane.f32.xlu0 %v7517_v56  ;;  %2810 = vmax.xlane.f32.xlu1 %v2809_v60  ;;  %v7530_v61 = vpop.f32.mrf.mxu0  ;;  %v4001_v27 = vmax.f32 %v2809_v60, %v7526_v28  ;;  %v4113_v15 = vadd.f32 %v7517_v56, %v7508_v29  ;;  %v3636_v49 = vmax.f32 %v7470_v57, %v7526_v28 }
 0x3c0   : > { %8455 = vst [vmem:[#allocation29_spill] sm:$0xff] %v7530_v61  ;;  %v7537_v9 = vsel %vm336_vm0, %v7530_v61, 0.0  ;;  %v7546_v38 = vsel %vm336_vm0, %v7530_v61, -inf  ;;  %v3620_v61 = vmax.f32 %v2809_v60, %v3621_v43 }
 0x3c1   : > { %v3994_v62 = vmax.f32 %v2803_v5, %v7546_v38  ;;  %v4002_v59 = vrot.slane %v4001_v27, 4  ;;  %v4106_v14 = vadd.f32 %v7537_v9, %v2899_v26  ;;  %v4114_v1 = vrot.slane %v4113_v15, 4 }
 0x3c2   : > { %v3623_v11 = vmax.f32 %v2803_v5, %v3620_v61  ;;  %v7644_v57 = vadd.f32 %v7489_v31, %v7537_v9 }
 0x3c3   : > { %2813 = vmax.xlane.f32.xlu0 %v7526_v28  ;;  %2900 = vadd.xlane.f32.xlu1 %v2899_v26  ;;  %v3995_v13 = vrot.slane %v3994_v62, 4  ;;  %v4003_v43 = vmax.f32 %v4001_v27, %v4002_v59  ;;  %v4107_v54 = vrot.slane %v4106_v14, 4  ;;  %v4115_v41 = vadd.f32 %v4114_v1, %v4113_v15 }
 0x3c4   : > { %v7585_v3 = vpop.xlane.xlu1 %2858 }
 0x3c5   : > { %8461 = vst [vmem:[#allocation35_spill] sm:$0xff] %v7585_v3  ;;  %v3996_v39 = vmax.f32 %v3994_v62, %v3995_v13  ;;  %v4108_v26 = vadd.f32 %v4107_v54, %v4106_v14  ;;  %v4116_v19 = vrot.slane %v4115_v41, 2 }
 0x3c7   : > { %2903 = vadd.xlane.f32.xlu0 %v7537_v9  ;;  %2804 = vmax.xlane.f32.xlu1 %v2803_v5  ;;  %v3997_v10 = vrot.slane %v3996_v39, 2 }
 0x3c8   : > { %v7608_v4 = vpop.xlane.xlu0 %2861 }
 0x3cb   : > { %2807 = vmax.xlane.f32.xlu0 %v7546_v38 }
 0x3cc   : > { %v7621_v20 = vpop.xlane.xlu0 %2765 }
 0x3cd   : > { %8463 = vst [vmem:[#allocation37_spill] sm:$0xff] %v7621_v20 }
 0x3d0   : > { %v7658_v9 = vpop.xlane.xlu0 %2855 }
 0x3d1   : > { %v7553_v37 = vpop.f32.mrf.mxu0 }
 0x3d2   : > { %8457 = vst [vmem:[#allocation31_spill] sm:$0xff] %v7553_v37  ;;  %v7559_v24 = vsel %vm336_vm0, %v7553_v37, 0.0  ;;  %v2821_v18 = vsel %vm336_vm0, %v7553_v37, -inf }
 0x3d3   : > { %v7561_v42 = vpop.f32.mrf.mxu0  ;;  %2918 = vadd.xlane.f32.xlu1 %v7559_v24  ;;  %v3622_v62 = vmax.f32 %v2821_v18, %v3623_v11  ;;  %v4004_v11 = vrot.slane %v4003_v43, 2 }
 0x3d4   : > { %8458 = vst [vmem:[#allocation32_spill] sm:$0xff] %v7561_v42  ;;  %v2815_v35 = vsel %vm336_vm0, %v7561_v42, -inf  ;;  %v7602_v55 = vsel %vm336_vm0, %v7561_v42, 0.0  ;;  %v7687_v53 = vpop.xlane.xlu0 %2759 }
 0x3d5   : > { %v7571_v30 = vpop.f32.mrf.mxu0  ;;  %v3624_v50 = vmax.f32 %v3622_v62, %v2815_v35  ;;  %v4109_v62 = vrot.slane %v4108_v26, 2  ;;  %8469 = vst [vmem:[#allocation43_spill] sm:$0xff] %v7687_v53 }
 0x3d6   : > { %8459 = vst [vmem:[#allocation33_spill] sm:$0xff] %v7571_v30  ;;  %v7575_v36 = vsel %vm336_vm0, %v7571_v30, 0.0  ;;  %v7598_v37 = vsel %vm336_vm0, %v7571_v30, -inf  ;;  %v7610_v30 = vpop.xlane.xlu1 %2762 }
 0x3d7   : > { %v7579_v40 = vpop.f32.mrf.mxu0  ;;  %2921 = vadd.xlane.f32.xlu0 %v7575_v36  ;;  %2822 = vmax.xlane.f32.xlu1 %v2821_v18  ;;  %8462 = vst [vmem:[#allocation36_spill] sm:$0xff] %v7610_v30  ;;  %v4015_v60 = vmax.f32 %v2821_v18, %v7598_v37  ;;  %v3998_v18 = vmax.f32 %v3996_v39, %v3997_v10 }
 0x3d8   : > { %8460 = vst [vmem:[#allocation34_spill] sm:$0xff] %v7579_v40  ;;  %v7589_v44 = vsel %vm336_vm0, %v7579_v40, -inf  ;;  %v7614_v42 = vsel %vm336_vm0, %v7579_v40, 0.0 }
 0x3d9   : > { %v4008_v6 = vmax.f32 %v2815_v35, %v7589_v44  ;;  %v4120_v13 = vadd.f32 %v7614_v42, %v7602_v55  ;;  %v4016_v5 = vrot.slane %v4015_v60, 4  ;;  %v3999_v31 = vrot.slane %v3998_v18, 1 }
 0x3da   : > { %v7632_v59 = vpop.xlane.xlu1 %2852 }
 0x3db   : > { %2825 = vmax.xlane.f32.xlu0 %v7598_v37  ;;  %2912 = vadd.xlane.f32.xlu1 %v7602_v55  ;;  %v4009_v51 = vrot.slane %v4008_v6, 4  ;;  %v4121_v15 = vrot.slane %v4120_v13, 4  ;;  %v4017_v28 = vmax.f32 %v4015_v60, %v4016_v5  ;;  %v4000_v8 = vmax.f32 %v3998_v18, %v3999_v31 }
 0x3dd   : > { %v4010_v61 = vmax.f32 %v4008_v6, %v4009_v51  ;;  %v4127_v51 = vadd.f32 %v7575_v36, %v7559_v24  ;;  %v7640_v6 = vadd.f32 %v3651_v17, %v7508_v29 }
 0x3df   : > { %2915 = vadd.xlane.f32.xlu0 %v7614_v42  ;;  %2816 = vmax.xlane.f32.xlu1 %v2815_v35  ;;  %v4011_v10 = vrot.slane %v4010_v61, 2  ;;  %v4005_v35 = vmax.f32 %v4003_v43, %v4004_v11  ;;  %v4128_v5 = vrot.slane %v4127_v51, 4  ;;  %v3635_v43 = vmax.f32 %v7486_v7, %v7546_v38  ;;  %v7670_v11 = vpop.xlane.xlu1 %2756 }
 0x3e0   : > { %8468 = vst [vmem:[#allocation42_spill] sm:$0xff] %v7670_v11  ;;  %v4110_v38 = vadd.f32 %v4109_v62, %v4108_v26  ;;  %v3638_v26 = vmax.f32 %v3636_v49, %v7598_v37 }
 0x3e1   : > { %v4012_v47 = vmax.f32 %v4010_v61, %v4011_v10  ;;  %v4006_v7 = vrot.slane %v4005_v35, 1 }
 0x3e2   : > { %v7623_v40 = vpop.f32.mrf.mxu0  ;;  %v4111_v3 = vrot.slane %v4110_v38, 1 }
 0x3e3   : > { %8464 = vst [vmem:[#allocation38_spill] sm:$0xff] %v7623_v40  ;;  %2819 = vmax.xlane.f32.xlu0 %v7589_v44  ;;  %v7628_v27 = vsel %vm336_vm0, %v7623_v40, 0.0  ;;  %v2833_v60 = vsel %vm336_vm0, %v7623_v40, -inf  ;;  %v4013_v16 = vrot.slane %v4012_v47, 1 }
 0x3e4   : > { %2930 = vadd.xlane.f32.xlu1 %v7628_v27  ;;  %v7635_v1 = vpop.f32.mrf.mxu0  ;;  %v7689_v22 = vpop.xlane.xlu1 %2870 }
 0x3e5   : > { %8465 = vst [vmem:[#allocation39_spill] sm:$0xff] %v7635_v1  ;;  %v2827_v39 = vsel %vm336_vm0, %v7635_v1, -inf  ;;  %v7652_v14 = vsel %vm336_vm0, %v7635_v1, 0.0  ;;  %v4122_v1 = vadd.f32 %v4121_v15, %v4120_v13  ;;  %v7678_v13 = vadd.f32 %v4116_v19, %v4115_v41  ;;  %8470 = vst [vmem:[#allocation44_spill] sm:$0xff] %v7689_v22 }
 0x3e6   : > { %v7646_v54 = vpop.f32.mrf.mxu0  ;;  %v3625_v29 = vmax.f32 %v2827_v39, %v3624_v50  ;;  %v4018_v15 = vrot.slane %v4017_v28, 2  ;;  %v3637_v41 = vmax.f32 %v3635_v43, %v7589_v44  ;;  %v4190_v44 = vsel %vm3153_vm13, %v4000_v8, %v7499_v63 }
 0x3e7   : > { %8466 = vst [vmem:[#allocation40_spill] sm:$0xff] %v7646_v54  ;;  %v7656_v17 = vsel %vm336_vm0, %v7646_v54, 0.0  ;;  %v2836_v50 = vsel %vm336_vm0, %v7646_v54, -inf  ;;  %v4123_v19 = vrot.slane %v4122_v1, 2  ;;  %v4014_v53 = vmax.f32 %v4012_v47, %v4013_v16 }
 0x3e8   : > { %2924 = vadd.xlane.f32.xlu1 %v7652_v14  ;;  %2933 = vadd.xlane.f32.xlu0 %v7656_v17  ;;  %v7664_v23 = vpop.f32.mrf.mxu0  ;;  %v3626_v45 = vmax.f32 %v2833_v60, %v3625_v29  ;;  %v4141_v29 = vadd.f32 %v7656_v17, %v7628_v27  ;;  %v4029_v10 = vmax.f32 %v2833_v60, %v2836_v50  ;;  %v7694_v12 = vpop.xlane.xlu0 %2873 }
 0x3e9   : > { %8467 = vst [vmem:[#allocation41_spill] sm:$0xff] %v7664_v23  ;;  %v7674_v58 = vsel %vm336_vm0, %v7664_v23, 0.0  ;;  %v2830_v40 = vsel %vm336_vm0, %v7664_v23, -inf  ;;  %v4129_v23 = vadd.f32 %v4128_v5, %v4127_v51  ;;  %v4019_v62 = vmax.f32 %v4017_v28, %v4018_v15  ;;  %v7699_v8 = vpop.xlane.xlu1 %2774 }
 0x3ea   : > { %v4134_v54 = vadd.f32 %v7674_v58, %v7652_v14  ;;  %3676 = vst.msk [vmem:[#allocation4 + $0x3] sm:$0xff] %vm336_vm0, %v3626_v45  ;;  %v4022_v61 = vmax.f32 %v2827_v39, %v2830_v40  ;;  %v4030_v45 = vrot.slane %v4029_v10, 4  ;;  %v4142_v20 = vrot.slane %v4141_v29, 4 }
 0x3eb   : > { %v3639_v11 = vmax.f32 %v3637_v41, %v2830_v40  ;;  %v4130_v31 = vrot.slane %v4129_v23, 2  ;;  %v3640_v5 = vmax.f32 %v3638_v26, %v2836_v50  ;;  %v4124_v22 = vadd.f32 %v4123_v19, %v4122_v1 }
 0x3ec   : > { %2828 = vmax.xlane.f32.xlu1 %v2827_v39  ;;  %2927 = vadd.xlane.f32.xlu0 %v7674_v58  ;;  %v4135_v48 = vrot.slane %v4134_v54, 4  ;;  %v4023_v30 = vrot.slane %v4022_v61, 4  ;;  %v4007_v39 = vmax.f32 %v4005_v35, %v4006_v7  ;;  %v4031_v43 = vmax.f32 %v4029_v10, %v4030_v45 }
 0x3ed   : > { %v4020_v28 = vrot.slane %v4019_v62, 1  ;;  %v4143_v15 = vadd.f32 %v4142_v20, %v4141_v29  ;;  %v3641_v7 = vmax.f32 %v3639_v11, %v3640_v5  ;;  %v4112_v1 = vadd.f32 %v4111_v3, %v4110_v38 }
 0x3ee   : > { %v4136_v18 = vadd.f32 %v4135_v48, %v4134_v54  ;;  %v4024_v51 = vmax.f32 %v4022_v61, %v4023_v30  ;;  %v4032_v35 = vrot.slane %v4031_v43, 2  ;;  %v3003_v48 = vlaneseq }
 0x3ef   : > { %v3667_v30 = vadd.f32 %v7644_v57, %v7517_v56  ;;  %v3653_v16 = vadd.f32 %v7640_v6, %v7602_v55  ;;  %v4191_v54 = vsel %vm3155_vm14, %v4007_v39, %v4190_v44  ;;  %3677 = vst.msk [vmem:[#allocation4 + $0xb] sm:$0xff] %vm336_vm0, %v3641_v7  ;;  %v4125_v20 = vrot.slane %v4124_v22, 1 }
 0x3f0   : > { %2834 = vmax.xlane.f32.xlu1 %v2833_v60  ;;  %2831 = vmax.xlane.f32.xlu0 %v2830_v40  ;;  %v4137_v37 = vrot.slane %v4136_v18, 2  ;;  %v4025_v49 = vrot.slane %v4024_v51, 2  ;;  %v4118_v40 = vrot.slane %v7678_v13, 1  ;;  %v4033_v47 = vmax.f32 %v4031_v43, %v4032_v35 }
 0x3f1   : > { %v4192_v29 = vsel %vm3157_vm15, %v4014_v53, %v4191_v54  ;;  %v4131_v61 = vadd.f32 %v4130_v31, %v4129_v23  ;;  %v4021_v56 = vmax.f32 %v4019_v62, %v4020_v28  ;;  %v4144_v57 = vrot.slane %v4143_v15, 2  ;;  %v7712_v53 = vpop.xlane.xlu1 %2864 }
 0x3f2   : > { %v4026_v63 = vmax.f32 %v4024_v51, %v4025_v49  ;;  %v4138_v60 = vadd.f32 %v4137_v37, %v4136_v18  ;;  %v4034_v10 = vrot.slane %v4033_v47, 1  ;;  %v3004_v19 = vand.u32 127, %v3003_v48 }
 0x3f3   : > { %v4119_v3 = vadd.f32 %v4118_v40, %v7678_v13  ;;  %v3668_v6 = vadd.f32 %v3667_v30, %v7614_v42  ;;  %v3654_v38 = vadd.f32 %v3653_v16, %v7559_v24  ;;  %v4193_v45 = vsel %vm3159_vm1, %v4021_v56, %v4192_v29 }
 0x3f4   : > { %2837 = vmax.xlane.f32.xlu0 %v2836_v50  ;;  %v4027_v11 = vrot.slane %v4026_v63, 1  ;;  %v7707_v50 = vpop.xlane.xlu0 %2777  ;;  %v4035_v41 = vmax.f32 %v4033_v47, %v4034_v10  ;;  %v4158_v26 = vmul.f32 0.0625, %v4112_v1  ;;  %v4126_v39 = vadd.f32 %v4125_v20, %v4124_v22 }
 0x3f5   : > { %v4139_v23 = vrot.slane %v4138_v60, 1  ;;  %v4132_v18 = vrot.slane %v4131_v61, 1  ;;  %v3655_v13 = vadd.f32 %v3654_v38, %v7652_v14  ;;  %v4145_v51 = vadd.f32 %v4144_v57, %v4143_v15 }
 0x3f6   : > { %v4028_v55 = vmax.f32 %v4026_v63, %v4027_v11  ;;  %v7717_v31 = vshrl.u32 %v3003_v48, 7  ;;  %v3208_v42 = vadd.s32 4294967280, %v3004_v19  ;;  %v3213_v24 = vadd.s32 4294967272, %v3004_v19  ;;  %v7732_v63 = vpop.xlane.xlu1 %2768 }
 0x3f7   : > { %v3009_v5 = vadd.s32 4294967288, %v3004_v19  ;;  %v3669_v22 = vadd.f32 %v3668_v6, %v7575_v36  ;;  %v4159_v43 = vmul.f32 0.0625, %v4119_v3  ;;  %v4160_v37 = vmul.f32 0.0625, %v4126_v39  ;;  %v8472_v39 = vld [vmem:[#allocation43_spill] sm:$0xff] }
 0x3f8   : > { %v4194_v62 = vsel %vm3161_vm2, %v4028_v55, %v4193_v45  ;;  %v4140_v49 = vadd.f32 %v4139_v23, %v4138_v60  ;;  %v2868_v28 = vpop.xlane.xlu0 %2867  ;;  %v4224_v35 = vsel %vm3153_vm13, %v4158_v26, %v7502_v33  ;;  %v4133_v14 = vadd.f32 %v4132_v18, %v4131_v61 }
 0x3f9   : > { %v4195_v44 = vsel %vm3163_vm3, %v4035_v41, %v4194_v62  ;;  %v3656_v15 = vadd.f32 %v3655_v13, %v7628_v27  ;;  %v4146_v7 = vrot.slane %v4145_v51, 1  ;;  %v3670_v48 = vadd.f32 %v3669_v22, %v7674_v58  ;;  %v8471_v41 = vld [vmem:[#allocation30_spill] sm:$0xff] }
 0x3fa   : > { %4199 = vst.msk [vmem:[#allocation5 + $0xb] sm:$0xff] %vm336_vm0, %v4195_v44  ;;  %v7726_v40 = vsub.s32 %v3208_v42, %v7717_v31  ;;  %v2938_v30 = vmul.f32 0.0625, %v7522_v46  ;;  %v7730_v36 = vsub.s32 %v3004_v19, %v7717_v31  ;;  %v7735_v1 = vsub.s32 %v3213_v24, %v7717_v31  ;;  %v8474_v24 = vld [vmem:[#allocation42_spill] sm:$0xff] }
 0x3fb   : > { %v2939_v33 = vmul.f32 0.0625, %v7549_v52  ;;  %v2937_v27 = vmul.f32 0.0625, %v7564_v25  ;;  %v4225_v58 = vsel %vm3155_vm14, %v4159_v43, %v4224_v35  ;;  %v2936_v16 = vmul.f32 0.0625, %v7533_v2 }
 0x3fc   : > { %v7744_v46 = vsub.s32 %v3009_v5, %v7717_v31  ;;  %v4162_v47 = vmul.f32 0.0625, %v4140_v49  ;;  %v4226_v54 = vsel %vm3157_vm15, %v4160_v37, %v4225_v58  ;;  %v4161_v20 = vmul.f32 0.0625, %v4133_v14  ;;  %v2772_v29 = vpop.xlane.xlu0 %2771 }
 0x3fd   : > { %v3672_v60 = vmul.f32 0.0625, %v3656_v15  ;;  %v3671_v11 = vadd.f32 %v3670_v48, %v7656_v17  ;;  %v4147_v52 = vadd.f32 %v4146_v7, %v4145_v51  ;;  %v3223_v25 = vrot.slane %v2938_v30, %v7726_v40  ;;  %v8473_v51 = vld [vmem:[#allocation35_spill] sm:$0xff]  ;;  %v8475_v30 = vld [vmem:[#allocation37_spill] sm:$0xff] }
 0x3fe   : > { %v3227_v2 = vrot.slane %v2939_v33, %v7735_v1  ;;  %v3217_v56 = vrot.slane %v2937_v27, %v7735_v1  ;;  %v3013_v57 = vrot.slane %v7582_v32, %v7744_v46  ;;  %v4227_v17 = vsel %vm3159_vm1, %v4161_v20, %v4226_v54  ;;  %v8477_v54 = vld [vmem:[#allocation44_spill] sm:$0xff] }
 0x3ff   : > { %v3212_v10 = vrot.slane %v2936_v16, %v7726_v40  ;;  %v3008_v19 = vrot.slane %v7551_v34, %v7730_v36  ;;  %v4228_v3 = vsel %vm3161_vm2, %v4162_v47, %v4227_v17  ;;  %v3023_v55 = vrot.slane %v7555_v21, %v7744_v46  ;;  %v8476_v16 = vld [vmem:[#allocation36_spill] sm:$0xff] }
 0x400   : > { %v2943_v6 = vmul.f32 0.0625, %v7608_v4  ;;  %v3673_v38 = vmul.f32 0.0625, %v3671_v11  ;;  %v4163_v32 = vmul.f32 0.0625, %v4147_v52  ;;  %v3019_v45 = vrot.slane %v8471_v41, %v7730_v36 }
 0x401   : > { %4230 = vrot.lane.b32.xlu1 %v7443_v0, %s6208_s14  ;;  %v2941_v0 = vmul.f32 0.0625, %v7658_v9  ;;  %v2940_v9 = vmul.f32 0.0625, %v7632_v59  ;;  %v3032_v23 = vrot.slane %v8472_v39, %v7744_v46  ;;  %v2945_v34 = vmul.f32 0.0625, %v2868_v28 }
 0x402   : > { %v3228_v18 = vsel %vm3218_vm5, %v3227_v2, %v3223_v25  ;;  %v3219_v21 = vsel %vm3218_vm5, %v3217_v56, %v3212_v10  ;;  %v3015_v4 = vsel %vm3014_vm6, %v3013_v57, %v3008_v19  ;;  %v4229_v13 = vsel %vm3163_vm3, %v4163_v32, %v4228_v3 }
 0x403   : > { %v3236_v26 = vrot.slane %v2941_v0, %v7735_v1  ;;  %v2942_v44 = vmul.f32 0.0625, %v8473_v51  ;;  %v3232_v42 = vrot.slane %v2940_v9, %v7726_v40  ;;  %v3028_v5 = vrot.slane %v8474_v24, %v7730_v36 }
 0x404   : > { %v7750_v61 = vpop.xlane.xlu1 %2882  ;;  %v2944_v22 = vmul.f32 0.0625, %v7712_v53  ;;  %v3024_v43 = vsel %vm3014_vm6, %v3023_v55, %v3019_v45  ;;  %v3245_v37 = vrot.slane %v2943_v6, %v7735_v1  ;;  %v2947_v35 = vmul.f32 0.0625, %v7694_v12 }
 0x405   : > { %3680 = vrot.lane.b32.xlu1 %v3672_v60, %s6208_s14  ;;  %v3237_v49 = vsel %vm3218_vm5, %v3236_v26, %v3232_v42  ;;  %v3033_v28 = vsel %vm3014_vm6, %v3032_v23, %v3028_v5  ;;  %v3254_v14 = vrot.slane %v2945_v34, %v7735_v1  ;;  %v3355_v48 = vsel %vm3151_vm12, %v3228_v18, %v3219_v21 }
 0x406   : > { %v3152_v53 = vsel %vm3151_vm12, %v3024_v43, %v3015_v4  ;;  %v3041_v33 = vrot.slane %v8475_v30, %v7744_v46  ;;  %v3050_v27 = vrot.slane %v2772_v29, %v7744_v46  ;;  %v3241_v58 = vrot.slane %v2942_v44, %v7726_v40  ;;  %v6097_v30 = vld [vmem:[%s8396_s4 + $0x20] sm:$0xff]  }
 0x407   : > { %v3037_v47 = vrot.slane %v8476_v16, %v7730_v36  ;;  %v2946_v12 = vmul.f32 0.0625, %v8477_v54  ;;  %v3250_v20 = vrot.slane %v2944_v22, %v7726_v40  ;;  %v3356_v60 = vsel %vm3153_vm13, %v3237_v49, %v3355_v48  ;;  %v6094_v49 = vld [vmem:[%s8396_s4 + $0x38] sm:$0xff]  }
 0x408   : > { %v2886_v62 = vpop.xlane.xlu0 %2885  ;;  %v7771_v59 = vpop.xlane.xlu1 %2786  ;;  %v3154_v11 = vsel %vm3153_vm13, %v3033_v28, %v3152_v53  ;;  %v3046_v52 = vrot.slane %v7732_v63, %v7730_v36  ;;  %v3246_v0 = vsel %vm3218_vm5, %v3245_v37, %v3241_v58  ;;  %v3263_v29 = vrot.slane %v2947_v35, %v7735_v1  ;;  %v6095_v35 = vld [vmem:[%s8396_s4 + $0x30] sm:$0xff]   ;;  %v6105_v53 = vld [vmem:[%s8397_s5 + $0x28] sm:$0xff]   ;;  %v6098_v16 = vld [vmem:[%s8396_s4 + $0x18] sm:$0xff]  }
 0x409   : > { %3682 = vrot.lane.b32.xlu1 %v3673_v38, %s6208_s14  ;;  %v3255_v2 = vsel %vm3218_vm5, %v3254_v14, %v3250_v20  ;;  %v3042_v57 = vsel %vm3014_vm6, %v3041_v33, %v3037_v47  ;;  %v2951_v10 = vmul.f32 0.0625, %v2886_v62  ;;  %v3259_v9 = vrot.slane %v2946_v12, %v7726_v40  ;;  %v6101_v14 = vld [vmem:[%s8397_s5 + $0x38] sm:$0xff]   ;;  %v6099_v12 = vld [vmem:[%s8396_s4 + $0x10] sm:$0xff]  }
 0x40a   : > { %4232 = vrot.lane.b32.xlu0 %v4229_v13, %s6208_s14  ;;  %v3051_v17 = vsel %vm3014_vm6, %v3050_v27, %v3046_v52  ;;  %v3059_v3 = vrot.slane %v7707_v50, %v7744_v46  ;;  %v3357_v63 = vsel %vm3155_vm14, %v3246_v0, %v3356_v60  ;;  %v3156_v55 = vsel %vm3155_vm14, %v3042_v57, %v3154_v11  ;;  %v6106_v27 = vld [vmem:[%s8397_s5 + $0x20] sm:$0xff]   ;;  %v6108_v47 = vld [vmem:[%s8397_s5 + $0x18] sm:$0xff]   ;;  %v6110_v60 = vld [vmem:[%s8397_s5 + $0x10] sm:$0xff]  }
 0x40b   : > { %v3358_v38 = vsel %vm3157_vm15, %v3255_v2, %v3357_v63  ;;  %v2950_v32 = vmul.f32 0.0625, %v7750_v61  ;;  %v3264_v26 = vsel %vm3218_vm5, %v3263_v29, %v3259_v9  ;;  %v3055_v39 = vrot.slane %v7699_v8, %v7730_v36  ;;  %v6100_v11 = vld [vmem:[%s8396_s4 + $0x8] sm:$0xff]   ;;  %v6102_v0 = vld [vmem:[%s8396_s4] sm:$0xff]  }
 0x40c   : > { %v2790_v15 = vpop.xlane.xlu0 %2789  ;;  %v2877_v7 = vpop.xlane.xlu1 %2876  ;;  %v3158_v50 = vsel %vm3157_vm15, %v3051_v17, %v3156_v55  ;;  %v3281_v62 = vrot.slane %v2951_v10, %v7735_v1  ;;  %v3073_v13 = vrot.slane %v7771_v59, %v7730_v36  ;;  %v3359_v8 = vsel %vm3159_vm1, %v3264_v26, %v3358_v38  ;;  %v6107_v17 = vld [vmem:[%s8396_s4 + $0x60] sm:$0xff]  }
 0x40d   : > { %v2948_v25 = vmul.f32 0.0625, %v2877_v7  ;;  %v3077_v23 = vrot.slane %v2790_v15, %v7744_v46  ;;  %v3060_v4 = vsel %vm3014_vm6, %v3059_v3, %v3055_v39  ;;  %v3277_v51 = vrot.slane %v2950_v32, %v7726_v40  ;;  %v6103_v15 = vld [vmem:[%s8397_s5 + $0x30] sm:$0xff]   ;;  %v6096_v7 = vld [vmem:[%s8396_s4 + $0x28] sm:$0xff]  }
 0x40e   : > { %v3160_v24 = vsel %vm3159_vm1, %v3060_v4, %v3158_v50  ;;  %v6211_v28 = vmov 0  }
 0x40f   : > { %v3268_v41 = vrot.slane %v2948_v25, %v7726_v40  ;;  %v3078_v5 = vsel %vm3014_vm6, %v3077_v23, %v3073_v13  ;;  %v3282_v43 = vsel %vm3218_vm5, %v3281_v62, %v3277_v51  ;;  %3557 = vmatprep.subr.bf16.mxu1 %v6211_v28  ;;  %3869 = vmatprep.subr.bf16.mxu0 %v6211_v28 }
 0x410   : > { %v2880_v56 = vpop.xlane.xlu0 %2879  ;;  %v2781_v6 = vpop.xlane.xlu1 %2780  ;;  %3558 = vmatpush1.bf16.msra.mxu1 %v6094_v49  ;;  %3870 = vmatpush1.bf16.msra.mxu0 %v6101_v14 }
 0x411   : > { %v2949_v19 = vmul.f32 0.0625, %v2880_v56  ;;  %v3064_v61 = vrot.slane %v2781_v6, %v7730_v36  ;;  %3559 = vmatprep.subr.bf16.mxu1 %v6211_v28  ;;  %3871 = vmatprep.subr.bf16.mxu0 %v6211_v28  ;;  %v6104_v56 = vld [vmem:[%s8396_s4 + $0x68] sm:$0xff]  }
 0x413   : > { %v3272_v45 = vrot.slane %v2949_v19, %v7735_v1  ;;  %v6109_v19 = vld [vmem:[%s8396_s4 + $0x58] sm:$0xff]  }
 0x414   : > { %v2784_v34 = vpop.xlane.xlu0 %2783  ;;  %3560 = vmatpush1.bf16.msra.mxu1 %v6095_v35  ;;  %3872 = vmatpush1.bf16.msra.mxu0 %v6103_v15 }
 0x415   : > { %v3273_v18 = vsel %vm3218_vm5, %v3272_v45, %v3268_v41  ;;  %v3068_v21 = vrot.slane %v2784_v34, %v7744_v46  ;;  %3561 = vmatprep.subr.bf16.mxu1 %v6211_v28  ;;  %3873 = vmatprep.subr.bf16.mxu0 %v6211_v28 }
 0x416   : > { %v3360_v44 = vsel %vm3161_vm2, %v3273_v18, %v3359_v8 }
 0x417   : > { %v3069_v42 = vsel %vm3014_vm6, %v3068_v21, %v3064_v61  ;;  %v3361_v59 = vsel %vm3163_vm3, %v3282_v43, %v3360_v44 }
 0x418   : > { %v3162_v22 = vsel %vm3161_vm2, %v3069_v42, %v3160_v24  ;;  %3562 = vmatpush1.bf16.msra.mxu1 %v6096_v7  ;;  %3874 = vmatpush1.bf16.msra.mxu0 %v6105_v53 }
 0x419   : > { %v3164_v37 = vsel %vm3163_vm3, %v3078_v5, %v3162_v22  ;;  %3563 = vmatprep.subr.bf16.mxu1 %v6211_v28  ;;  %3875 = vmatprep.subr.bf16.mxu0 %v6211_v28 }
 0x41a   : > { %3174 = vst.msk [vmem:[#allocation3 + $0x3] sm:$0xff] %vm336_vm0, %v3164_v37 }
 0x41b   : > { %3372 = vst.msk [vmem:[#allocation3 + $0x3] sm:$0xff] %vm3371_vm7, %v3361_v59 }
 0x41c   : > { %3564 = vmatpush1.bf16.msra.mxu1 %v6097_v30  ;;  %3876 = vmatpush1.bf16.msra.mxu0 %v6106_v27 }
 0x41d   : > { %3565 = vmatprep.subr.bf16.mxu1 %v6211_v28  ;;  %3877 = vmatprep.subr.bf16.mxu0 %v6211_v28 }
 0x420   : > { %3566 = vmatpush1.bf16.msra.mxu1 %v6098_v16  ;;  %3878 = vmatpush1.bf16.msra.mxu0 %v6108_v47 }
 0x421   : > { %3567 = vmatprep.subr.bf16.mxu1 %v6211_v28  ;;  %3879 = vmatprep.subr.bf16.mxu0 %v6211_v28 }
 0x424   : > { %v7861_v48 = vpop.xlane.xlu1 %2894  ;;  %3568 = vmatpush1.bf16.msra.mxu1 %v6099_v12  ;;  %3880 = vmatpush1.bf16.msra.mxu0 %v6110_v60 }
 0x425   : > { %3569 = vmatprep.subr.bf16.mxu1 %v6211_v28  ;;  %3881 = vmatprep.subr.bf16.mxu0 %v6211_v28  ;;  %v2954_v18 = vmul.f32 0.0625, %v7861_v48 }
 0x427   : > { %v3295_v22 = vrot.slane %v2954_v18, %v7726_v40 }
 0x428   : > { %v2898_v33 = vpop.xlane.xlu0 %2897  ;;  %v7875_v58 = vpop.xlane.xlu1 %2798  ;;  %3570 = vmatpush1.bf16.msra.mxu1 %v6100_v11 }
 0x429   : > { %3571 = vmatprep.subr.bf16.mxu1 %v6211_v28  ;;  %v2955_v62 = vmul.f32 0.0625, %v2898_v33  ;;  %v3091_v43 = vrot.slane %v7875_v58, %v7730_v36 }
 0x42b   : > { %v3299_v42 = vrot.slane %v2955_v62, %v7735_v1 }
 0x42c   : > { %v7885_v54 = vpop.xlane.xlu0 %2801  ;;  %v2889_v20 = vpop.xlane.xlu1 %2888  ;;  %3572 = vmatpush1.bf16.msra.mxu1 %v6102_v0 }
 0x42d   : > { %3577 = vmatprep.subr.bf16.mxu1 %v6211_v28  ;;  %v2952_v34 = vmul.f32 0.0625, %v2889_v20  ;;  %v3095_v24 = vrot.slane %v7885_v54, %v7744_v46  ;;  %v3300_v33 = vsel %vm3218_vm5, %v3299_v42, %v3295_v22 }
 0x42f   : > { %v3286_v8 = vrot.slane %v2952_v34, %v7726_v40  ;;  %v3096_v27 = vsel %vm3014_vm6, %v3095_v24, %v3091_v43 }
 0x430   : > { %v2892_v52 = vpop.xlane.xlu0 %2891  ;;  %v2793_v25 = vpop.xlane.xlu1 %2792  ;;  %3578 = vmatpush2.bf16.msra.mxu1 %v6104_v56 }
 0x431   : > { %3579 = vmatprep.subr.bf16.mxu1 %v6211_v28  ;;  %v2953_v39 = vmul.f32 0.0625, %v2892_v52  ;;  %v3082_v5 = vrot.slane %v2793_v25, %v7730_v36 }
 0x433   : > { %v3290_v61 = vrot.slane %v2953_v39, %v7735_v1 }
 0x434   : > { %v2796_v29 = vpop.xlane.xlu0 %2795  ;;  %3580 = vmatpush2.bf16.msra.mxu1 %v6107_v17 }
 0x435   : > { %3581 = vmatprep.subr.bf16.mxu1 %v6211_v28  ;;  %v3086_v4 = vrot.slane %v2796_v29, %v7744_v46  ;;  %v3291_v37 = vsel %vm3218_vm5, %v3290_v61, %v3286_v8 }
 0x436   : > { %v3362_v47 = vsel %vm3151_vm12, %v3300_v33, %v3291_v37 }
 0x437   : > { %v3087_v49 = vsel %vm3014_vm6, %v3086_v4, %v3082_v5 }
 0x438   : > { %3582 = vmatpush2.bf16.msra.mxu1 %v6109_v19  ;;  %v3165_v54 = vsel %vm3151_vm12, %v3096_v27, %v3087_v49 }
 0x439   : > { %3583 = vmatprep.subr.bf16.mxu1 %v6211_v28 }
 0x444   : > { %v2907_v2 = vpop.xlane.xlu1 %2906 }
 0x445   : > { %v2958_v7 = vmul.f32 0.0625, %v2907_v2 }
 0x447   : > { %v3313_v25 = vrot.slane %v2958_v7, %v7726_v40 }
 0x448   : > { %v2910_v57 = vpop.xlane.xlu0 %2909  ;;  %v7912_v10 = vpop.xlane.xlu1 %2810 }
 0x449   : > { %v2959_v35 = vmul.f32 0.0625, %v2910_v57  ;;  %v3109_v0 = vrot.slane %v7912_v10, %v7730_v36 }
 0x44b   : > { %v3317_v20 = vrot.slane %v2959_v35, %v7735_v1 }
 0x44c   : > { %v7918_v9 = vpop.xlane.xlu0 %2813  ;;  %v2901_v3 = vpop.xlane.xlu1 %2900 }
 0x44d   : > { %v2956_v51 = vmul.f32 0.0625, %v2901_v3  ;;  %v3113_v60 = vrot.slane %v7918_v9, %v7744_v46 }
 0x44f   : > { %v3304_v48 = vrot.slane %v2956_v51, %v7726_v40  ;;  %v3114_v10 = vsel %vm3014_vm6, %v3113_v60, %v3109_v0 }
 0x450   : > { %v2904_v63 = vpop.xlane.xlu0 %2903  ;;  %v2805_v55 = vpop.xlane.xlu1 %2804 }
 0x451   : > { %v2957_v21 = vmul.f32 0.0625, %v2904_v63  ;;  %v3100_v58 = vrot.slane %v2805_v55, %v7730_v36 }
 0x453   : > { %v3308_v59 = vrot.slane %v2957_v21, %v7735_v1 }
 0x454   : > { %v2808_v6 = vpop.xlane.xlu0 %2807 }
 0x455   : > { %v3104_v14 = vrot.slane %v2808_v6, %v7744_v46  ;;  %v3309_v12 = vsel %vm3218_vm5, %v3308_v59, %v3304_v48 }
 0x456   : > { %v3363_v17 = vsel %vm3153_vm13, %v3309_v12, %v3362_v47  ;;  %v6114_v12 = vld [vmem:[%s8397_s5] sm:$0xff]  }
 0x457   : > { %v3105_v11 = vsel %vm3014_vm6, %v3104_v14, %v3100_v58 }
 0x458   : > { %v3166_v63 = vsel %vm3153_vm13, %v3105_v11, %v3165_v54  ;;  %v6113_v54 = vld [vmem:[%s8396_s4 + $0x48] sm:$0xff]  }
 0x45c   : > { %v2919_v38 = vpop.xlane.xlu1 %2918 }
 0x45d   : > { %v2962_v55 = vmul.f32 0.0625, %v2919_v38 }
 0x45f   : > { %v3331_v8 = vrot.slane %v2962_v55, %v7726_v40 }
 0x460   : > { %v2922_v32 = vpop.xlane.xlu0 %2921  ;;  %v7922_v41 = vpop.xlane.xlu1 %2822 }
 0x461   : > { %v2963_v29 = vmul.f32 0.0625, %v2922_v32  ;;  %v3127_v5 = vrot.slane %v7922_v41, %v7730_v36 }
 0x464   : > { %v7924_v45 = vpop.xlane.xlu0 %2825  ;;  %v2913_v26 = vpop.xlane.xlu1 %2912 }
 0x465   : > { %v2960_v16 = vmul.f32 0.0625, %v2913_v26  ;;  %v3318_v26 = vsel %vm3218_vm5, %v3317_v20, %v3313_v25  ;;  %v3131_v38 = vrot.slane %v7924_v45, %v7744_v46  ;;  %v3376_v20 = vld [vmem:[#allocation3 + $0x1] sm:$0xff] }
 0x466   : > { %v3364_v34 = vsel %vm3155_vm14, %v3318_v26, %v3363_v17  ;;  %v6116_v26 = vld [vmem:[%s8397_s5 + $0x68] sm:$0xff]  }
 0x467   : > { %v3322_v19 = vrot.slane %v2960_v16, %v7726_v40  ;;  %v3132_v14 = vsel %vm3014_vm6, %v3131_v38, %v3127_v5 }
 0x468   : > { %v2916_v50 = vpop.xlane.xlu0 %2915  ;;  %v2817_v23 = vpop.xlane.xlu1 %2816 }
 0x469   : > { %v2961_v15 = vmul.f32 0.0625, %v2916_v50  ;;  %v3118_v6 = vrot.slane %v2817_v23, %v7730_v36  ;;  %v3335_v50 = vrot.slane %v2963_v29, %v7735_v1  ;;  %v3167_v23 = vsel %vm3155_vm14, %v3114_v10, %v3166_v63  ;;  %v3380_v63 = vld [vmem:[#allocation3 + $0x3] sm:$0xff] }
 0x46b   : > { %v3326_v52 = vrot.slane %v2961_v15, %v7735_v1  ;;  %v3336_v43 = vsel %vm3218_vm5, %v3335_v50, %v3331_v8 }
 0x46c   : > { %v2820_v13 = vpop.xlane.xlu0 %2819 }
 0x46d   : > { %v2931_v44 = vpop.xlane.xlu1 %2930  ;;  %v3122_v2 = vrot.slane %v2820_v13, %v7744_v46  ;;  %v3327_v32 = vsel %vm3218_vm5, %v3326_v52, %v3322_v19 }
 0x46e   : > { %v3365_v51 = vsel %vm3157_vm15, %v3327_v32, %v3364_v34  ;;  %v2966_v42 = vmul.f32 0.0625, %v2931_v44 }
 0x46f   : > { %v3123_v62 = vsel %vm3014_vm6, %v3122_v2, %v3118_v6  ;;  %v3366_v44 = vsel %vm3159_vm1, %v3336_v43, %v3365_v51  ;;  %v6115_v6 = vld [vmem:[%s8396_s4 + $0x40] sm:$0xff]  }
 0x470   : > { %v3168_v22 = vsel %vm3157_vm15, %v3123_v62, %v3167_v23  ;;  %v3349_v7 = vrot.slane %v2966_v42, %v7726_v40  ;;  %v6118_v62 = vld [vmem:[%s8397_s5 + $0x60] sm:$0xff]  }
 0x471   : > { %v2925_v53 = vpop.xlane.xlu1 %2924  ;;  %v2934_v30 = vpop.xlane.xlu0 %2933 }
 0x472   : > { %v2964_v3 = vmul.f32 0.0625, %v2925_v53  ;;  %v2967_v18 = vmul.f32 0.0625, %v2934_v30 }
 0x474   : > { %v3340_v4 = vrot.slane %v2964_v3, %v7726_v40  ;;  %v3353_v37 = vrot.slane %v2967_v18, %v7735_v1  ;;  %v6111_v40 = vld [vmem:[%s8396_s4 + $0x50] sm:$0xff]  }
 0x475   : > { %v2829_v56 = vpop.xlane.xlu1 %2828  ;;  %v2928_v57 = vpop.xlane.xlu0 %2927  ;;  %3584 = vmatpush2.bf16.msra.mxu1 %v6111_v40 }
 0x476   : > { %v2965_v9 = vmul.f32 0.0625, %v2928_v57  ;;  %v3136_v24 = vrot.slane %v2829_v56, %v7730_v36  ;;  %v3354_v33 = vsel %vm3218_vm5, %v3353_v37, %v3349_v7  ;;  %3585 = vmatprep.subr.bf16.mxu1 %v6211_v28  ;;  %v3378_v57 = vld [vmem:[#allocation3 + $0x2] sm:$0xff] }
 0x478   : > { %v3344_v39 = vrot.slane %v2965_v9, %v7735_v1  ;;  %v3169_v1 = vsel %vm3159_vm1, %v3132_v14, %v3168_v22 }
 0x479   : > { %v2835_v61 = vpop.xlane.xlu1 %2834  ;;  %v2832_v21 = vpop.xlane.xlu0 %2831  ;;  %3586 = vmatpush2.bf16.msra.mxu1 %v6113_v54 }
 0x47a   : > { %v3140_v13 = vrot.slane %v2832_v21, %v7744_v46  ;;  %v3345_v45 = vsel %vm3218_vm5, %v3344_v39, %v3340_v4  ;;  %v3145_v15 = vrot.slane %v2835_v61, %v7730_v36  ;;  %3587 = vmatprep.subr.bf16.mxu1 %v6211_v28 }
 0x47b   : > { %v3367_v48 = vsel %vm3161_vm2, %v3345_v45, %v3366_v44  ;;  %v6122_v45 = vld [vmem:[%s8397_s5 + $0x50] sm:$0xff]   ;;  %v6124_v44 = vld [vmem:[%s8397_s5 + $0x48] sm:$0xff]  }
 0x47c   : > { %v3141_v59 = vsel %vm3014_vm6, %v3140_v13, %v3136_v24  ;;  %v3368_v16 = vsel %vm3163_vm3, %v3354_v33, %v3367_v48  ;;  %v6120_v13 = vld [vmem:[%s8397_s5 + $0x58] sm:$0xff]  }
 0x47d   : > { %v4231_v49 = vpop.permute.xlu1 %4230  ;;  %v2838_v35 = vpop.xlane.xlu0 %2837  ;;  %v3170_v53 = vsel %vm3161_vm2, %v3141_v59, %v3169_v1  ;;  %3588 = vmatpush2.bf16.msra.mxu1 %v6115_v6  ;;  %v6126_v1 = vld [vmem:[%s8397_s5 + $0x40] sm:$0xff]  }
 0x47e   : > { %4236 = vst.msk [vmem:[#allocation5 + $0x3] sm:$0xff] %vm3371_vm7, %v4231_v49  ;;  %v3149_v41 = vrot.slane %v2838_v35, %v7744_v46  ;;  %v6112_v46 = vld [vmem:[%s8397_s5 + $0x8] sm:$0xff]   ;;  %4419 = vmatprep.subr.bf16.mxu1 %v6211_v28 }
 0x47f   : > { %3882 = vmatpush1.bf16.msra.mxu0 %v6112_v46 }
 0x480   : > { %v3150_v30 = vsel %vm3014_vm6, %v3149_v41, %v3145_v15  ;;  %3883 = vmatprep.subr.bf16.mxu0 %v6211_v28 }
 0x481   : > { %v3171_v27 = vsel %vm3163_vm3, %v3150_v30, %v3170_v53  ;;  %v3681_v58 = vpop.permute.xlu1 %3680  ;;  %v4233_v36 = vpop.permute.xlu0 %4232 }
 0x482   : > { %3175 = vst.msk [vmem:[#allocation3 + $0xb] sm:$0xff] %vm336_vm0, %v3171_v27 }
 0x483   : > { %3686 = vst.msk [vmem:[#allocation4 + $0x3] sm:$0xff] %vm3371_vm7, %v3681_v58  ;;  %4237 = vst.msk [vmem:[#allocation5 + $0xb] sm:$0xff] %vm3371_vm7, %v4233_v36  ;;  %3884 = vmatpush1.bf16.msra.mxu0 %v6114_v12 }
 0x484   : > { %3373 = vst.msk [vmem:[#allocation3 + $0xb] sm:$0xff] %vm3371_vm7, %v3368_v16  ;;  %3889 = vmatprep.subr.bf16.mxu0 %v6211_v28 }
 0x485   : > { %v3683_v47 = vpop.permute.xlu1 %3682  ;;  %v4240_v55 = vld [vmem:[#allocation5 + $0x1] sm:$0xff] }
 0x486   : > { %3687 = vst.msk [vmem:[#allocation4 + $0xb] sm:$0xff] %vm3371_vm7, %v3683_v47  ;;  %v4242_v18 = vld [vmem:[#allocation5 + $0x2] sm:$0xff] }
 0x487   : > { %3890 = vmatpush2.bf16.msra.mxu0 %v6116_v26  ;;  %v4244_v8 = vld [vmem:[#allocation5 + $0x3] sm:$0xff] }
 0x488   : > { %3891 = vmatprep.subr.bf16.mxu0 %v6211_v28 }
 0x48a   : > { %v4241_v9 = vld [vmem:[#allocation5 + $0x9] sm:$0xff] }
 0x48b   : > { %v3384_v60 = vld [vmem:[#allocation3 + $0x5] sm:$0xff]  ;;  %v3385_v11 = vld [vmem:[#allocation3 + $0xd] sm:$0xff]  ;;  %v6040_v32 = vpack.i.bf16 %v4241_v9, %v4240_v55  ;;  %v4248_v39 = vld [vmem:[#allocation5 + $0x5] sm:$0xff]  ;;  %3892 = vmatpush2.bf16.msra.mxu0 %v6118_v62 }
 0x48c   : > { %v3377_v52 = vld [vmem:[#allocation3 + $0x9] sm:$0xff]  ;;  %v6020_v25 = vpack.i.bf16 %v3385_v11, %v3384_v60  ;;  %v4249_v50 = vld [vmem:[#allocation5 + $0xd] sm:$0xff]  ;;  %3893 = vmatprep.subr.bf16.mxu0 %v6211_v28 }
 0x48d   : > { %v6015_v0 = vpack.i.bf16 %v3377_v52, %v3376_v20  ;;  %v3386_v29 = vld [vmem:[#allocation3 + $0x6] sm:$0xff]  ;;  %v3387_v2 = vld [vmem:[#allocation3 + $0xe] sm:$0xff]  ;;  %v4243_v34 = vld [vmem:[#allocation5 + $0xa] sm:$0xff]  ;;  %v6045_v61 = vpack.i.bf16 %v4249_v50, %v4248_v39 }
 0x48e   : > { %v3379_v56 = vld [vmem:[#allocation3 + $0xa] sm:$0xff]  ;;  %6021 = vrot.lane.b32.xlu1 %v6020_v25, %s6209_s15  ;;  %v6030_v17 = vpack.i.bf16 %v3387_v2, %v3386_v29  ;;  %v6050_v21 = vpack.i.bf16 %v4243_v34, %v4242_v18  ;;  %v4250_v38 = vld [vmem:[#allocation5 + $0x6] sm:$0xff]  ;;  %v4251_v23 = vld [vmem:[#allocation5 + $0xe] sm:$0xff] }
 0x48f   : > { %6016 = vrot.lane.b32.xlu0 %v6015_v0, %s6209_s15  ;;  %v6025_v19 = vpack.i.bf16 %v3379_v56, %v3378_v57  ;;  %v3381_v3 = vld [vmem:[#allocation3 + $0xb] sm:$0xff]  ;;  %v4245_v4 = vld [vmem:[#allocation5 + $0xb] sm:$0xff]  ;;  %v6055_v51 = vpack.i.bf16 %v4251_v23, %v4250_v38  ;;  %3894 = vmatpush2.bf16.msra.mxu0 %v6120_v13  ;;  %v3695_v48 = vld [vmem:[#allocation4 + $0xb] sm:$0xff] }
 0x490   : > { %v6035_v10 = vpack.i.bf16 %v3381_v3, %v3380_v63  ;;  %v6060_v42 = vpack.i.bf16 %v4245_v4, %v4244_v8  ;;  %v3698_v24 = vld [vmem:[#allocation4 + $0x5] sm:$0xff]  ;;  %v3699_v5 = vld [vmem:[#allocation4 + $0xd] sm:$0xff]  ;;  %3895 = vmatprep.subr.bf16.mxu0 %v6211_v28  ;;  %v4246_v13 = vld [vmem:[#allocation5 + $0x4] sm:$0xff] }
 0x491   : > { %v3691_v22 = vld [vmem:[#allocation4 + $0x9] sm:$0xff]  ;;  %v3690_v43 = vld [vmem:[#allocation4 + $0x1] sm:$0xff]  ;;  %v6070_v37 = vpack.i.bf16 %v3699_v5, %v3698_v24  ;;  %v3383_v47 = vld [vmem:[#allocation3 + $0xc] sm:$0xff] }
 0x492   : > { %6031 = vrot.lane.b32.xlu1 %v6030_v17, %s6212_s12  ;;  %v6065_v59 = vpack.i.bf16 %v3691_v22, %v3690_v43  ;;  %v3700_v49 = vld [vmem:[#allocation4 + $0x6] sm:$0xff]  ;;  %v3701_v35 = vld [vmem:[#allocation4 + $0xe] sm:$0xff] }
 0x493   : > { %6026 = vrot.lane.b32.xlu0 %v6025_v19, %s6212_s12  ;;  %v3693_v14 = vld [vmem:[#allocation4 + $0xa] sm:$0xff]  ;;  %3896 = vmatpush2.bf16.msra.mxu0 %v6122_v45  ;;  %v3692_v15 = vld [vmem:[#allocation4 + $0x2] sm:$0xff]  ;;  %v6080_v41 = vpack.i.bf16 %v3701_v35, %v3700_v49 }
 0x494   : > { %3897 = vmatprep.subr.bf16.mxu0 %v6211_v28  ;;  %v6075_v7 = vpack.i.bf16 %v3693_v14, %v3692_v15  ;;  %v3694_v53 = vld [vmem:[#allocation4 + $0x3] sm:$0xff]  ;;  %v3382_v46 = vld [vmem:[#allocation3 + $0x4] sm:$0xff] }
 0x495   : > { %v6085_v30 = vpack.i.bf16 %v3695_v48, %v3694_v53  ;;  %v3374_v56 = vld [vmem:[#allocation3] sm:$0xff]  ;;  %v3375_v57 = vld [vmem:[#allocation3 + $0x8] sm:$0xff]  ;;  %v6121_v43 = vld [vmem:[%s8398_s6 + $0x28] sm:$0xff]  }
 0x496   : > { %6041 = vrot.lane.b32.xlu1 %v6040_v32, %s6209_s15  ;;  %v6117_v50 = vld [vmem:[%s8398_s6 + $0x38] sm:$0xff]   ;;  %v6119_v38 = vld [vmem:[%s8398_s6 + $0x30] sm:$0xff]  }
 0x497   : > { %6036 = vrot.lane.b32.xlu0 %v6035_v10, %s6213_s20  ;;  %3898 = vmatpush2.bf16.msra.mxu0 %v6124_v44  ;;  %v4247_v8 = vld [vmem:[#allocation5 + $0xc] sm:$0xff]  ;;  %v6123_v44 = vld [vmem:[%s8398_s6 + $0x20] sm:$0xff]   ;;  %v3697_v48 = vld [vmem:[#allocation4 + $0xc] sm:$0xff] }
 0x498   : > { %3899 = vmatprep.subr.bf16.mxu0 %v6211_v28 }
 0x49a   : > { %6051 = vrot.lane.b32.xlu1 %v6050_v21, %s6212_s12 }
 0x49b   : > { %6046 = vrot.lane.b32.xlu0 %v6045_v61, %s6209_s15  ;;  %3900 = vmatpush2.bf16.msra.mxu0 %v6126_v1 }
 0x49e   : > { %6061 = vrot.lane.b32.xlu1 %v6060_v42, %s6213_s20 }
 0x49f   : > { %6056 = vrot.lane.b32.xlu0 %v6055_v51, %s6212_s12 }
 0x4a2   : > { %6071 = vrot.lane.b32.xlu1 %v6070_v37, %s6209_s15 }
 0x4a3   : > { %6066 = vrot.lane.b32.xlu0 %v6065_v59, %s6209_s15 }
 0x4a6   : > { %6081 = vrot.lane.b32.xlu1 %v6080_v41, %s6212_s12 }
 0x4a7   : > { %6076 = vrot.lane.b32.xlu0 %v6075_v7, %s6212_s12  ;;  %v3696_v7 = vld [vmem:[#allocation4 + $0x4] sm:$0xff] }
 0x4ab   : > { %6086 = vrot.lane.b32.xlu0 %v6085_v30, %s6213_s20 }
 0x500   : > { %v6022_v33 = vpop.permute.xlu1 %6021 }
 0x501   : > { %v6017_v27 = vpop.permute.xlu0 %6016  ;;  %v6024_v58 = vunpack.i.h.bf16 %v6022_v33  ;;  %v6023_v36 = vunpack.i.l.bf16 %v6022_v33 }
 0x502   : > { %v6019_v54 = vunpack.i.h.bf16 %v6017_v27  ;;  %v6018_v12 = vunpack.i.l.bf16 %v6017_v27 }
 0x503   : > { %v3436_v11 = vsel %vm2199_vm10, %v3382_v46, %v6023_v36  ;;  %v3437_v52 = vsel %vm2199_vm10, %v3383_v47, %v6024_v58  ;;  %v6125_v47 = vld [vmem:[%s8398_s6 + $0x18] sm:$0xff]  }
 0x504   : > { %v6032_v16 = vpop.permute.xlu1 %6031  ;;  %v3429_v9 = vsel %vm2199_vm10, %v3375_v57, %v6019_v54  ;;  %v3428_v63 = vsel %vm2199_vm10, %v3374_v56, %v6018_v12  ;;  %v3688_v54 = vld [vmem:[#allocation4] sm:$0xff]  ;;  %v3689_v12 = vld [vmem:[#allocation4 + $0x8] sm:$0xff] }
 0x505   : > { %v6027_v40 = vpop.permute.xlu0 %6026  ;;  %v6034_v20 = vunpack.i.h.bf16 %v6032_v16  ;;  %v6033_v60 = vunpack.i.l.bf16 %v6032_v16 }
 0x506   : > { %v6029_v25 = vunpack.i.h.bf16 %v6027_v40  ;;  %v6028_v0 = vunpack.i.l.bf16 %v6027_v40 }
 0x507   : > { %v3438_v29 = vsel %vm3430_vm8, %v3436_v11, %v6033_v60  ;;  %v3439_v2 = vsel %vm3430_vm8, %v3437_v52, %v6034_v20 }
 0x508   : > { %v3441_v17 = vpack.c.bf16 %v3439_v2, %v3438_v29  ;;  %v8063_v3 = vpop.permute.xlu1 %6041  ;;  %v3431_v26 = vsel %vm3430_vm8, %v3428_v63, %v6028_v0  ;;  %v3432_v10 = vsel %vm3430_vm8, %v3429_v9, %v6029_v25  ;;  %v6128_v9 = vld [vmem:[%s8398_s6 + $0x8] sm:$0xff]   ;;  %v6129_v63 = vld [vmem:[%s8398_s6] sm:$0xff]  }
 0x509   : > { %v6037_v19 = vpop.permute.xlu0 %6036 }
 0x50a   : > { %v6039_v55 = vunpack.i.h.bf16 %v6037_v19  ;;  %v6038_v6 = vunpack.i.l.bf16 %v6037_v19  ;;  %5152 = vmatprep.mubr.msk.bf16.mxu1 %vm3433_vm9, %v3441_v17  ;;  %v6127_v17 = vld [vmem:[%s8398_s6 + $0x10] sm:$0xff]  }
 0x50c   : > { %v3434_v32 = vsel %vm3433_vm9, %v3431_v26, %v6038_v6  ;;  %v3435_v39 = vsel %vm3433_vm9, %v3432_v10, %v6039_v55  ;;  %v8075_v18 = vpop.permute.xlu1 %6051  ;;  %v6130_v55 = vld [vmem:[%s8398_s6 + $0x68] sm:$0xff]   ;;  %v6131_v6 = vld [vmem:[%s8398_s6 + $0x60] sm:$0xff]   ;;  %v6132_v26 = vld [vmem:[%s8398_s6 + $0x58] sm:$0xff]  }
 0x50d   : > { %v3440_v34 = vpack.c.bf16 %v3435_v39, %v3434_v32  ;;  %v6047_v62 = vpop.permute.xlu0 %6046  ;;  %v6133_v10 = vld [vmem:[%s8398_s6 + $0x50] sm:$0xff]   ;;  %v6044_v32 = vunpack.i.h.bf16 %v8063_v3  ;;  %v6043_v39 = vunpack.i.l.bf16 %v8063_v3 }
 0x50e   : > { %v6049_v61 = vunpack.i.h.bf16 %v6047_v62  ;;  %v6048_v21 = vunpack.i.l.bf16 %v6047_v62  ;;  %v6053_v62 = vunpack.i.l.bf16 %v8075_v18 }
 0x50f   : > { %3590 = vmatmul.mubr.bf16.vlgmr.msra.gmra.mxu1 %v3440_v34  ;;  %v6054_v34 = vunpack.i.h.bf16 %v8075_v18 }
 0x510   : > { %4420 = vmatpush1.bf16.msra.mxu1 %v6117_v50  ;;  %v8080_v4 = vpop.permute.xlu1 %6061  ;;  %v4298_v24 = vsel %vm2199_vm10, %v4246_v13, %v6048_v21  ;;  %v4299_v5 = vsel %vm2199_vm10, %v4247_v8, %v6049_v61  ;;  %v6134_v50 = vld [vmem:[%s8398_s6 + $0x48] sm:$0xff]   ;;  %v6135_v8 = vld [vmem:[%s8398_s6 + $0x40] sm:$0xff]  }
 0x511   : > { %v6057_v23 = vpop.permute.xlu0 %6056  ;;  %4421 = vmatprep.subr.bf16.mxu1 %v6211_v28  ;;  %v6064_v61 = vunpack.i.h.bf16 %v8080_v4  ;;  %v6063_v21 = vunpack.i.l.bf16 %v8080_v4 }
 0x512   : > { %v6059_v51 = vunpack.i.h.bf16 %v6057_v23  ;;  %v6058_v42 = vunpack.i.l.bf16 %v6057_v23  ;;  %v4239_v23 = vld [vmem:[#allocation5 + $0x8] sm:$0xff] }
 0x513   : > { %v4293_v3 = vsel %vm2199_vm10, %v4239_v23, %v6044_v32 }
 0x514   : > { %v4300_v22 = vsel %vm3430_vm8, %v4298_v24, %v6058_v42  ;;  %v4301_v45 = vsel %vm3430_vm8, %v4299_v5, %v6059_v51  ;;  %4422 = vmatpush1.bf16.msra.mxu1 %v6119_v38  ;;  %v6072_v59 = vpop.permute.xlu1 %6071  ;;  %v4238_v38 = vld [vmem:[#allocation5] sm:$0xff]  ;;  %v4295_v18 = vsel %vm3430_vm8, %v4293_v3, %v6054_v34  ;;  %v6214_v3 = vmov 1966171168  }
 0x515   : > { %v4303_v37 = vpack.c.bf16 %v4301_v45, %v4300_v22  ;;  %v6067_v49 = vpop.permute.xlu0 %6066  ;;  %4423 = vmatprep.subr.bf16.mxu1 %v6211_v28  ;;  %v6074_v35 = vunpack.i.h.bf16 %v6072_v59  ;;  %v6073_v14 = vunpack.i.l.bf16 %v6072_v59  ;;  %v4292_v13 = vsel %vm2199_vm10, %v4238_v38, %v6043_v39 }
 0x516   : > { %v6069_v1 = vunpack.i.h.bf16 %v6067_v49  ;;  %v6068_v53 = vunpack.i.l.bf16 %v6067_v49  ;;  %v4294_v51 = vsel %vm3430_vm8, %v4292_v13, %v6053_v62  ;;  %v4297_v4 = vsel %vm3433_vm9, %v4295_v18, %v6064_v61 }
 0x517   : > { %5186 = vmatprep.mubr.msk.bf16.mxu1 %vm3433_vm9, %v4303_v37  ;;  %v3748_v27 = vsel %vm2199_vm10, %v3696_v7, %v6073_v14  ;;  %v3749_v58 = vsel %vm2199_vm10, %v3697_v48, %v6074_v35  ;;  %v4296_v42 = vsel %vm3433_vm9, %v4294_v51, %v6063_v21 }
 0x518   : > { %4424 = vmatpush1.bf16.msra.mxu1 %v6121_v43  ;;  %v6082_v15 = vpop.permute.xlu1 %6081  ;;  %v3742_v11 = vsel %vm2199_vm10, %v3688_v54, %v6068_v53  ;;  %v3743_v52 = vsel %vm2199_vm10, %v3689_v12, %v6069_v1  ;;  %v4302_v24 = vpack.c.bf16 %v4297_v4, %v4296_v42  ;;  %v4487_v53 = vsub.s32 1, %v7717_v31 }
 0x519   : > { %v6077_v41 = vpop.permute.xlu0 %6076  ;;  %4425 = vmatprep.subr.bf16.mxu1 %v6211_v28  ;;  %v6084_v30 = vunpack.i.h.bf16 %v6082_v15  ;;  %v6083_v33 = vunpack.i.l.bf16 %v6082_v15  ;;  %v4531_v54 = vsub.s32 5, %v7717_v31 }
 0x51a   : > { %v6079_v36 = vunpack.i.h.bf16 %v6077_v41  ;;  %v6078_v16 = vunpack.i.l.bf16 %v6077_v41  ;;  %v8164_v41 = vsub.s32 0, %v7717_v31 }
 0x51b   : > { %v3750_v40 = vsel %vm3430_vm8, %v3748_v27, %v6083_v33  ;;  %v3751_v46 = vsel %vm3430_vm8, %v3749_v58, %v6084_v30  ;;  %v4498_v33 = vsub.s32 2, %v7717_v31 }
 0x51c   : > { %4426 = vmatpush1.bf16.msra.mxu1 %v6123_v44  ;;  %v3753_v20 = vpack.c.bf16 %v3751_v46, %v3750_v40  ;;  %v3744_v29 = vsel %vm3430_vm8, %v3742_v11, %v6078_v16  ;;  %v3745_v2 = vsel %vm3430_vm8, %v3743_v52, %v6079_v36  ;;  %v4509_v16 = vsub.s32 3, %v7717_v31 }
 0x51d   : > { %v6087_v60 = vpop.permute.xlu0 %6086  ;;  %4427 = vmatprep.subr.bf16.mxu1 %v6211_v28  ;;  %v4520_v46 = vsub.s32 4, %v7717_v31 }
 0x51e   : > { %v6089_v25 = vunpack.i.h.bf16 %v6087_v60  ;;  %v6088_v0 = vunpack.i.l.bf16 %v6087_v60  ;;  %5169 = vmatprep.mubr.msk.bf16.mxu0 %vm3433_vm9, %v3753_v20  ;;  %v4542_v20 = vsub.s32 6, %v7717_v31 }
 0x520   : > { %v3746_v56 = vsel %vm3433_vm9, %v3744_v29, %v6088_v0  ;;  %v3747_v57 = vsel %vm3433_vm9, %v3745_v2, %v6089_v25  ;;  %4428 = vmatpush1.bf16.msra.mxu1 %v6125_v47  ;;  %v4553_v25 = vsub.s32 7, %v7717_v31 }
 0x521   : > { %v3752_v19 = vpack.c.bf16 %v3747_v57, %v3746_v56  ;;  %4429 = vmatprep.subr.bf16.mxu1 %v6211_v28 }
 0x523   : > { %3902 = vmatmul.mubr.bf16.vlgmr.msra.gmra.mxu0 %v3752_v19 }
 0x524   : > { %4430 = vmatpush1.bf16.msra.mxu1 %v6127_v17 }
 0x525   : > { %4431 = vmatprep.subr.bf16.mxu1 %v6211_v28 }
 0x528   : > { %4432 = vmatpush1.bf16.msra.mxu1 %v6128_v9 }
 0x529   : > { %4433 = vmatprep.subr.bf16.mxu1 %v6211_v28 }
 0x52c   : > { %4434 = vmatpush1.bf16.msra.mxu1 %v6129_v63 }
 0x52d   : > { %4439 = vmatprep.subr.bf16.mxu1 %v6211_v28 }
 0x530   : > { %4440 = vmatpush2.bf16.msra.mxu1 %v6130_v55 }
 0x531   : > { %4441 = vmatprep.subr.bf16.mxu1 %v6211_v28 }
 0x534   : > { %4442 = vmatpush2.bf16.msra.mxu1 %v6131_v6 }
 0x535   : > { %4443 = vmatprep.subr.bf16.mxu1 %v6211_v28 }
 0x538   : > { %4444 = vmatpush2.bf16.msra.mxu1 %v6132_v26 }
 0x539   : > { %4445 = vmatprep.subr.bf16.mxu1 %v6211_v28 }
 0x53c   : > { %4446 = vmatpush2.bf16.msra.mxu1 %v6133_v10 }
 0x53d   : > { %4447 = vmatprep.subr.bf16.mxu1 %v6211_v28 }
 0x540   : > { %4448 = vmatpush2.bf16.msra.mxu1 %v6134_v50 }
 0x541   : > { %4449 = vmatprep.subr.bf16.mxu1 %v6211_v28 }
 0x544   : > { %4450 = vmatpush2.bf16.msra.mxu1 %v6135_v8  ;;  %v4686_v8 = vunpack.c.l.s4 %v6214_v3 }
 0x546   : > { %v4687_v51 = vunpack.c.0.s8 %v4686_v8 }
 0x547   : > { %4452 = vmatmul.mubr.bf16.vlgmr.msra.gmra.mxu1 %v4302_v24 }
 0x548   : > { %v8178_v4 = vsub.s32 %v4687_v51, %v7717_v31 }
 0x5cf   : > { %v3591_v5 = vpop.f32.mrf.mxu1 }
 0x5d0   : > { %v5153_v22 = vmul.f32 -1.442695, %v3591_v5 }
 0x5d1   : > { %v3593_v45 = vpop.f32.mrf.mxu1 }
 0x5d2   : > { %6136 = vpow2.f32 %v5153_v22 }
 0x5d3   : > { %v3594_v43 = vpop.f32.mrf.mxu1 }
 0x5d4   : > { %v5154_v28 = vmul.f32 -1.442695, %v3594_v43 }
 0x5d5   : > { %v3596_v37 = vpop.f32.mrf.mxu1 }
 0x5df   : > { %v6137_v59 = vpop.eup %6136 }
 0x5e0   : > { %v3604_v49 = vadd.f32 1.0, %v6137_v59 }
 0x5e2   : > { %6138 = vrcp.f32 %v3604_v49 }
 0x5e3   : > { %v8159_v35 = vpop.f32.mrf.mxu0  ;;  %6140 = vpow2.f32 %v5154_v28 }
 0x5e4   : > { %v5170_v39 = vmul.f32 -1.442695, %v8159_v35 }
 0x5e5   : > { %v3905_v14 = vpop.f32.mrf.mxu0 }
 0x5e7   : > { %v8161_v44 = vpop.f32.mrf.mxu0 }
 0x5e8   : > { %v5171_v50 = vmul.f32 -1.442695, %v8161_v44 }
 0x5e9   : > { %v3908_v15 = vpop.f32.mrf.mxu0 }
 0x5ef   : > { %v6139_v7 = vpop.eup %6138 }
 0x5f0   : > { %v3610_v48 = vmul.f32 0.33333334, %v6139_v7  ;;  %v6141_v27 = vpop.eup %6140 }
 0x5f1   : > { %v3605_v58 = vadd.f32 1.0, %v6141_v27 }
 0x5f2   : > { %v4477_v1 = vrot.slane %v3610_v48, %v8164_v41  ;;  %v4488_v30 = vrot.slane %v3610_v48, %v4487_v53  ;;  %v4499_v36 = vrot.slane %v3610_v48, %v4498_v33  ;;  %v4510_v40 = vrot.slane %v3610_v48, %v4509_v16 }
 0x5f3   : > { %6142 = vrcp.f32 %v3605_v58  ;;  %v4521_v47 = vrot.slane %v3610_v48, %v4520_v46  ;;  %v4532_v12 = vrot.slane %v3610_v48, %v4531_v54  ;;  %v4543_v52 = vrot.slane %v3610_v48, %v4542_v20  ;;  %v8478_v58 = vld [vmem:[#allocation7_spill] sm:$0xff] }
 0x5f4   : > { %4479 = vbcast.lane.b32.xlu1 %v4477_v1, 256  ;;  %4483 = vbcast.lane.b32.xlu0 %v4477_v1, 264  ;;  %v4554_v57 = vrot.slane %v3610_v48, %v4553_v25 }
 0x5f8   : > { %4490 = vbcast.lane.b32.xlu1 %v4488_v30, 256  ;;  %4494 = vbcast.lane.b32.xlu0 %v4488_v30, 264 }
 0x5fc   : > { %4501 = vbcast.lane.b32.xlu1 %v4499_v36, 256  ;;  %4505 = vbcast.lane.b32.xlu0 %v4499_v36, 264 }
 0x600   : > { %4512 = vbcast.lane.b32.xlu1 %v4510_v40, 256  ;;  %4516 = vbcast.lane.b32.xlu0 %v4510_v40, 264  ;;  %v6143_v0 = vpop.eup %6142 }
 0x601   : > { %v3611_v56 = vmul.f32 0.33333334, %v6143_v0 }
 0x603   : > { %v4565_v17 = vrot.slane %v3611_v56, %v8164_v41  ;;  %v4576_v19 = vrot.slane %v3611_v56, %v4487_v53  ;;  %v4587_v9 = vrot.slane %v3611_v56, %v4498_v33  ;;  %v4598_v63 = vrot.slane %v3611_v56, %v4509_v16  ;;  %v8479_v16 = vld [vmem:[#allocation9_spill] sm:$0xff] }
 0x604   : > { %4523 = vbcast.lane.b32.xlu1 %v4521_v47, 256  ;;  %4527 = vbcast.lane.b32.xlu0 %v4521_v47, 264  ;;  %v4609_v55 = vrot.slane %v3611_v56, %v4520_v46  ;;  %v4620_v6 = vrot.slane %v3611_v56, %v4531_v54  ;;  %v4631_v26 = vrot.slane %v3611_v56, %v4542_v20 }
 0x605   : > { %v4642_v10 = vrot.slane %v3611_v56, %v4553_v25 }
 0x607   : > { %v4453_v60 = vpop.f32.mrf.mxu1 }
 0x608   : > { %4534 = vbcast.lane.b32.xlu1 %v4532_v12, 256  ;;  %4538 = vbcast.lane.b32.xlu0 %v4532_v12, 264  ;;  %v5187_v32 = vmul.f32 -1.442695, %v4453_v60  ;;  %v6162_v12 = vld [vmem:[%s6274_s8] sm:$0xff]  ;;  %v6163_v60 = vld [vmem:[%s6274_s8 + $0x8] sm:$0xff] }
 0x609   : > { %v4455_v11 = vpop.f32.mrf.mxu1 }
 0x60a   : > { %6144 = vpow2.f32 %v5187_v32  ;;  %v6164_v32 = vld [vmem:[%s6274_s8 + $0x10] sm:$0xff] }
 0x60b   : > { %v4456_v29 = vpop.f32.mrf.mxu1  ;;  %6146 = vpow2.f32 %v5170_v39 }
 0x60c   : > { %4545 = vbcast.lane.b32.xlu1 %v4543_v52, 256  ;;  %4549 = vbcast.lane.b32.xlu0 %v4543_v52, 264  ;;  %6148 = vpow2.f32 %v5171_v50  ;;  %v5188_v23 = vmul.f32 -1.442695, %v4456_v29  ;;  %v6165_v50 = vld [vmem:[%s6274_s8 + $0x18] sm:$0xff] }
 0x60d   : > { %v4458_v2 = vpop.f32.mrf.mxu1 }
 0x610   : > { %4556 = vbcast.lane.b32.xlu1 %v4554_v57, 256  ;;  %4560 = vbcast.lane.b32.xlu0 %v4554_v57, 264 }
 0x614   : > { %4567 = vbcast.lane.b32.xlu1 %v4565_v17, 256  ;;  %4571 = vbcast.lane.b32.xlu0 %v4565_v17, 264 }
 0x617   : > { %v6145_v34 = vpop.eup %6144 }
 0x618   : > { %4578 = vbcast.lane.b32.xlu1 %v4576_v19, 256  ;;  %4582 = vbcast.lane.b32.xlu0 %v4576_v19, 264  ;;  %v4466_v62 = vadd.f32 1.0, %v6145_v34  ;;  %v6147_v61 = vpop.eup %6146  ;;  %v8480_v19 = vld [vmem:[#allocation6_spill] sm:$0xff] }
 0x619   : > { %v6149_v21 = vpop.eup %6148  ;;  %v3916_v38 = vadd.f32 1.0, %v6147_v61 }
 0x61a   : > { %6150 = vrcp.f32 %v4466_v62  ;;  %v3917_v13 = vadd.f32 1.0, %v6149_v21 }
 0x61b   : > { %6152 = vrcp.f32 %v3916_v38 }
 0x61c   : > { %4589 = vbcast.lane.b32.xlu1 %v4587_v9, 256  ;;  %4593 = vbcast.lane.b32.xlu0 %v4587_v9, 264  ;;  %6154 = vpow2.f32 %v5188_v23 }
 0x61d   : > { %6156 = vrcp.f32 %v3917_v13 }
 0x620   : > { %4600 = vbcast.lane.b32.xlu1 %v4598_v63, 256  ;;  %4604 = vbcast.lane.b32.xlu0 %v4598_v63, 264  ;;  %v8481_v63 = vld [vmem:[#allocation8_spill] sm:$0xff] }
 0x624   : > { %4611 = vbcast.lane.b32.xlu1 %v4609_v55, 256  ;;  %4615 = vbcast.lane.b32.xlu0 %v4609_v55, 264 }
 0x627   : > { %v6151_v18 = vpop.eup %6150 }
 0x628   : > { %4622 = vbcast.lane.b32.xlu1 %v4620_v6, 256  ;;  %4626 = vbcast.lane.b32.xlu0 %v4620_v6, 264  ;;  %v4472_v42 = vmul.f32 0.33333334, %v6151_v18  ;;  %v6153_v5 = vpop.eup %6152 }
 0x629   : > { %v6155_v22 = vpop.eup %6154  ;;  %v8182_v49 = vmul.f32 0.33333334, %v6153_v5  ;;  %v8483_v5 = vld [vmem:[#allocation13_spill] sm:$0xff] }
 0x62a   : > { %v4691_v24 = vrot.slane %v4472_v42, %v8178_v4  ;;  %v6157_v45 = vpop.eup %6156  ;;  %v4467_v59 = vadd.f32 1.0, %v6155_v22  ;;  %v4684_v27 = vcombine.high %v4472_v42, %v4472_v42  ;;  %v8482_v42 = vld [vmem:[#allocation11_spill] sm:$0xff] }
 0x62b   : > { %v8184_v35 = vmul.f32 0.33333334, %v6157_v45 }
 0x62c   : > { %4633 = vbcast.lane.b32.xlu1 %v4631_v26, 256  ;;  %4637 = vbcast.lane.b32.xlu0 %v4631_v26, 264  ;;  %v4699_v43 = vcombine.high %v4691_v24, %v4691_v24  ;;  %v4707_v37 = vrot.slane %v4691_v24, %v8178_v4  ;;  %6158 = vrcp.f32 %v4467_v59  ;;  %v4698_v56 = vrot.slane %v4684_v27, %v8178_v4 }
 0x62e   : > { %v4721_v44 = vrot.slane %v4699_v43, %v8178_v4  ;;  %v4785_v31 = vrot.slane %v4707_v37, %v8164_v41  ;;  %v4729_v54 = vcombine.high %v4707_v37, %v4707_v37  ;;  %v4714_v13 = vrot.slane %v4698_v56, %v8178_v4 }
 0x62f   : > { %v4700_v45 = vcombine.high %v4698_v56, %v4698_v56  ;;  %v8486_v56 = vld [vmem:[#allocation15_spill] sm:$0xff] }
 0x630   : > { %4644 = vbcast.lane.b32.xlu1 %v4642_v10, 256  ;;  %4648 = vbcast.lane.b32.xlu0 %v4642_v10, 264  ;;  %v4789_v53 = vrot.slane %v4721_v44, %v8164_v41  ;;  %v4731_v2 = vcombine.high %v4721_v44, %v4721_v44  ;;  %v4793_v6 = vrot.slane %v4729_v54, %v8164_v41  ;;  %v6167_v44 = vld [vmem:[%s6274_s8 + $0x28] sm:$0xff] }
 0x632   : > { %v4797_v21 = vrot.slane %v4731_v2, %v8164_v41 }
 0x639   : > { %v6159_v43 = vpop.eup %6158 }
 0x666   : > { %v4480_v14 = vpop.permute.xlu1 %4479  ;;  %v4484_v28 = vpop.permute.xlu0 %4483 }
 0x667   : > { %v4650_v15 = vadd.f32 %v4480_v14, %v8182_v49  ;;  %v4651_v7 = vadd.f32 %v4484_v28, %v8184_v35  ;;  %v6166_v14 = vld [vmem:[%s6274_s8 + $0x20] sm:$0xff] }
 0x669   : > { %v4862_v48 = vadd.f32 %v4785_v31, %v4650_v15  ;;  %v4863_v1 = vadd.f32 %v4785_v31, %v4651_v7  ;;  %v4801_v15 = vrot.slane %v4714_v13, %v8164_v41 }
 0x66a   : > { %v4491_v30 = vpop.permute.xlu1 %4490  ;;  %v4495_v33 = vpop.permute.xlu0 %4494 }
 0x66b   : > { %v4894_v36 = vmul.f32 %v4862_v48, %v8478_v58  ;;  %v4895_v40 = vmul.f32 %v4863_v1, %v8479_v16  ;;  %v4652_v46 = vadd.f32 %v4491_v30, %v8182_v49  ;;  %v4653_v47 = vadd.f32 %v4495_v33, %v8184_v35  ;;  %v8484_v1 = vld [vmem:[#allocation10_spill] sm:$0xff]  ;;  %v8485_v30 = vld [vmem:[#allocation12_spill] sm:$0xff] }
 0x66d   : > { %v4926_v20 = vadd.f32 %v6162_v12, %v4894_v36  ;;  %v4927_v11 = vadd.f32 %v6163_v60, %v4895_v40  ;;  %v4864_v52 = vadd.f32 %v4789_v53, %v4652_v46  ;;  %v4865_v25 = vadd.f32 %v4789_v53, %v4653_v47  ;;  %v6168_v47 = vld [vmem:[%s6274_s8 + $0x30] sm:$0xff]  ;;  %v6169_v12 = vld [vmem:[%s6274_s8 + $0x38] sm:$0xff] }
 0x66e   : > { %v4502_v0 = vpop.permute.xlu1 %4501  ;;  %v4506_v29 = vpop.permute.xlu0 %4505  ;;  %v8233_v36 = vmul.f32 0.33333334, %v6159_v43  ;;  %v4728_v46 = vrot.slane %v4700_v45, %v8178_v4  ;;  %v6172_v45 = vld [vmem:[%s6274_s8 + $0x50] sm:$0xff] }
 0x66f   : > { %v4958_v57 = vmax.f32 %v4926_v20, 0.0  ;;  %v4959_v17 = vmax.f32 %v4927_v11, 0.0  ;;  %v4896_v9 = vmul.f32 %v8480_v19, %v4864_v52  ;;  %v4897_v55 = vmul.f32 %v8481_v63, %v4865_v25 }
 0x670   : > { %v4654_v26 = vadd.f32 %v4502_v0, %v8182_v49  ;;  %v4655_v10 = vadd.f32 %v4506_v29, %v8184_v35  ;;  %v4730_v0 = vcombine.high %v4714_v13, %v4714_v13 }
 0x671   : > { %4990 = vst.msk [vmem:[%s8202_s21] sm:$0xff] %vm336_vm0, %v4958_v57  ;;  %4991 = vst.msk [vmem:[%s8202_s21 + $0x8] sm:$0xff] %vm336_vm0, %v4959_v17  ;;  %v4928_v39 = vadd.f32 %v6164_v32, %v4896_v9  ;;  %v4929_v34 = vadd.f32 %v6165_v50, %v4897_v55  ;;  %v8487_v17 = vld [vmem:[#allocation17_spill] sm:$0xff]  ;;  %v4805_v9 = vrot.slane %v4728_v46, %v8164_v41 }
 0x672   : > { %v4866_v62 = vadd.f32 %v4793_v6, %v4654_v26  ;;  %v4867_v61 = vadd.f32 %v4793_v6, %v4655_v10  ;;  %v4513_v38 = vpop.permute.xlu1 %4512  ;;  %v4517_v23 = vpop.permute.xlu0 %4516  ;;  %v6170_v6 = vld [vmem:[%s6274_s8 + $0x40] sm:$0xff]  ;;  %v6171_v10 = vld [vmem:[%s6274_s8 + $0x48] sm:$0xff] }
 0x673   : > { %v4960_v3 = vmax.f32 %v4928_v39, 0.0  ;;  %v4961_v8 = vmax.f32 %v4929_v34, 0.0  ;;  %v4656_v51 = vadd.f32 %v4513_v38, %v8182_v49  ;;  %v4657_v18 = vadd.f32 %v4517_v23, %v8184_v35 }
 0x674   : > { %v4898_v24 = vmul.f32 %v4866_v62, %v8482_v42  ;;  %v4899_v22 = vmul.f32 %v4867_v61, %v8483_v5  ;;  %v4740_v39 = vrot.slane %v8233_v36, %v8178_v4  ;;  %v4809_v62 = vrot.slane %v4730_v0, %v8164_v41  ;;  %v8489_v42 = vld [vmem:[#allocation16_spill] sm:$0xff]  ;;  %v8492_v0 = vld [vmem:[#allocation18_spill] sm:$0xff] }
 0x675   : > { %4992 = vst.msk [vmem:[%s8202_s21 + $0x10] sm:$0xff] %vm336_vm0, %v4960_v3  ;;  %4993 = vst.msk [vmem:[%s8202_s21 + $0x18] sm:$0xff] %vm336_vm0, %v4961_v8  ;;  %v4868_v37 = vadd.f32 %v4797_v21, %v4656_v51  ;;  %v4869_v59 = vadd.f32 %v4797_v21, %v4657_v18  ;;  %v4732_v38 = vcombine.high %v4728_v46, %v4728_v46  ;;  %v8488_v51 = vld [vmem:[#allocation14_spill] sm:$0xff]  ;;  %v6175_v46 = vld [vmem:[%s6274_s8 + $0x68] sm:$0xff] }
 0x676   : > { %v4930_v28 = vadd.f32 %v6166_v14, %v4898_v24  ;;  %v4931_v31 = vadd.f32 %v6167_v44, %v4899_v22  ;;  %v4524_v7 = vpop.permute.xlu1 %4523  ;;  %v4528_v48 = vpop.permute.xlu0 %4527 }
 0x677   : > { %v4900_v53 = vmul.f32 %v8484_v1, %v4868_v37  ;;  %v4901_v33 = vmul.f32 %v8485_v30, %v4869_v59  ;;  %v4658_v27 = vadd.f32 %v4524_v7, %v8182_v49  ;;  %v4659_v58 = vadd.f32 %v4528_v48, %v8184_v35  ;;  %v6173_v37 = vld [vmem:[%s6274_s8 + $0x58] sm:$0xff]  ;;  %v8491_v48 = vld [vmem:[#allocation21_spill] sm:$0xff] }
 0x678   : > { %v4962_v16 = vmax.f32 %v4930_v28, 0.0  ;;  %v4963_v40 = vmax.f32 %v4931_v31, 0.0  ;;  %v4813_v14 = vrot.slane %v4732_v38, %v8164_v41  ;;  %v4748_v31 = vcombine.high %v4740_v39, %v4740_v39 }
 0x679   : > { %v4932_v54 = vadd.f32 %v6168_v47, %v4900_v53  ;;  %v4933_v20 = vadd.f32 %v6169_v12, %v4901_v33  ;;  %v4870_v60 = vadd.f32 %v4801_v15, %v4658_v27  ;;  %v4871_v11 = vadd.f32 %v4801_v15, %v4659_v58  ;;  %v8490_v15 = vld [vmem:[#allocation19_spill] sm:$0xff] }
 0x67a   : > { %4994 = vst.msk [vmem:[%s8202_s21 + $0x20] sm:$0xff] %vm336_vm0, %v4962_v16  ;;  %4995 = vst.msk [vmem:[%s8202_s21 + $0x28] sm:$0xff] %vm336_vm0, %v4963_v40  ;;  %v4535_v52 = vpop.permute.xlu1 %4534  ;;  %v4539_v25 = vpop.permute.xlu0 %4538  ;;  %v4756_v58 = vrot.slane %v4740_v39, %v8178_v4  ;;  %v6174_v16 = vld [vmem:[%s6274_s8 + $0x60] sm:$0xff] }
 0x67b   : > { %v4964_v29 = vmax.f32 %v4932_v54, 0.0  ;;  %v4965_v2 = vmax.f32 %v4933_v20, 0.0  ;;  %v4902_v57 = vmul.f32 %v4870_v60, %v8486_v56  ;;  %v4903_v19 = vmul.f32 %v4871_v11, %v8487_v17 }
 0x67c   : > { %v4660_v63 = vadd.f32 %v4535_v52, %v8182_v49  ;;  %v4661_v55 = vadd.f32 %v4539_v25, %v8184_v35  ;;  %v8279_v11 = vrot.slane %v4748_v31, %v8178_v4 }
 0x67d   : > { %4996 = vst.msk [vmem:[%s8202_s21 + $0x30] sm:$0xff] %vm336_vm0, %v4964_v29  ;;  %4997 = vst.msk [vmem:[%s8202_s21 + $0x38] sm:$0xff] %vm336_vm0, %v4965_v2  ;;  %v4934_v26 = vadd.f32 %v6170_v6, %v4902_v57  ;;  %v4935_v32 = vadd.f32 %v6171_v10, %v4903_v19  ;;  %v8493_v2 = vld [vmem:[#allocation20_spill] sm:$0xff]  ;;  %v4817_v57 = vrot.slane %v4756_v58, %v8164_v41 }
 0x67e   : > { %v4872_v50 = vadd.f32 %v4805_v9, %v4660_v63  ;;  %v4873_v34 = vadd.f32 %v4805_v9, %v4661_v55  ;;  %v4546_v61 = vpop.permute.xlu1 %4545  ;;  %v4550_v21 = vpop.permute.xlu0 %4549  ;;  %v6176_v9 = vld [vmem:[%s6274_s8 + $0x70] sm:$0xff]  ;;  %v6177_v55 = vld [vmem:[%s6274_s8 + $0x78] sm:$0xff]  ;;  %v4821_v39 = vrot.slane %v8279_v11, %v8164_v41 }
 0x67f   : > { %v4966_v23 = vmax.f32 %v4934_v26, 0.0  ;;  %v4967_v13 = vmax.f32 %v4935_v32, 0.0  ;;  %v4662_v3 = vadd.f32 %v4546_v61, %v8182_v49  ;;  %v4663_v8 = vadd.f32 %v4550_v21, %v8184_v35 }
 0x680   : > { %v4904_v18 = vmul.f32 %v8488_v51, %v4872_v50  ;;  %v4905_v24 = vmul.f32 %v8489_v42, %v4873_v34  ;;  %v4733_v26 = vcombine.high %v8233_v36, %v8233_v36  ;;  %v6178_v42 = vld [vmem:[%s6274_s8 + $0x80] sm:$0xff] }
 0x681   : > { %4998 = vst.msk [vmem:[%s8202_s21 + $0x40] sm:$0xff] %vm336_vm0, %v4966_v23  ;;  %4999 = vst.msk [vmem:[%s8202_s21 + $0x48] sm:$0xff] %vm336_vm0, %v4967_v13  ;;  %v4874_v5 = vadd.f32 %v4809_v62, %v4662_v3  ;;  %v4875_v22 = vadd.f32 %v4809_v62, %v4663_v8  ;;  %v4778_v62 = vcombine.high %v4756_v58, %v4756_v58  ;;  %v8494_v13 = vld [vmem:[#allocation23_spill] sm:$0xff]  ;;  %v8495_v8 = vld [vmem:[#allocation25_spill] sm:$0xff] }
 0x682   : > { %v4936_v43 = vadd.f32 %v6172_v45, %v4904_v18  ;;  %v4937_v59 = vadd.f32 %v6173_v37, %v4905_v24  ;;  %v4557_v28 = vpop.permute.xlu1 %4556  ;;  %v4561_v44 = vpop.permute.xlu0 %4560 }
 0x683   : > { %v4906_v7 = vmul.f32 %v4874_v5, %v8490_v15  ;;  %v4907_v1 = vmul.f32 %v4875_v22, %v8491_v48  ;;  %v4664_v53 = vadd.f32 %v4557_v28, %v8182_v49  ;;  %v4665_v30 = vadd.f32 %v4561_v44, %v8184_v35  ;;  %v6179_v5 = vld [vmem:[%s6274_s8 + $0x88] sm:$0xff] }
 0x684   : > { %v4968_v33 = vmax.f32 %v4936_v43, 0.0  ;;  %v4969_v27 = vmax.f32 %v4937_v59, 0.0  ;;  %v4825_v45 = vrot.slane %v4778_v62, %v8164_v41  ;;  %v4747_v59 = vrot.slane %v4733_v26, %v8178_v4  ;;  %v8497_v44 = vld [vmem:[#allocation24_spill] sm:$0xff] }
 0x685   : > { %v4938_v40 = vadd.f32 %v6174_v16, %v4906_v7  ;;  %v4939_v47 = vadd.f32 %v6175_v46, %v4907_v1  ;;  %v4876_v54 = vadd.f32 %v4813_v14, %v4664_v53  ;;  %v4877_v12 = vadd.f32 %v4813_v14, %v4665_v30  ;;  %v8496_v14 = vld [vmem:[#allocation22_spill] sm:$0xff]  ;;  %v6180_v30 = vld [vmem:[%s6274_s8 + $0x90] sm:$0xff] }
 0x686   : > { %5000 = vst.msk [vmem:[%s8202_s21 + $0x50] sm:$0xff] %vm336_vm0, %v4968_v33  ;;  %5001 = vst.msk [vmem:[%s8202_s21 + $0x58] sm:$0xff] %vm336_vm0, %v4969_v27  ;;  %v4568_v20 = vpop.permute.xlu1 %4567  ;;  %v4572_v60 = vpop.permute.xlu0 %4571  ;;  %v4780_v53 = vcombine.high %v8279_v11, %v8279_v11  ;;  %v6181_v27 = vld [vmem:[%s6274_s8 + $0x98] sm:$0xff]  ;;  %v8498_v11 = vld [vmem:[#allocation27_spill] sm:$0xff] }
 0x687   : > { %v4970_v52 = vmax.f32 %v4938_v40, 0.0  ;;  %v4971_v25 = vmax.f32 %v4939_v47, 0.0  ;;  %v4908_v29 = vmul.f32 %v8492_v0, %v4876_v54  ;;  %v4909_v56 = vmul.f32 %v8493_v2, %v4877_v12 }
 0x688   : > { %v4666_v17 = vadd.f32 %v4568_v20, %v8182_v49  ;;  %v4667_v19 = vadd.f32 %v4572_v60, %v8184_v35  ;;  %v4763_v54 = vrot.slane %v4747_v59, %v8178_v4  ;;  %v4749_v12 = vcombine.high %v4747_v59, %v4747_v59 }
 0x689   : > { %5002 = vst.msk [vmem:[%s8202_s21 + $0x60] sm:$0xff] %vm336_vm0, %v4970_v52  ;;  %5003 = vst.msk [vmem:[%s8202_s21 + $0x68] sm:$0xff] %vm336_vm0, %v4971_v25  ;;  %v4940_v63 = vadd.f32 %v6176_v9, %v4908_v29  ;;  %v4941_v6 = vadd.f32 %v6177_v55, %v4909_v56  ;;  %v8499_v25 = vld [vmem:[#allocation29_spill] sm:$0xff]  ;;  %v4829_v29 = vrot.slane %v4780_v53, %v8164_v41 }
 0x68a   : > { %v4878_v10 = vadd.f32 %v4817_v57, %v4666_v17  ;;  %v4879_v32 = vadd.f32 %v4817_v57, %v4667_v19  ;;  %v4579_v50 = vpop.permute.xlu1 %4578  ;;  %v4583_v34 = vpop.permute.xlu0 %4582  ;;  %v6182_v57 = vld [vmem:[%s6274_s8 + $0xa0] sm:$0xff]  ;;  %v6183_v19 = vld [vmem:[%s6274_s8 + $0xa8] sm:$0xff] }
 0x68b   : > { %v4972_v61 = vmax.f32 %v4940_v63, 0.0  ;;  %v4973_v21 = vmax.f32 %v4941_v6, 0.0  ;;  %v4668_v38 = vadd.f32 %v4579_v50, %v8182_v49  ;;  %v4669_v23 = vadd.f32 %v4583_v34, %v8184_v35 }
 0x68c   : > { %v4910_v3 = vmul.f32 %v4878_v10, %v8494_v13  ;;  %v4911_v36 = vmul.f32 %v4879_v32, %v8495_v8  ;;  %v4833_v6 = vrot.slane %v4763_v54, %v8164_v41  ;;  %v4777_v32 = vrot.slane %v4749_v12, %v8178_v4  ;;  %v6184_v8 = vld [vmem:[%s6274_s8 + $0xb0] sm:$0xff] }
 0x68d   : > { %5004 = vst.msk [vmem:[%s8202_s21 + $0x70] sm:$0xff] %vm336_vm0, %v4972_v61  ;;  %5005 = vst.msk [vmem:[%s8202_s21 + $0x78] sm:$0xff] %vm336_vm0, %v4973_v21  ;;  %v4880_v51 = vadd.f32 %v4821_v39, %v4668_v38  ;;  %v4881_v18 = vadd.f32 %v4821_v39, %v4669_v23  ;;  %v8500_v61 = vld [vmem:[#allocation26_spill] sm:$0xff]  ;;  %v8501_v38 = vld [vmem:[#allocation28_spill] sm:$0xff] }
 0x68e   : > { %v4942_v24 = vadd.f32 %v6178_v42, %v4910_v3  ;;  %v4943_v22 = vadd.f32 %v6179_v5, %v4911_v36  ;;  %v4590_v43 = vpop.permute.xlu1 %4589  ;;  %v4594_v37 = vpop.permute.xlu0 %4593  ;;  %v6185_v36 = vld [vmem:[%s6274_s8 + $0xb8] sm:$0xff]  ;;  %v8502_v5 = vld [vmem:[#allocation32_spill] sm:$0xff] }
 0x68f   : > { %v4912_v28 = vmul.f32 %v8496_v14, %v4880_v51  ;;  %v4913_v31 = vmul.f32 %v8497_v44, %v4881_v18  ;;  %v4670_v15 = vadd.f32 %v4590_v43, %v8182_v49  ;;  %v4671_v7 = vadd.f32 %v4594_v37, %v8184_v35 }
 0x690   : > { %v4974_v48 = vmax.f32 %v4942_v24, 0.0  ;;  %v4975_v1 = vmax.f32 %v4943_v22, 0.0  ;;  %v4837_v18 = vrot.slane %v4777_v32, %v8164_v41  ;;  %v4779_v44 = vcombine.high %v4763_v54, %v4763_v54 }
 0x691   : > { %v4944_v33 = vadd.f32 %v6180_v30, %v4912_v28  ;;  %v4945_v58 = vadd.f32 %v6181_v27, %v4913_v31  ;;  %v4882_v16 = vadd.f32 %v4825_v45, %v4670_v15  ;;  %v4883_v40 = vadd.f32 %v4825_v45, %v4671_v7  ;;  %v8503_v45 = vld [vmem:[#allocation34_spill] sm:$0xff]  ;;  %v6186_v31 = vld [vmem:[%s6274_s8 + $0xc0] sm:$0xff]  ;;  %v6187_v7 = vld [vmem:[%s6274_s8 + $0xc8] sm:$0xff] }
 0x692   : > { %5006 = vst.msk [vmem:[%s8202_s21 + $0x80] sm:$0xff] %vm336_vm0, %v4974_v48  ;;  %5007 = vst.msk [vmem:[%s8202_s21 + $0x88] sm:$0xff] %vm336_vm0, %v4975_v1  ;;  %v4601_v46 = vpop.permute.xlu1 %4600  ;;  %v4605_v47 = vpop.permute.xlu0 %4604  ;;  %v4781_v27 = vcombine.high %v4777_v32, %v4777_v32  ;;  %v4841_v12 = vrot.slane %v4779_v44, %v8164_v41 }
 0x693   : > { %v4976_v20 = vmax.f32 %v4944_v33, 0.0  ;;  %v4977_v60 = vmax.f32 %v4945_v58, 0.0  ;;  %v4914_v52 = vmul.f32 %v4882_v16, %v8498_v11  ;;  %v4915_v0 = vmul.f32 %v4883_v40, %v8499_v25  ;;  %v8504_v40 = vld [vmem:[#allocation31_spill] sm:$0xff]  ;;  %v6188_v11 = vld [vmem:[%s6274_s8 + $0xd0] sm:$0xff]  ;;  %v6189_v25 = vld [vmem:[%s6274_s8 + $0xd8] sm:$0xff] }
 0x694   : > { %v4672_v2 = vadd.f32 %v4601_v46, %v8182_v49  ;;  %v4673_v56 = vadd.f32 %v4605_v47, %v8184_v35  ;;  %v8505_v47 = vld [vmem:[#allocation33_spill] sm:$0xff] }
 0x695   : > { %5008 = vst.msk [vmem:[%s8202_s21 + $0x90] sm:$0xff] %vm336_vm0, %v4976_v20  ;;  %5009 = vst.msk [vmem:[%s8202_s21 + $0x98] sm:$0xff] %vm336_vm0, %v4977_v60  ;;  %v4946_v17 = vadd.f32 %v6182_v57, %v4914_v52  ;;  %v4947_v9 = vadd.f32 %v6183_v19, %v4915_v0 }
 0x696   : > { %v4884_v63 = vadd.f32 %v4829_v29, %v4672_v2  ;;  %v4885_v55 = vadd.f32 %v4829_v29, %v4673_v56  ;;  %v4612_v26 = vpop.permute.xlu1 %4611  ;;  %v4616_v10 = vpop.permute.xlu0 %4615  ;;  %v4845_v56 = vrot.slane %v4781_v27, %v8164_v41 }
 0x697   : > { %v4978_v39 = vmax.f32 %v4946_v17, 0.0  ;;  %v4979_v50 = vmax.f32 %v4947_v9, 0.0  ;;  %v4674_v34 = vadd.f32 %v4612_v26, %v8182_v49  ;;  %v4675_v62 = vadd.f32 %v4616_v10, %v8184_v35  ;;  %v8507_v10 = vld [vmem:[#allocation41_spill] sm:$0xff] }
 0x698   : > { %v4916_v21 = vmul.f32 %v8500_v61, %v4884_v63  ;;  %v4917_v23 = vmul.f32 %v8501_v38, %v4885_v55 }
 0x699   : > { %5010 = vst.msk [vmem:[%s8202_s21 + $0xa0] sm:$0xff] %vm336_vm0, %v4978_v39  ;;  %5011 = vst.msk [vmem:[%s8202_s21 + $0xa8] sm:$0xff] %vm336_vm0, %v4979_v50  ;;  %v4886_v13 = vadd.f32 %v4833_v6, %v4674_v34  ;;  %v4887_v3 = vadd.f32 %v4833_v6, %v4675_v62  ;;  %v8506_v6 = vld [vmem:[#allocation39_spill] sm:$0xff] }
 0x69a   : > { %v4948_v4 = vadd.f32 %v6184_v8, %v4916_v21  ;;  %v4949_v51 = vadd.f32 %v6185_v36, %v4917_v23  ;;  %v4623_v42 = vpop.permute.xlu1 %4622  ;;  %v4627_v24 = vpop.permute.xlu0 %4626  ;;  %v6190_v50 = vld [vmem:[%s6274_s8 + $0xe0] sm:$0xff]  ;;  %v8509_v21 = vld [vmem:[#allocation40_spill] sm:$0xff] }
 0x69b   : > { %v4918_v22 = vmul.f32 %v4886_v13, %v8502_v5  ;;  %v4919_v43 = vmul.f32 %v4887_v3, %v8503_v45  ;;  %v4676_v37 = vadd.f32 %v4623_v42, %v8182_v49  ;;  %v4677_v59 = vadd.f32 %v4627_v24, %v8184_v35  ;;  %v6192_v3 = vld [vmem:[%s6274_s8 + $0xf0] sm:$0xff] }
 0x69c   : > { %v4980_v14 = vmax.f32 %v4948_v4, 0.0  ;;  %v4981_v28 = vmax.f32 %v4949_v51, 0.0  ;;  %v6193_v4 = vld [vmem:[%s6274_s8 + $0xf8] sm:$0xff] }
 0x69d   : > { %v4950_v15 = vadd.f32 %v6186_v31, %v4918_v22  ;;  %v4951_v48 = vadd.f32 %v6187_v7, %v4919_v43  ;;  %v4888_v1 = vadd.f32 %v4837_v18, %v4676_v37  ;;  %v4889_v53 = vadd.f32 %v4837_v18, %v4677_v59 }
 0x69e   : > { %5012 = vst.msk [vmem:[%s8202_s21 + $0xb0] sm:$0xff] %vm336_vm0, %v4980_v14  ;;  %5013 = vst.msk [vmem:[%s8202_s21 + $0xb8] sm:$0xff] %vm336_vm0, %v4981_v28  ;;  %v4634_v30 = vpop.permute.xlu1 %4633  ;;  %v4638_v33 = vpop.permute.xlu0 %4637 }
 0x69f   : > { %v4982_v58 = vmax.f32 %v4950_v15, 0.0  ;;  %v4983_v16 = vmax.f32 %v4951_v48, 0.0  ;;  %v4920_v46 = vmul.f32 %v8504_v40, %v4888_v1  ;;  %v4921_v54 = vmul.f32 %v8505_v47, %v4889_v53 }
 0x6a0   : > { %v4678_v20 = vadd.f32 %v4634_v30, %v8182_v49  ;;  %v4679_v60 = vadd.f32 %v4638_v33, %v8184_v35 }
 0x6a1   : > { %5014 = vst.msk [vmem:[%s8202_s21 + $0xc0] sm:$0xff] %vm336_vm0, %v4982_v58  ;;  %5015 = vst.msk [vmem:[%s8202_s21 + $0xc8] sm:$0xff] %vm336_vm0, %v4983_v16  ;;  %v4952_v52 = vadd.f32 %v6188_v11, %v4920_v46  ;;  %v4953_v0 = vadd.f32 %v6189_v25, %v4921_v54 }
 0x6a2   : > { %v4890_v29 = vadd.f32 %v4841_v12, %v4678_v20  ;;  %v4891_v2 = vadd.f32 %v4841_v12, %v4679_v60  ;;  %v4645_v57 = vpop.permute.xlu1 %4644  ;;  %v4649_v17 = vpop.permute.xlu0 %4648 }
 0x6a3   : > { %v4984_v19 = vmax.f32 %v4952_v52, 0.0  ;;  %v4985_v9 = vmax.f32 %v4953_v0, 0.0  ;;  %v4680_v63 = vadd.f32 %v4645_v57, %v8182_v49  ;;  %v4681_v55 = vadd.f32 %v4649_v17, %v8184_v35  ;;  %v6191_v49 = vld [vmem:[%s6274_s8 + $0xe8] sm:$0xff]  ;;  %v8508_v35 = vld [vmem:[#allocation38_spill] sm:$0xff] }
 0x6a4   : > { %v4922_v26 = vmul.f32 %v4890_v29, %v8506_v6  ;;  %v4923_v32 = vmul.f32 %v4891_v2, %v8507_v10 }
 0x6a5   : > { %5016 = vst.msk [vmem:[%s8202_s21 + $0xd0] sm:$0xff] %vm336_vm0, %v4984_v19  ;;  %5017 = vst.msk [vmem:[%s8202_s21 + $0xd8] sm:$0xff] %vm336_vm0, %v4985_v9  ;;  %v4892_v41 = vadd.f32 %v4845_v56, %v4680_v63  ;;  %v4893_v39 = vadd.f32 %v4845_v56, %v4681_v55 }
 0x6a6   : > { %v4954_v34 = vadd.f32 %v6190_v50, %v4922_v26  ;;  %v4955_v62 = vadd.f32 %v6191_v49, %v4923_v32 }
 0x6a7   : > { %v4924_v61 = vmul.f32 %v8508_v35, %v4892_v41  ;;  %v4925_v38 = vmul.f32 %v8509_v21, %v4893_v39 }
 0x6a8   : > { %v4986_v23 = vmax.f32 %v4954_v34, 0.0  ;;  %v4987_v13 = vmax.f32 %v4955_v62, 0.0 }
 0x6a9   : > { %v4956_v8 = vadd.f32 %v6192_v3, %v4924_v61  ;;  %v4957_v36 = vadd.f32 %v6193_v4, %v4925_v38 }
 0x6aa   : > { %5018 = vst.msk [vmem:[%s8202_s21 + $0xe0] sm:$0xff] %vm336_vm0, %v4986_v23  ;;  %5019 = vst.msk [vmem:[%s8202_s21 + $0xe8] sm:$0xff] %vm336_vm0, %v4987_v13 }
 0x6ab   : > { %v4988_v51 = vmax.f32 %v4956_v8, 0.0  ;;  %v4989_v18 = vmax.f32 %v4957_v36, 0.0 }
 0x6ad   : > { %5020 = vst.msk [vmem:[%s8202_s21 + $0xf0] sm:$0xff] %vm336_vm0, %v4988_v51  ;;  %5021 = vst.msk [vmem:[%s8202_s21 + $0xf8] sm:$0xff] %vm336_vm0, %v4989_v18 }
 0x6ae PF: > { %s17_s24 = sadd.s32 1, %s6200_s24  }
 0x6af   : > { %p14_p4 = scmp.ge.s32.totalorder %s17_s24, 4  }
 0x6b1   :  { %16 = sbr.rel (!%p14_p4) target bundleno = 1 (0x1), region = 81 }

</bundles_post_ra>
